<compile_context>
chip_gen: v5e
topology: v5e:2x2
jax: 0.10.0
libtpu: 0.0.40
codegen_flags: <defaults>
</compile_context>

<pallas_src>
import math

import jax
import jax.numpy as jnp
from jax import lax
from jax.experimental import pallas as pl
from jax.experimental.pallas import tpu as pltpu

# TODO(synk): torch.float16 parameters are mapped to bfloat16 (matmul weights) /
# float32 (LN params, biases, activations); fp16 storage is not TPU-native.
# Matmuls run with bf16 operands and fp32 accumulation, as in PyTorch's fp16 paths.
ACT_DTYPE = jnp.float32     # activations between kernels
W_DTYPE = jnp.bfloat16      # matmul weight storage

# ---------------- scaled-down synthetic configuration ------------------------
B = 2
IMG_HW = 16
PATCH = 4
N_PATCH = (IMG_HW // PATCH) ** 2            # 16 visual tokens
PATCH_DIM = 3 * PATCH * PATCH               # 48
D_IMG = 32                                  # d_image_encoder
D_MODEL = 32                                # LLM hidden size
VOCAB = 128
MAX_POS = 64
N_LAYERS = 4                                # decoder layers
CROSS_IDX = (1, 3)                          # HybridBlip2Flamingo(attn_layers_at=(1, 3))
N_CROSS_HEADS = 4                           # n_attn_heads
NUM_LATENTS = 8                             # PerceiverResampler num_latents (scaled from 64)
N_RES_LAYERS = 2
N_RES_HEADS = 8
NUM_QUERY = 8                               # BLIP-2 query tokens (scaled from 32)
N_DEC_HEADS = 4
N_QF_HEADS = 4
TEXT_LEN = 8                                # total decoder seq = NUM_QUERY + TEXT_LEN = 16 (8-aligned)


# ================================ Pallas kernels ==============================
def _linear(x, w, b, act=None):
    """y = act(x @ w + b);  x:(M,K) fp32, w:(K,N) bf16, b:(1,N) fp32."""
    M, K = x.shape
    N = w.shape[1]

    def kernel(x_ref, w_ref, b_ref, o_ref):
        acc = jnp.dot(x_ref[...].astype(jnp.bfloat16), w_ref[...],
                      preferred_element_type=jnp.float32)
        acc = acc + b_ref[...]
        if act == "gelu":
            # TODO(synk): torch nn.GELU uses exact erf GELU; tanh approximation used here.
            acc = jax.nn.gelu(acc, approximate=True)
        elif act == "relu":
            acc = jnp.maximum(acc, 0.0)
        o_ref[...] = acc.astype(o_ref.dtype)

    return pl.pallas_call(
        kernel,
        out_shape=jax.ShapeDtypeStruct((M, N), ACT_DTYPE),
        grid=(1,),
        in_specs=[
            pl.BlockSpec((M, K), lambda i: (0, 0)),
            pl.BlockSpec((K, N), lambda i: (0, 0)),
            pl.BlockSpec((1, N), lambda i: (0, 0)),
        ],
        out_specs=pl.BlockSpec((M, N), lambda i: (0, 0)),
    )(x, w, b)


def _ln_linear(x, g, b, w):
    """logits = LayerNorm(x) @ w  (final_layer_norm fused into lm_head; no zeros add)."""
    M, D = x.shape
    N = w.shape[1]

    def kernel(x_ref, g_ref, b_ref, w_ref, o_ref):
        z = x_ref[...].astype(jnp.float32)
        mean = jnp.mean(z, axis=-1, keepdims=True)
        zc = z - mean
        var = jnp.mean(zc * zc, axis=-1, keepdims=True)
        h = zc * lax.rsqrt(var + 1e-5) * g_ref[...] + b_ref[...]
        o_ref[...] = jnp.dot(h.astype(jnp.bfloat16), w_ref[...],
                             preferred_element_type=jnp.float32).astype(o_ref.dtype)

    return pl.pallas_call(
        kernel,
        out_shape=jax.ShapeDtypeStruct((M, N), ACT_DTYPE),
        grid=(1,),
        in_specs=[
            pl.BlockSpec((M, D), lambda i: (0, 0)),
            pl.BlockSpec((1, D), lambda i: (0, 0)),
            pl.BlockSpec((1, D), lambda i: (0, 0)),
            pl.BlockSpec((D, N), lambda i: (0, 0)),
        ],
        out_specs=pl.BlockSpec((M, N), lambda i: (0, 0)),
    )(x, g, b, w)


def _fused_block(x, kv, p, num_heads, *, bias=None, act="gelu", full_block=True):
    """One fused transformer block in a single pallas_call, grid=(B,), all heads per step.

    full_block=True : out = LN2(h + MLP(h)),  h = LN1(x + OutProj(MHA(x, kv, kv)))
    full_block=False: out = x + OutProj(MHA(x, kv, kv))          (Q-Former stand-in)

    x:(B,Lq,D)  kv:(B,Lk,D)  bias:(B,Lq,Lk) fp32 additive or None.
    Merged QKV weight (D,3D) bf16; all block weights live in VMEM for the whole block.
    """
    Bx, Lq, D = x.shape
    Lk = kv.shape[1]
    dh = D // num_heads
    scale = 1.0 / math.sqrt(dh)
    has_bias = bias is not None

    def layer_norm(z, g, b):
        mean = jnp.mean(z, axis=-1, keepdims=True)
        zc = z - mean
        var = jnp.mean(zc * zc, axis=-1, keepdims=True)
        return zc * lax.rsqrt(var + 1e-5) * g + b

    def kernel(*refs):
        it = iter(refs)
        x_ref = next(it)
        kv_ref = next(it)
        bias_ref = next(it) if has_bias else None
        wqkv_ref = next(it)
        bqkv_ref = next(it)
        wo_ref = next(it)
        bo_ref = next(it)
        if full_block:
            g1_ref = next(it); be1_ref = next(it)
            w1_ref = next(it); bm1_ref = next(it)
            w2_ref = next(it); bm2_ref = next(it)
            g2_ref = next(it); be2_ref = next(it)
        o_ref = next(it)

        x_f32 = x_ref[0].astype(jnp.float32)                      # (Lq, D)
        x_bf = x_ref[0].astype(jnp.bfloat16)
        kv_bf = kv_ref[0].astype(jnp.bfloat16)

        # merged QKV projection (single matmul per operand, lane width 3*D)
        wqkv = wqkv_ref[...]
        bqkv = bqkv_ref[...]
        q3 = jnp.dot(x_bf, wqkv, preferred_element_type=jnp.float32) + bqkv     # (Lq, 3D)
        kv3 = jnp.dot(kv_bf, wqkv, preferred_element_type=jnp.float32) + bqkv   # (Lk, 3D)
        q = q3[:, :D]
        k = kv3[:, D:2 * D]
        v = kv3[:, 2 * D:]

        # all heads of this batch element in one grid step (unrolled, static slices)
        heads = []
        for h in range(num_heads):
            qh = q[:, h * dh:(h + 1) * dh].astype(jnp.bfloat16)
            kh = k[:, h * dh:(h + 1) * dh].astype(jnp.bfloat16)
            vh = v[:, h * dh:(h + 1) * dh].astype(jnp.bfloat16)
            # contract last dims directly (no in-kernel transpose of k)
            s = lax.dot_general(qh, kh, (((1,), (1,)), ((), ())),
                                preferred_element_type=jnp.float32) * scale     # (Lq, Lk)
            if has_bias:
                s = s + bias_ref[0]
            m = jnp.max(s, axis=-1, keepdims=True)
            pexp = jnp.exp(s - m)
            denom = jnp.sum(pexp, axis=-1, keepdims=True)
            pw = pexp * pl.reciprocal(denom, approx=True)         # divide -> EUP slot
            heads.append(jnp.dot(pw.astype(jnp.bfloat16), vh,
                                 preferred_element_type=jnp.float32))
        attn = jnp.concatenate(heads, axis=-1)                    # (Lq, D) fp32
        attn = jnp.dot(attn.astype(jnp.bfloat16), wo_ref[...],
                       preferred_element_type=jnp.float32) + bo_ref[...]

        if not full_block:
            o_ref[0] = (x_f32 + attn).astype(o_ref.dtype)
            return

        h1 = layer_norm(x_f32 + attn, g1_ref[...], be1_ref[...])  # fp32 LN math

        # MLP (two matmuls, bf16 operands, fp32 accum), hidden width 4*D = 128 lanes
        m1 = jnp.dot(h1.astype(jnp.bfloat16), w1_ref[...],
                     preferred_element_type=jnp.float32) + bm1_ref[...]
        if act == "gelu":
            # TODO(synk): torch nn.GELU uses exact erf GELU; tanh approximation used here.
            m1 = jax.nn.gelu(m1, approximate=True)
        elif act == "relu":
            m1 = jnp.maximum(m1, 0.0)
        m2 = jnp.dot(m1.astype(jnp.bfloat16), w2_ref[...],
                     preferred_element_type=jnp.float32) + bm2_ref[...]
        out = layer_norm(h1 + m2, g2_ref[...], be2_ref[...])
        o_ref[0] = out.astype(o_ref.dtype)

    def full2d(arr):
        r, c = arr.shape
        return pl.BlockSpec((r, c), lambda bb: (0, 0))

    inputs = [x, kv]
    in_specs = [pl.BlockSpec((1, Lq, D), lambda bb: (bb, 0, 0)),
                pl.BlockSpec((1, Lk, D), lambda bb: (bb, 0, 0))]
    if has_bias:
        inputs.append(bias)
        in_specs.append(pl.BlockSpec((1, Lq, Lk), lambda bb: (bb, 0, 0)))
    a = p["attn"]
    w_list = [a["wqkv"], a["bqkv"], a["wo"], a["bo"]]
    if full_block:
        w_list += [p["ln1"]["g"], p["ln1"]["b"], p["w1"], p["b1"],
                   p["w2"], p["b2"], p["ln2"]["g"], p["ln2"]["b"]]
    inputs += w_list
    in_specs += [full2d(w) for w in w_list]

    return pl.pallas_call(
        kernel,
        out_shape=jax.ShapeDtypeStruct((Bx, Lq, D), ACT_DTYPE),
        grid=(Bx,),
        in_specs=in_specs,
        out_specs=pl.BlockSpec((1, Lq, D), lambda bb: (bb, 0, 0)),
        compiler_params=pltpu.CompilerParams(dimension_semantics=("parallel",)),
    )(*inputs)


# ============================ thin JAX glue wrappers ==========================
def linear3d(x, w, b, act=None):
    Bx, L, D = x.shape
    return _linear(x.reshape(Bx * L, D), w, b, act).reshape(Bx, L, w.shape[1])


# ============================ parameter initialization ========================
def _dense(key, d_in, d_out, scale=0.02):
    return jax.random.normal(key, (d_in, d_out), jnp.float32) * scale


def init_attn(key, d):
    ks = jax.random.split(key, 4)
    wqkv = jnp.concatenate(
        [_dense(ks[0], d, d), _dense(ks[1], d, d), _dense(ks[2], d, d)], axis=1)
    return {"wqkv": wqkv.astype(W_DTYPE),
            "bqkv": jnp.zeros((1, 3 * d), jnp.float32),
            "wo": _dense(ks[3], d, d).astype(W_DTYPE),
            "bo": jnp.zeros((1, d), jnp.float32)}


def init_ln(d):
    return {"g": jnp.ones((1, d), jnp.float32), "b": jnp.zeros((1, d), jnp.float32)}


def init_block(key, d):
    """Shared structure for CrossAttentionBlock / PerceiverResamplerLayer / decoder stand-in."""
    ks = jax.random.split(key, 3)
    return {"attn": init_attn(ks[0], d),
            "ln1": init_ln(d), "ln2": init_ln(d),
            "w1": _dense(ks[1], d, 4 * d).astype(W_DTYPE),
            "b1": jnp.zeros((1, 4 * d), jnp.float32),
            "w2": _dense(ks[2], 4 * d, d).astype(W_DTYPE),
            "b2": jnp.zeros((1, d), jnp.float32)}


def init_params(key):
    ks = jax.random.split(key, 13)
    return {
        # frozen BLIP-2 vision encoder stand-in (patch embedding + learned position)
        "patch_w": _dense(ks[0], PATCH_DIM, D_IMG).astype(W_DTYPE),
        "patch_b": jnp.zeros((1, D_IMG), jnp.float32),
        "vis_pos": _dense(ks[1], N_PATCH, D_IMG)[None].astype(ACT_DTYPE),
        # frozen Q-Former stand-in
        "query_tokens": _dense(ks[2], NUM_QUERY, D_IMG).astype(ACT_DTYPE),
        "qformer_attn": init_attn(ks[3], D_IMG),
        "lang_proj_w": _dense(ks[4], D_IMG, D_MODEL).astype(W_DTYPE),
        "lang_proj_b": jnp.zeros((1, D_MODEL), jnp.float32),
        # trainable PerceiverResampler + v_proj
        "latents": jax.random.normal(ks[5], (NUM_LATENTS, D_IMG), jnp.float32).astype(ACT_DTYPE),
        "resampler_layers": [init_block(jax.random.fold_in(ks[6], i), D_IMG)
                             for i in range(N_RES_LAYERS)],
        "v_proj_w": _dense(ks[7], D_IMG, D_MODEL).astype(W_DTYPE),
        "v_proj_b": jnp.zeros((1, D_MODEL), jnp.float32),
        # frozen OPT decoder stand-in
        "embed_tokens": _dense(ks[8], VOCAB, D_MODEL).astype(ACT_DTYPE),
        "embed_positions": _dense(ks[9], MAX_POS, D_MODEL).astype(ACT_DTYPE),
        "decoder_layers": [init_block(jax.random.fold_in(ks[10], i), D_MODEL)
                           for i in range(N_LAYERS)],
        "final_ln": init_ln(D_MODEL),
        "lm_head_w": _dense(ks[11], D_MODEL, VOCAB).astype(W_DTYPE),
        # trainable Flamingo cross-attention blocks at CROSS_IDX
        "cross_attn_blocks": {str(i): init_block(jax.random.fold_in(ks[12], i), D_MODEL)
                              for i in CROSS_IDX},
    }


# =============================== model forward ================================
def encode_image(params, images):
    # TODO(synk): frozen BLIP-2 ViT replaced by a synthetic patch-embedding encoder.
    Bx, C, H, W = images.shape
    nh, nw = H // PATCH, W // PATCH
    patches = images.reshape(Bx, C, nh, PATCH, nw, PATCH)
    patches = patches.transpose(0, 2, 4, 1, 3, 5).reshape(Bx * nh * nw, C * PATCH * PATCH)
    emb = _linear(patches, params["patch_w"], params["patch_b"]).reshape(Bx, nh * nw, D_IMG)
    return emb + params["vis_pos"]


def qformer(params, v_enc):
    # TODO(synk): frozen BLIP-2 Q-Former replaced by one synthetic cross-attention over image features.
    Bx = v_enc.shape[0]
    q = jnp.broadcast_to(params["query_tokens"][None], (Bx, NUM_QUERY, D_IMG)).astype(ACT_DTYPE)
    return _fused_block(q, v_enc, {"attn": params["qformer_attn"]}, N_QF_HEADS,
                        full_block=False)


def perceiver_resampler(params, patch_embeds):
    Bx = patch_embeds.shape[0]
    lat = jnp.broadcast_to(params["latents"][None],
                           (Bx, NUM_LATENTS, D_IMG)).astype(patch_embeds.dtype)
    for lp in params["resampler_layers"]:
        kv = jnp.concatenate([patch_embeds, lat], axis=1)        # cat([x_f, x], dim=1)
        lat = _fused_block(lat, kv, lp, N_RES_HEADS, act="gelu") # LN(x+attn); LN(x+ffw)
    return lat


def build_self_attn_bias(attention_mask):
    Bx, L = attention_mask.shape
    causal = jnp.tril(jnp.ones((L, L), dtype=bool))
    allowed = causal[None, :, :] & (attention_mask[:, None, :] > 0)
    return jnp.where(allowed, 0.0, -1e9).astype(jnp.float32)     # (B, L, L) additive


def hybrid_blip2_flamingo_forward(params, images, text_ids, text_attention_mask):
    Bx = images.shape[0]
    v_image_encodings = encode_image(params, images)                        # (B, S_v, D_IMG)
    q_out = qformer(params, v_image_encodings)                              # (B, NQ, D_IMG)
    q_features = linear3d(q_out, params["lang_proj_w"], params["lang_proj_b"])

    lat = perceiver_resampler(params, v_image_encodings)                    # (B, NUM_LATENTS, D_IMG)
    v_tokens = linear3d(lat, params["v_proj_w"], params["v_proj_b"])        # (B, NUM_LATENTS, D_MODEL)

    L = text_ids.shape[1]
    text_embeds = params["embed_tokens"][text_ids]                          # embed_tokens
    # TODO(synk): real OPT positional embedding applies a +2 offset; synthetic table indexed directly.
    text_embeds = text_embeds + params["embed_positions"][jnp.arange(L)][None]

    input_embeds = jnp.concatenate([q_features, text_embeds], axis=1)
    prefix_mask = jnp.ones((Bx, NUM_QUERY), text_attention_mask.dtype)
    attention_mask = jnp.concatenate([prefix_mask, text_attention_mask], axis=1)
    bias = build_self_attn_bias(attention_mask)

    hidden = input_embeds
    for i, lp in enumerate(params["decoder_layers"]):
        # TODO(synk): frozen HuggingFace OPT decoder layer replaced by a synthetic
        # self-attention + ReLU-FFN stand-in (same (hidden, extra) tuple contract).
        hidden = _fused_block(hidden, hidden, lp, N_DEC_HEADS, bias=bias, act="relu")
        if i in CROSS_IDX:                                                   # DecoderLayerWithCrossAttn
            hidden = _fused_block(hidden, v_tokens,
                                  params["cross_attn_blocks"][str(i)],
                                  N_CROSS_HEADS, act="gelu")

    Lfull = hidden.shape[1]
    logits = _ln_linear(hidden.reshape(Bx * Lfull, D_MODEL),                 # final_layer_norm + lm_head
                        params["final_ln"]["g"], params["final_ln"]["b"],
                        params["lm_head_w"]).reshape(Bx, Lfull, VOCAB)
    # labels=None path: no cross-entropy loss computed.
    return {"logits": logits, "loss": None}


# ==================================== main ====================================
if __name__ == "__main__":
    key = jax.random.PRNGKey(0)
    kp, ki, kt = jax.random.split(key, 3)
    params = init_params(kp)

    images = jax.random.normal(ki, (B, 3, IMG_HW, IMG_HW), ACT_DTYPE)        # NCHW like PyTorch
    text_ids = jax.random.randint(kt, (B, TEXT_LEN), 0, VOCAB)
    text_attention_mask = jnp.array(
        [[1] * TEXT_LEN, [1] * (TEXT_LEN - 2) + [0, 0]], dtype=jnp.int32)    # padded example

    fwd = jax.jit(hybrid_blip2_flamingo_forward)
    out = fwd(params, images, text_ids, text_attention_mask)
    logits = jax.block_until_ready(out["logits"])
    assert logits.shape == (B, NUM_QUERY + TEXT_LEN, VOCAB)
    print("KERNEL_OK")
</pallas_src>

<mosaic_0001>
module attributes {stable_mosaic.version = 11 : i64} {
  func.func @kernel(%arg0: i32, %arg1: memref<32x48xf32, #tpu.memory_space<vmem>>, %arg2: memref<48x32xbf16, #tpu.memory_space<vmem>>, %arg3: memref<1x32xf32, #tpu.memory_space<vmem>>, %arg4: memref<32x32xf32, #tpu.memory_space<vmem>>) attributes {dimension_semantics = [#tpu.dimension_semantics<arbitrary>], iteration_bounds = array<i64: 1>, scalar_prefetch = 0 : i64, scratch_operands = 0 : i64, tpu.core_type = #tpu.core_type<tc>, window_params = [{pipeline_mode = #tpu.pipeline_mode<synchronous>, transform_indices = @transform_0, window_bounds = array<i64: 32, 48>}, {pipeline_mode = #tpu.pipeline_mode<synchronous>, transform_indices = @transform_1, window_bounds = array<i64: 48, 32>}, {pipeline_mode = #tpu.pipeline_mode<synchronous>, transform_indices = @transform_2, window_bounds = array<i64: 1, 32>}, {pipeline_mode = #tpu.pipeline_mode<synchronous>, transform_indices = @transform_3, window_bounds = array<i64: 32, 32>}]} {
    %c0 = arith.constant 0 : index
    %c0_0 = arith.constant 0 : index
    %0 = vector.load %arg1[%c0, %c0_0] : memref<32x48xf32, #tpu.memory_space<vmem>>, vector<32x48xf32>
    %1 = arith.truncf %0 : vector<32x48xf32> to vector<32x48xbf16>
    %c0_1 = arith.constant 0 : index
    %c0_2 = arith.constant 0 : index
    %2 = vector.load %arg2[%c0_1, %c0_2] : memref<48x32xbf16, #tpu.memory_space<vmem>>, vector<48x32xbf16>
    %cst = arith.constant dense<0.000000e+00> : vector<32x32xf32>
    %3 = tpu.matmul %1, %2, %cst {dimension_numbers = #tpu.dot_dimension_numbers<[1], [0], [0], [1], [0, 0, 1, 1], [], []>} : vector<32x48xbf16>, vector<48x32xbf16>, vector<32x32xf32> -> vector<32x32xf32>
    %c0_3 = arith.constant 0 : index
    %c0_4 = arith.constant 0 : index
    %4 = vector.load %arg3[%c0_3, %c0_4] : memref<1x32xf32, #tpu.memory_space<vmem>>, vector<1x32xf32>
    %5 = vector.broadcast %4 : vector<1x32xf32> to vector<32x32xf32>
    %6 = arith.addf %3, %5 : vector<32x32xf32>
    %c0_5 = arith.constant 0 : index
    %c0_6 = arith.constant 0 : index
    %7 = vector.load %arg4[%c0_5, %c0_6] : memref<32x32xf32, #tpu.memory_space<vmem>>, vector<32x32xf32>
    tpu.vector_store %arg4[%c0_5, %c0_6], %6 {strides = array<i32>} : memref<32x32xf32, #tpu.memory_space<vmem>>, vector<32x32xf32>,
    return
  }
  func.func @transform_0(%arg0: i32) -> (i32, i32) {
    %c0_i32 = arith.constant 0 : i32
    %c0_i32_0 = arith.constant 0 : i32
    %c0_i32_1 = arith.constant 0 : i32
    return %c0_i32, %c0_i32_0 : i32, i32
  }
  func.func @transform_1(%arg0: i32) -> (i32, i32) {
    %c0_i32 = arith.constant 0 : i32
    %c0_i32_0 = arith.constant 0 : i32
    %c0_i32_1 = arith.constant 0 : i32
    return %c0_i32, %c0_i32_0 : i32, i32
  }
  func.func @transform_2(%arg0: i32) -> (i32, i32) {
    %c0_i32 = arith.constant 0 : i32
    %c0_i32_0 = arith.constant 0 : i32
    %c0_i32_1 = arith.constant 0 : i32
    return %c0_i32, %c0_i32_0 : i32, i32
  }
  func.func @transform_3(%arg0: i32) -> (i32, i32) {
    %c0_i32 = arith.constant 0 : i32
    %c0_i32_0 = arith.constant 0 : i32
    %c0_i32_1 = arith.constant 0 : i32
    return %c0_i32, %c0_i32_0 : i32, i32
  }
}

module attributes {stable_mosaic.version = 11 : i64} {
  func.func @kernel(%arg0: i32, %arg1: memref<16x32xf32, #tpu.memory_space<vmem>>, %arg2: memref<32x32xbf16, #tpu.memory_space<vmem>>, %arg3: memref<1x32xf32, #tpu.memory_space<vmem>>, %arg4: memref<16x32xf32, #tpu.memory_space<vmem>>) attributes {dimension_semantics = [#tpu.dimension_semantics<arbitrary>], iteration_bounds = array<i64: 1>, scalar_prefetch = 0 : i64, scratch_operands = 0 : i64, tpu.core_type = #tpu.core_type<tc>, window_params = [{pipeline_mode = #tpu.pipeline_mode<synchronous>, transform_indices = @transform_0, window_bounds = array<i64: 16, 32>}, {pipeline_mode = #tpu.pipeline_mode<synchronous>, transform_indices = @transform_1, window_bounds = array<i64: 32, 32>}, {pipeline_mode = #tpu.pipeline_mode<synchronous>, transform_indices = @transform_2, window_bounds = array<i64: 1, 32>}, {pipeline_mode = #tpu.pipeline_mode<synchronous>, transform_indices = @transform_3, window_bounds = array<i64: 16, 32>}]} {
    %c0 = arith.constant 0 : index
    %c0_0 = arith.constant 0 : index
    %0 = vector.load %arg1[%c0, %c0_0] : memref<16x32xf32, #tpu.memory_space<vmem>>, vector<16x32xf32>
    %1 = arith.truncf %0 : vector<16x32xf32> to vector<16x32xbf16>
    %c0_1 = arith.constant 0 : index
    %c0_2 = arith.constant 0 : index
    %2 = vector.load %arg2[%c0_1, %c0_2] : memref<32x32xbf16, #tpu.memory_space<vmem>>, vector<32x32xbf16>
    %cst = arith.constant dense<0.000000e+00> : vector<16x32xf32>
    %3 = tpu.matmul %1, %2, %cst {dimension_numbers = #tpu.dot_dimension_numbers<[1], [0], [0], [1], [0, 0, 1, 1], [], []>} : vector<16x32xbf16>, vector<32x32xbf16>, vector<16x32xf32> -> vector<16x32xf32>
    %c0_3 = arith.constant 0 : index
    %c0_4 = arith.constant 0 : index
    %4 = vector.load %arg3[%c0_3, %c0_4] : memref<1x32xf32, #tpu.memory_space<vmem>>, vector<1x32xf32>
    %5 = vector.broadcast %4 : vector<1x32xf32> to vector<16x32xf32>
    %6 = arith.addf %3, %5 : vector<16x32xf32>
    %c0_5 = arith.constant 0 : index
    %c0_6 = arith.constant 0 : index
    %7 = vector.load %arg4[%c0_5, %c0_6] : memref<16x32xf32, #tpu.memory_space<vmem>>, vector<16x32xf32>
    tpu.vector_store %arg4[%c0_5, %c0_6], %6 {strides = array<i32>} : memref<16x32xf32, #tpu.memory_space<vmem>>, vector<16x32xf32>,
    return
  }
  func.func @transform_0(%arg0: i32) -> (i32, i32) {
    %c0_i32 = arith.constant 0 : i32
    %c0_i32_0 = arith.constant 0 : i32
    %c0_i32_1 = arith.constant 0 : i32
    return %c0_i32, %c0_i32_0 : i32, i32
  }
  func.func @transform_1(%arg0: i32) -> (i32, i32) {
    %c0_i32 = arith.constant 0 : i32
    %c0_i32_0 = arith.constant 0 : i32
    %c0_i32_1 = arith.constant 0 : i32
    return %c0_i32, %c0_i32_0 : i32, i32
  }
  func.func @transform_2(%arg0: i32) -> (i32, i32) {
    %c0_i32 = arith.constant 0 : i32
    %c0_i32_0 = arith.constant 0 : i32
    %c0_i32_1 = arith.constant 0 : i32
    return %c0_i32, %c0_i32_0 : i32, i32
  }
  func.func @transform_3(%arg0: i32) -> (i32, i32) {
    %c0_i32 = arith.constant 0 : i32
    %c0_i32_0 = arith.constant 0 : i32
    %c0_i32_1 = arith.constant 0 : i32
    return %c0_i32, %c0_i32_0 : i32, i32
  }
}

module attributes {stable_mosaic.version = 11 : i64} {
  func.func @kernel(%arg0: i32, %arg1: memref<1x8x32xf32, #tpu.memory_space<vmem>>, %arg2: memref<1x24x32xf32, #tpu.memory_space<vmem>>, %arg3: memref<32x96xbf16, #tpu.memory_space<vmem>>, %arg4: memref<1x96xf32, #tpu.memory_space<vmem>>, %arg5: memref<32x32xbf16, #tpu.memory_space<vmem>>, %arg6: memref<1x32xf32, #tpu.memory_space<vmem>>, %arg7: memref<1x32xf32, #tpu.memory_space<vmem>>, %arg8: memref<1x32xf32, #tpu.memory_space<vmem>>, %arg9: memref<32x128xbf16, #tpu.memory_space<vmem>>, %arg10: memref<1x128xf32, #tpu.memory_space<vmem>>, %arg11: memref<128x32xbf16, #tpu.memory_space<vmem>>, %arg12: memref<1x32xf32, #tpu.memory_space<vmem>>, %arg13: memref<1x32xf32, #tpu.memory_space<vmem>>, %arg14: memref<1x32xf32, #tpu.memory_space<vmem>>, %arg15: memref<1x8x32xf32, #tpu.memory_space<vmem>>) attributes {dimension_semantics = [#tpu.dimension_semantics<parallel>], iteration_bounds = array<i64: 2>, scalar_prefetch = 0 : i64, scratch_operands = 0 : i64, tpu.core_type = #tpu.core_type<tc>, window_params = [{transform_indices = @transform_0, window_bounds = array<i64: 1, 8, 32>}, {transform_indices = @transform_1, window_bounds = array<i64: 1, 24, 32>}, {pipeline_mode = #tpu.pipeline_mode<synchronous>, transform_indices = @transform_2, window_bounds = array<i64: 32, 96>}, {pipeline_mode = #tpu.pipeline_mode<synchronous>, transform_indices = @transform_3, window_bounds = array<i64: 1, 96>}, {pipeline_mode = #tpu.pipeline_mode<synchronous>, transform_indices = @transform_4, window_bounds = array<i64: 32, 32>}, {pipeline_mode = #tpu.pipeline_mode<synchronous>, transform_indices = @transform_5, window_bounds = array<i64: 1, 32>}, {pipeline_mode = #tpu.pipeline_mode<synchronous>, transform_indices = @transform_6, window_bounds = array<i64: 1, 32>}, {pipeline_mode = #tpu.pipeline_mode<synchronous>, transform_indices = @transform_7, window_bounds = array<i64: 1, 32>}, {pipeline_mode = #tpu.pipeline_mode<synchronous>, transform_indices = @transform_8, window_bounds = array<i64: 32, 128>}, {pipeline_mode = #tpu.pipeline_mode<synchronous>, transform_indices = @transform_9, window_bounds = array<i64: 1, 128>}, {pipeline_mode = #tpu.pipeline_mode<synchronous>, transform_indices = @transform_10, window_bounds = array<i64: 128, 32>}, {pipeline_mode = #tpu.pipeline_mode<synchronous>, transform_indices = @transform_11, window_bounds = array<i64: 1, 32>}, {pipeline_mode = #tpu.pipeline_mode<synchronous>, transform_indices = @transform_12, window_bounds = array<i64: 1, 32>}, {pipeline_mode = #tpu.pipeline_mode<synchronous>, transform_indices = @transform_13, window_bounds = array<i64: 1, 32>}, {transform_indices = @transform_14, window_bounds = array<i64: 1, 8, 32>}]} {
    %c0 = arith.constant 0 : index
    %c0_0 = arith.constant 0 : index
    %c0_1 = arith.constant 0 : index
    %0 = vector.load %arg1[%c0, %c0_0, %c0_1] : memref<1x8x32xf32, #tpu.memory_space<vmem>>, vector<1x8x32xf32>
    %1 = vector.shape_cast %0 : vector<1x8x32xf32> to vector<8x32xf32>
    %c0_2 = arith.constant 0 : index
    %c0_3 = arith.constant 0 : index
    %c0_4 = arith.constant 0 : index
    %2 = vector.load %arg1[%c0_2, %c0_3, %c0_4] : memref<1x8x32xf32, #tpu.memory_space<vmem>>, vector<1x8x32xf32>
    %3 = vector.shape_cast %2 : vector<1x8x32xf32> to vector<8x32xf32>
    %4 = arith.truncf %3 : vector<8x32xf32> to vector<8x32xbf16>
    %c0_5 = arith.constant 0 : index
    %c0_6 = arith.constant 0 : index
    %c0_7 = arith.constant 0 : index
    %5 = vector.load %arg2[%c0_5, %c0_6, %c0_7] : memref<1x24x32xf32, #tpu.memory_space<vmem>>, vector<1x24x32xf32>
    %6 = vector.shape_cast %5 : vector<1x24x32xf32> to vector<24x32xf32>
    %7 = arith.truncf %6 : vector<24x32xf32> to vector<24x32xbf16>
    %c0_8 = arith.constant 0 : index
    %c0_9 = arith.constant 0 : index
    %8 = vector.load %arg3[%c0_8, %c0_9] : memref<32x96xbf16, #tpu.memory_space<vmem>>, vector<32x96xbf16>
    %c0_10 = arith.constant 0 : index
    %c0_11 = arith.constant 0 : index
    %9 = vector.load %arg4[%c0_10, %c0_11] : memref<1x96xf32, #tpu.memory_space<vmem>>, vector<1x96xf32>
    %cst = arith.constant dense<0.000000e+00> : vector<8x96xf32>
    %10 = tpu.matmul %4, %8, %cst {dimension_numbers = #tpu.dot_dimension_numbers<[1], [0], [0], [1], [0, 0, 1, 1], [], []>} : vector<8x32xbf16>, vector<32x96xbf16>, vector<8x96xf32> -> vector<8x96xf32>
    %11 = vector.broadcast %9 : vector<1x96xf32> to vector<8x96xf32>
    %12 = arith.addf %10, %11 : vector<8x96xf32>
    %cst_12 = arith.constant dense<0.000000e+00> : vector<24x96xf32>
    %13 = tpu.matmul %7, %8, %cst_12 {dimension_numbers = #tpu.dot_dimension_numbers<[1], [0], [0], [1], [0, 0, 1, 1], [], []>} : vector<24x32xbf16>, vector<32x96xbf16>, vector<24x96xf32> -> vector<24x96xf32>
    %14 = vector.broadcast %9 : vector<1x96xf32> to vector<24x96xf32>
    %15 = arith.addf %13, %14 : vector<24x96xf32>
    %16 = vector.extract_strided_slice %12 {offsets = [0, 0], sizes = [8, 32], strides = [1, 1]} : vector<8x96xf32> to vector<8x32xf32>
    %17 = vector.extract_strided_slice %15 {offsets = [0, 32], sizes = [24, 32], strides = [1, 1]} : vector<24x96xf32> to vector<24x32xf32>
    %18 = vector.extract_strided_slice %15 {offsets = [0, 64], sizes = [24, 32], strides = [1, 1]} : vector<24x96xf32> to vector<24x32xf32>
    %19 = vector.extract_strided_slice %16 {offsets = [0, 0], sizes = [8, 4], strides = [1, 1]} : vector<8x32xf32> to vector<8x4xf32>
    %20 = arith.truncf %19 : vector<8x4xf32> to vector<8x4xbf16>
    %21 = vector.extract_strided_slice %17 {offsets = [0, 0], sizes = [24, 4], strides = [1, 1]} : vector<24x32xf32> to vector<24x4xf32>
    %22 = arith.truncf %21 : vector<24x4xf32> to vector<24x4xbf16>
    %23 = vector.extract_strided_slice %18 {offsets = [0, 0], sizes = [24, 4], strides = [1, 1]} : vector<24x32xf32> to vector<24x4xf32>
    %24 = arith.truncf %23 : vector<24x4xf32> to vector<24x4xbf16>
    %cst_13 = arith.constant dense<0.000000e+00> : vector<8x24xf32>
    %25 = tpu.matmul %20, %22, %cst_13 {dimension_numbers = #tpu.dot_dimension_numbers<[1], [1], [0], [0], [0, 0, 1, 0], [], []>} : vector<8x4xbf16>, vector<24x4xbf16>, vector<8x24xf32> -> vector<8x24xf32>
    %cst_14 = arith.constant 5.000000e-01 : f32
    %26 = vector.broadcast %cst_14 : f32 to vector<8x24xf32>
    %27 = arith.mulf %25, %26 : vector<8x24xf32>
    %cst_15 = arith.constant dense<0xFF800000> : vector<8xf32>
    %28 = vector.multi_reduction <maximumf>, %27, %cst_15 [1] : vector<8x24xf32> to vector<8xf32>
    %29 = vector.shape_cast %28 : vector<8xf32> to vector<8x1xf32>
    %30 = vector.broadcast %29 : vector<8x1xf32> to vector<8x24xf32>
    %31 = arith.subf %27, %30 : vector<8x24xf32>
    %32 = math.exp %31 : vector<8x24xf32>
    %cst_16 = arith.constant dense<0.000000e+00> : vector<8xf32>
    %33 = vector.multi_reduction <add>, %32, %cst_16 [1] : vector<8x24xf32> to vector<8xf32>
    %34 = vector.shape_cast %33 : vector<8xf32> to vector<8x1xf32>
    %35 = tpu.reciprocal %34 {approx = true} : vector<8x1xf32> -> vector<8x1xf32>
    %36 = vector.broadcast %35 : vector<8x1xf32> to vector<8x24xf32>
    %37 = arith.mulf %32, %36 : vector<8x24xf32>
    %38 = arith.truncf %37 : vector<8x24xf32> to vector<8x24xbf16>
    %cst_17 = arith.constant dense<0.000000e+00> : vector<8x4xf32>
    %39 = tpu.matmul %38, %24, %cst_17 {dimension_numbers = #tpu.dot_dimension_numbers<[1], [0], [0], [1], [0, 0, 1, 1], [], []>} : vector<8x24xbf16>, vector<24x4xbf16>, vector<8x4xf32> -> vector<8x4xf32>
    %40 = vector.extract_strided_slice %16 {offsets = [0, 4], sizes = [8, 4], strides = [1, 1]} : vector<8x32xf32> to vector<8x4xf32>
    %41 = arith.truncf %40 : vector<8x4xf32> to vector<8x4xbf16>
    %42 = vector.extract_strided_slice %17 {offsets = [0, 4], sizes = [24, 4], strides = [1, 1]} : vector<24x32xf32> to vector<24x4xf32>
    %43 = arith.truncf %42 : vector<24x4xf32> to vector<24x4xbf16>
    %44 = vector.extract_strided_slice %18 {offsets = [0, 4], sizes = [24, 4], strides = [1, 1]} : vector<24x32xf32> to vector<24x4xf32>
    %45 = arith.truncf %44 : vector<24x4xf32> to vector<24x4xbf16>
    %cst_18 = arith.constant dense<0.000000e+00> : vector<8x24xf32>
    %46 = tpu.matmul %41, %43, %cst_18 {dimension_numbers = #tpu.dot_dimension_numbers<[1], [1], [0], [0], [0, 0, 1, 0], [], []>} : vector<8x4xbf16>, vector<24x4xbf16>, vector<8x24xf32> -> vector<8x24xf32>
    %cst_19 = arith.constant 5.000000e-01 : f32
    %47 = vector.broadcast %cst_19 : f32 to vector<8x24xf32>
    %48 = arith.mulf %46, %47 : vector<8x24xf32>
    %cst_20 = arith.constant dense<0xFF800000> : vector<8xf32>
    %49 = vector.multi_reduction <maximumf>, %48, %cst_20 [1] : vector<8x24xf32> to vector<8xf32>
    %50 = vector.shape_cast %49 : vector<8xf32> to vector<8x1xf32>
    %51 = vector.broadcast %50 : vector<8x1xf32> to vector<8x24xf32>
    %52 = arith.subf %48, %51 : vector<8x24xf32>
    %53 = math.exp %52 : vector<8x24xf32>
    %cst_21 = arith.constant dense<0.000000e+00> : vector<8xf32>
    %54 = vector.multi_reduction <add>, %53, %cst_21 [1] : vector<8x24xf32> to vector<8xf32>
    %55 = vector.shape_cast %54 : vector<8xf32> to vector<8x1xf32>
    %56 = tpu.reciprocal %55 {approx = true} : vector<8x1xf32> -> vector<8x1xf32>
    %57 = vector.broadcast %56 : vector<8x1xf32> to vector<8x24xf32>
    %58 = arith.mulf %53, %57 : vector<8x24xf32>
    %59 = arith.truncf %58 : vector<8x24xf32> to vector<8x24xbf16>
    %cst_22 = arith.constant dense<0.000000e+00> : vector<8x4xf32>
    %60 = tpu.matmul %59, %45, %cst_22 {dimension_numbers = #tpu.dot_dimension_numbers<[1], [0], [0], [1], [0, 0, 1, 1], [], []>} : vector<8x24xbf16>, vector<24x4xbf16>, vector<8x4xf32> -> vector<8x4xf32>
    %61 = vector.extract_strided_slice %16 {offsets = [0, 8], sizes = [8, 4], strides = [1, 1]} : vector<8x32xf32> to vector<8x4xf32>
    %62 = arith.truncf %61 : vector<8x4xf32> to vector<8x4xbf16>
    %63 = vector.extract_strided_slice %17 {offsets = [0, 8], sizes = [24, 4], strides = [1, 1]} : vector<24x32xf32> to vector<24x4xf32>
    %64 = arith.truncf %63 : vector<24x4xf32> to vector<24x4xbf16>
    %65 = vector.extract_strided_slice %18 {offsets = [0, 8], sizes = [24, 4], strides = [1, 1]} : vector<24x32xf32> to vector<24x4xf32>
    %66 = arith.truncf %65 : vector<24x4xf32> to vector<24x4xbf16>
    %cst_23 = arith.constant dense<0.000000e+00> : vector<8x24xf32>
    %67 = tpu.matmul %62, %64, %cst_23 {dimension_numbers = #tpu.dot_dimension_numbers<[1], [1], [0], [0], [0, 0, 1, 0], [], []>} : vector<8x4xbf16>, vector<24x4xbf16>, vector<8x24xf32> -> vector<8x24xf32>
    %cst_24 = arith.constant 5.000000e-01 : f32
    %68 = vector.broadcast %cst_24 : f32 to vector<8x24xf32>
    %69 = arith.mulf %67, %68 : vector<8x24xf32>
    %cst_25 = arith.constant dense<0xFF800000> : vector<8xf32>
    %70 = vector.multi_reduction <maximumf>, %69, %cst_25 [1] : vector<8x24xf32> to vector<8xf32>
    %71 = vector.shape_cast %70 : vector<8xf32> to vector<8x1xf32>
    %72 = vector.broadcast %71 : vector<8x1xf32> to vector<8x24xf32>
    %73 = arith.subf %69, %72 : vector<8x24xf32>
    %74 = math.exp %73 : vector<8x24xf32>
    %cst_26 = arith.constant dense<0.000000e+00> : vector<8xf32>
    %75 = vector.multi_reduction <add>, %74, %cst_26 [1] : vector<8x24xf32> to vector<8xf32>
    %76 = vector.shape_cast %75 : vector<8xf32> to vector<8x1xf32>
    %77 = tpu.reciprocal %76 {approx = true} : vector<8x1xf32> -> vector<8x1xf32>
    %78 = vector.broadcast %77 : vector<8x1xf32> to vector<8x24xf32>
    %79 = arith.mulf %74, %78 : vector<8x24xf32>
    %80 = arith.truncf %79 : vector<8x24xf32> to vector<8x24xbf16>
    %cst_27 = arith.constant dense<0.000000e+00> : vector<8x4xf32>
    %81 = tpu.matmul %80, %66, %cst_27 {dimension_numbers = #tpu.dot_dimension_numbers<[1], [0], [0], [1], [0, 0, 1, 1], [], []>} : vector<8x24xbf16>, vector<24x4xbf16>, vector<8x4xf32> -> vector<8x4xf32>
    %82 = vector.extract_strided_slice %16 {offsets = [0, 12], sizes = [8, 4], strides = [1, 1]} : vector<8x32xf32> to vector<8x4xf32>
    %83 = arith.truncf %82 : vector<8x4xf32> to vector<8x4xbf16>
    %84 = vector.extract_strided_slice %17 {offsets = [0, 12], sizes = [24, 4], strides = [1, 1]} : vector<24x32xf32> to vector<24x4xf32>
    %85 = arith.truncf %84 : vector<24x4xf32> to vector<24x4xbf16>
    %86 = vector.extract_strided_slice %18 {offsets = [0, 12], sizes = [24, 4], strides = [1, 1]} : vector<24x32xf32> to vector<24x4xf32>
    %87 = arith.truncf %86 : vector<24x4xf32> to vector<24x4xbf16>
    %cst_28 = arith.constant dense<0.000000e+00> : vector<8x24xf32>
    %88 = tpu.matmul %83, %85, %cst_28 {dimension_numbers = #tpu.dot_dimension_numbers<[1], [1], [0], [0], [0, 0, 1, 0], [], []>} : vector<8x4xbf16>, vector<24x4xbf16>, vector<8x24xf32> -> vector<8x24xf32>
    %cst_29 = arith.constant 5.000000e-01 : f32
    %89 = vector.broadcast %cst_29 : f32 to vector<8x24xf32>
    %90 = arith.mulf %88, %89 : vector<8x24xf32>
    %cst_30 = arith.constant dense<0xFF800000> : vector<8xf32>
    %91 = vector.multi_reduction <maximumf>, %90, %cst_30 [1] : vector<8x24xf32> to vector<8xf32>
    %92 = vector.shape_cast %91 : vector<8xf32> to vector<8x1xf32>
    %93 = vector.broadcast %92 : vector<8x1xf32> to vector<8x24xf32>
    %94 = arith.subf %90, %93 : vector<8x24xf32>
    %95 = math.exp %94 : vector<8x24xf32>
    %cst_31 = arith.constant dense<0.000000e+00> : vector<8xf32>
    %96 = vector.multi_reduction <add>, %95, %cst_31 [1] : vector<8x24xf32> to vector<8xf32>
    %97 = vector.shape_cast %96 : vector<8xf32> to vector<8x1xf32>
    %98 = tpu.reciprocal %97 {approx = true} : vector<8x1xf32> -> vector<8x1xf32>
    %99 = vector.broadcast %98 : vector<8x1xf32> to vector<8x24xf32>
    %100 = arith.mulf %95, %99 : vector<8x24xf32>
    %101 = arith.truncf %100 : vector<8x24xf32> to vector<8x24xbf16>
    %cst_32 = arith.constant dense<0.000000e+00> : vector<8x4xf32>
    %102 = tpu.matmul %101, %87, %cst_32 {dimension_numbers = #tpu.dot_dimension_numbers<[1], [0], [0], [1], [0, 0, 1, 1], [], []>} : vector<8x24xbf16>, vector<24x4xbf16>, vector<8x4xf32> -> vector<8x4xf32>
    %103 = vector.extract_strided_slice %16 {offsets = [0, 16], sizes = [8, 4], strides = [1, 1]} : vector<8x32xf32> to vector<8x4xf32>
    %104 = arith.truncf %103 : vector<8x4xf32> to vector<8x4xbf16>
    %105 = vector.extract_strided_slice %17 {offsets = [0, 16], sizes = [24, 4], strides = [1, 1]} : vector<24x32xf32> to vector<24x4xf32>
    %106 = arith.truncf %105 : vector<24x4xf32> to vector<24x4xbf16>
    %107 = vector.extract_strided_slice %18 {offsets = [0, 16], sizes = [24, 4], strides = [1, 1]} : vector<24x32xf32> to vector<24x4xf32>
    %108 = arith.truncf %107 : vector<24x4xf32> to vector<24x4xbf16>
    %cst_33 = arith.constant dense<0.000000e+00> : vector<8x24xf32>
    %109 = tpu.matmul %104, %106, %cst_33 {dimension_numbers = #tpu.dot_dimension_numbers<[1], [1], [0], [0], [0, 0, 1, 0], [], []>} : vector<8x4xbf16>, vector<24x4xbf16>, vector<8x24xf32> -> vector<8x24xf32>
    %cst_34 = arith.constant 5.000000e-01 : f32
    %110 = vector.broadcast %cst_34 : f32 to vector<8x24xf32>
    %111 = arith.mulf %109, %110 : vector<8x24xf32>
    %cst_35 = arith.constant dense<0xFF800000> : vector<8xf32>
    %112 = vector.multi_reduction <maximumf>, %111, %cst_35 [1] : vector<8x24xf32> to vector<8xf32>
    %113 = vector.shape_cast %112 : vector<8xf32> to vector<8x1xf32>
    %114 = vector.broadcast %113 : vector<8x1xf32> to vector<8x24xf32>
    %115 = arith.subf %111, %114 : vector<8x24xf32>
    %116 = math.exp %115 : vector<8x24xf32>
    %cst_36 = arith.constant dense<0.000000e+00> : vector<8xf32>
    %117 = vector.multi_reduction <add>, %116, %cst_36 [1] : vector<8x24xf32> to vector<8xf32>
    %118 = vector.shape_cast %117 : vector<8xf32> to vector<8x1xf32>
    %119 = tpu.reciprocal %118 {approx = true} : vector<8x1xf32> -> vector<8x1xf32>
    %120 = vector.broadcast %119 : vector<8x1xf32> to vector<8x24xf32>
    %121 = arith.mulf %116, %120 : vector<8x24xf32>
    %122 = arith.truncf %121 : vector<8x24xf32> to vector<8x24xbf16>
    %cst_37 = arith.constant dense<0.000000e+00> : vector<8x4xf32>
    %123 = tpu.matmul %122, %108, %cst_37 {dimension_numbers = #tpu.dot_dimension_numbers<[1], [0], [0], [1], [0, 0, 1, 1], [], []>} : vector<8x24xbf16>, vector<24x4xbf16>, vector<8x4xf32> -> vector<8x4xf32>
    %124 = vector.extract_strided_slice %16 {offsets = [0, 20], sizes = [8, 4], strides = [1, 1]} : vector<8x32xf32> to vector<8x4xf32>
    %125 = arith.truncf %124 : vector<8x4xf32> to vector<8x4xbf16>
    %126 = vector.extract_strided_slice %17 {offsets = [0, 20], sizes = [24, 4], strides = [1, 1]} : vector<24x32xf32> to vector<24x4xf32>
    %127 = arith.truncf %126 : vector<24x4xf32> to vector<24x4xbf16>
    %128 = vector.extract_strided_slice %18 {offsets = [0, 20], sizes = [24, 4], strides = [1, 1]} : vector<24x32xf32> to vector<24x4xf32>
    %129 = arith.truncf %128 : vector<24x4xf32> to vector<24x4xbf16>
    %cst_38 = arith.constant dense<0.000000e+00> : vector<8x24xf32>
    %130 = tpu.matmul %125, %127, %cst_38 {dimension_numbers = #tpu.dot_dimension_numbers<[1], [1], [0], [0], [0, 0, 1, 0], [], []>} : vector<8x4xbf16>, vector<24x4xbf16>, vector<8x24xf32> -> vector<8x24xf32>
    %cst_39 = arith.constant 5.000000e-01 : f32
    %131 = vector.broadcast %cst_39 : f32 to vector<8x24xf32>
    %132 = arith.mulf %130, %131 : vector<8x24xf32>
    %cst_40 = arith.constant dense<0xFF800000> : vector<8xf32>
    %133 = vector.multi_reduction <maximumf>, %132, %cst_40 [1] : vector<8x24xf32> to vector<8xf32>
    %134 = vector.shape_cast %133 : vector<8xf32> to vector<8x1xf32>
    %135 = vector.broadcast %134 : vector<8x1xf32> to vector<8x24xf32>
    %136 = arith.subf %132, %135 : vector<8x24xf32>
    %137 = math.exp %136 : vector<8x24xf32>
    %cst_41 = arith.constant dense<0.000000e+00> : vector<8xf32>
    %138 = vector.multi_reduction <add>, %137, %cst_41 [1] : vector<8x24xf32> to vector<8xf32>
    %139 = vector.shape_cast %138 : vector<8xf32> to vector<8x1xf32>
    %140 = tpu.reciprocal %139 {approx = true} : vector<8x1xf32> -> vector<8x1xf32>
    %141 = vector.broadcast %140 : vector<8x1xf32> to vector<8x24xf32>
    %142 = arith.mulf %137, %141 : vector<8x24xf32>
    %143 = arith.truncf %142 : vector<8x24xf32> to vector<8x24xbf16>
    %cst_42 = arith.constant dense<0.000000e+00> : vector<8x4xf32>
    %144 = tpu.matmul %143, %129, %cst_42 {dimension_numbers = #tpu.dot_dimension_numbers<[1], [0], [0], [1], [0, 0, 1, 1], [], []>} : vector<8x24xbf16>, vector<24x4xbf16>, vector<8x4xf32> -> vector<8x4xf32>
    %145 = vector.extract_strided_slice %16 {offsets = [0, 24], sizes = [8, 4], strides = [1, 1]} : vector<8x32xf32> to vector<8x4xf32>
    %146 = arith.truncf %145 : vector<8x4xf32> to vector<8x4xbf16>
    %147 = vector.extract_strided_slice %17 {offsets = [0, 24], sizes = [24, 4], strides = [1, 1]} : vector<24x32xf32> to vector<24x4xf32>
    %148 = arith.truncf %147 : vector<24x4xf32> to vector<24x4xbf16>
    %149 = vector.extract_strided_slice %18 {offsets = [0, 24], sizes = [24, 4], strides = [1, 1]} : vector<24x32xf32> to vector<24x4xf32>
    %150 = arith.truncf %149 : vector<24x4xf32> to vector<24x4xbf16>
    %cst_43 = arith.constant dense<0.000000e+00> : vector<8x24xf32>
    %151 = tpu.matmul %146, %148, %cst_43 {dimension_numbers = #tpu.dot_dimension_numbers<[1], [1], [0], [0], [0, 0, 1, 0], [], []>} : vector<8x4xbf16>, vector<24x4xbf16>, vector<8x24xf32> -> vector<8x24xf32>
    %cst_44 = arith.constant 5.000000e-01 : f32
    %152 = vector.broadcast %cst_44 : f32 to vector<8x24xf32>
    %153 = arith.mulf %151, %152 : vector<8x24xf32>
    %cst_45 = arith.constant dense<0xFF800000> : vector<8xf32>
    %154 = vector.multi_reduction <maximumf>, %153, %cst_45 [1] : vector<8x24xf32> to vector<8xf32>
    %155 = vector.shape_cast %154 : vector<8xf32> to vector<8x1xf32>
    %156 = vector.broadcast %155 : vector<8x1xf32> to vector<8x24xf32>
    %157 = arith.subf %153, %156 : vector<8x24xf32>
    %158 = math.exp %157 : vector<8x24xf32>
    %cst_46 = arith.constant dense<0.000000e+00> : vector<8xf32>
    %159 = vector.multi_reduction <add>, %158, %cst_46 [1] : vector<8x24xf32> to vector<8xf32>
    %160 = vector.shape_cast %159 : vector<8xf32> to vector<8x1xf32>
    %161 = tpu.reciprocal %160 {approx = true} : vector<8x1xf32> -> vector<8x1xf32>
    %162 = vector.broadcast %161 : vector<8x1xf32> to vector<8x24xf32>
    %163 = arith.mulf %158, %162 : vector<8x24xf32>
    %164 = arith.truncf %163 : vector<8x24xf32> to vector<8x24xbf16>
    %cst_47 = arith.constant dense<0.000000e+00> : vector<8x4xf32>
    %165 = tpu.matmul %164, %150, %cst_47 {dimension_numbers = #tpu.dot_dimension_numbers<[1], [0], [0], [1], [0, 0, 1, 1], [], []>} : vector<8x24xbf16>, vector<24x4xbf16>, vector<8x4xf32> -> vector<8x4xf32>
    %166 = vector.extract_strided_slice %16 {offsets = [0, 28], sizes = [8, 4], strides = [1, 1]} : vector<8x32xf32> to vector<8x4xf32>
    %167 = arith.truncf %166 : vector<8x4xf32> to vector<8x4xbf16>
    %168 = vector.extract_strided_slice %17 {offsets = [0, 28], sizes = [24, 4], strides = [1, 1]} : vector<24x32xf32> to vector<24x4xf32>
    %169 = arith.truncf %168 : vector<24x4xf32> to vector<24x4xbf16>
    %170 = vector.extract_strided_slice %18 {offsets = [0, 28], sizes = [24, 4], strides = [1, 1]} : vector<24x32xf32> to vector<24x4xf32>
    %171 = arith.truncf %170 : vector<24x4xf32> to vector<24x4xbf16>
    %cst_48 = arith.constant dense<0.000000e+00> : vector<8x24xf32>
    %172 = tpu.matmul %167, %169, %cst_48 {dimension_numbers = #tpu.dot_dimension_numbers<[1], [1], [0], [0], [0, 0, 1, 0], [], []>} : vector<8x4xbf16>, vector<24x4xbf16>, vector<8x24xf32> -> vector<8x24xf32>
    %cst_49 = arith.constant 5.000000e-01 : f32
    %173 = vector.broadcast %cst_49 : f32 to vector<8x24xf32>
    %174 = arith.mulf %172, %173 : vector<8x24xf32>
    %cst_50 = arith.constant dense<0xFF800000> : vector<8xf32>
    %175 = vector.multi_reduction <maximumf>, %174, %cst_50 [1] : vector<8x24xf32> to vector<8xf32>
    %176 = vector.shape_cast %175 : vector<8xf32> to vector<8x1xf32>
    %177 = vector.broadcast %176 : vector<8x1xf32> to vector<8x24xf32>
    %178 = arith.subf %174, %177 : vector<8x24xf32>
    %179 = math.exp %178 : vector<8x24xf32>
    %cst_51 = arith.constant dense<0.000000e+00> : vector<8xf32>
    %180 = vector.multi_reduction <add>, %179, %cst_51 [1] : vector<8x24xf32> to vector<8xf32>
    %181 = vector.shape_cast %180 : vector<8xf32> to vector<8x1xf32>
    %182 = tpu.reciprocal %181 {approx = true} : vector<8x1xf32> -> vector<8x1xf32>
    %183 = vector.broadcast %182 : vector<8x1xf32> to vector<8x24xf32>
    %184 = arith.mulf %179, %183 : vector<8x24xf32>
    %185 = arith.truncf %184 : vector<8x24xf32> to vector<8x24xbf16>
    %cst_52 = arith.constant dense<0.000000e+00> : vector<8x4xf32>
    %186 = tpu.matmul %185, %171, %cst_52 {dimension_numbers = #tpu.dot_dimension_numbers<[1], [0], [0], [1], [0, 0, 1, 1], [], []>} : vector<8x24xbf16>, vector<24x4xbf16>, vector<8x4xf32> -> vector<8x4xf32>
    %187 = tpu.concatenate %39, %60, %81, %102, %123, %144, %165, %186 in 1 : vector<8x4xf32>, vector<8x4xf32>, vector<8x4xf32>, vector<8x4xf32>, vector<8x4xf32>, vector<8x4xf32>, vector<8x4xf32>, vector<8x4xf32> -> vector<8x32xf32>
    %188 = arith.truncf %187 : vector<8x32xf32> to vector<8x32xbf16>
    %c0_53 = arith.constant 0 : index
    %c0_54 = arith.constant 0 : index
    %189 = vector.load %arg5[%c0_53, %c0_54] : memref<32x32xbf16, #tpu.memory_space<vmem>>, vector<32x32xbf16>
    %cst_55 = arith.constant dense<0.000000e+00> : vector<8x32xf32>
    %190 = tpu.matmul %188, %189, %cst_55 {dimension_numbers = #tpu.dot_dimension_numbers<[1], [0], [0], [1], [0, 0, 1, 1], [], []>} : vector<8x32xbf16>, vector<32x32xbf16>, vector<8x32xf32> -> vector<8x32xf32>
    %c0_56 = arith.constant 0 : index
    %c0_57 = arith.constant 0 : index
    %191 = vector.load %arg6[%c0_56, %c0_57] : memref<1x32xf32, #tpu.memory_space<vmem>>, vector<1x32xf32>
    %192 = vector.broadcast %191 : vector<1x32xf32> to vector<8x32xf32>
    %193 = arith.addf %190, %192 : vector<8x32xf32>
    %194 = arith.addf %1, %193 : vector<8x32xf32>
    %c0_58 = arith.constant 0 : index
    %c0_59 = arith.constant 0 : index
    %195 = vector.load %arg7[%c0_58, %c0_59] : memref<1x32xf32, #tpu.memory_space<vmem>>, vector<1x32xf32>
    %c0_60 = arith.constant 0 : index
    %c0_61 = arith.constant 0 : index
    %196 = vector.load %arg8[%c0_60, %c0_61] : memref<1x32xf32, #tpu.memory_space<vmem>>, vector<1x32xf32>
    %cst_62 = arith.constant dense<0.000000e+00> : vector<8xf32>
    %197 = vector.multi_reduction <add>, %194, %cst_62 [1] : vector<8x32xf32> to vector<8xf32>
    %198 = vector.shape_cast %197 : vector<8xf32> to vector<8x1xf32>
    %cst_63 = arith.constant 3.200000e+01 : f32
    %199 = vector.broadcast %cst_63 : f32 to vector<8x1xf32>
    %200 = arith.divf %198, %199 : vector<8x1xf32>
    %201 = vector.broadcast %200 : vector<8x1xf32> to vector<8x32xf32>
    %202 = arith.subf %194, %201 : vector<8x32xf32>
    %203 = arith.mulf %202, %202 : vector<8x32xf32>
    %cst_64 = arith.constant dense<0.000000e+00> : vector<8xf32>
    %204 = vector.multi_reduction <add>, %203, %cst_64 [1] : vector<8x32xf32> to vector<8xf32>
    %205 = vector.shape_cast %204 : vector<8xf32> to vector<8x1xf32>
    %cst_65 = arith.constant 3.200000e+01 : f32
    %206 = vector.broadcast %cst_65 : f32 to vector<8x1xf32>
    %207 = arith.divf %205, %206 : vector<8x1xf32>
    %cst_66 = arith.constant 9.99999974E-6 : f32
    %208 = vector.broadcast %cst_66 : f32 to vector<8x1xf32>
    %209 = arith.addf %207, %208 : vector<8x1xf32>
    %210 = math.rsqrt %209 : vector<8x1xf32>
    %211 = vector.broadcast %210 : vector<8x1xf32> to vector<8x32xf32>
    %212 = arith.mulf %202, %211 : vector<8x32xf32>
    %213 = vector.broadcast %195 : vector<1x32xf32> to vector<8x32xf32>
    %214 = arith.mulf %212, %213 : vector<8x32xf32>
    %215 = vector.broadcast %196 : vector<1x32xf32> to vector<8x32xf32>
    %216 = arith.addf %214, %215 : vector<8x32xf32>
    %217 = arith.truncf %216 : vector<8x32xf32> to vector<8x32xbf16>
    %c0_67 = arith.constant 0 : index
    %c0_68 = arith.constant 0 : index
    %218 = vector.load %arg9[%c0_67, %c0_68] : memref<32x128xbf16, #tpu.memory_space<vmem>>, vector<32x128xbf16>
    %cst_69 = arith.constant dense<0.000000e+00> : vector<8x128xf32>
    %219 = tpu.matmul %217, %218, %cst_69 {dimension_numbers = #tpu.dot_dimension_numbers<[1], [0], [0], [1], [0, 0, 1, 1], [], []>} : vector<8x32xbf16>, vector<32x128xbf16>, vector<8x128xf32> -> vector<8x128xf32>
    %c0_70 = arith.constant 0 : index
    %c0_71 = arith.constant 0 : index
    %220 = vector.load %arg10[%c0_70, %c0_71] : memref<1x128xf32, #tpu.memory_space<vmem>>, vector<1x128xf32>
    %221 = vector.broadcast %220 : vector<1x128xf32> to vector<8x128xf32>
    %222 = arith.addf %219, %221 : vector<8x128xf32>
    %223 = arith.mulf %222, %222 : vector<8x128xf32>
    %224 = arith.mulf %222, %223 : vector<8x128xf32>
    %cst_72 = arith.constant 4.471500e-02 : f32
    %225 = vector.broadcast %cst_72 : f32 to vector<8x128xf32>
    %226 = arith.mulf %225, %224 : vector<8x128xf32>
    %227 = arith.addf %222, %226 : vector<8x128xf32>
    %cst_73 = arith.constant 0.797884583 : f32
    %228 = vector.broadcast %cst_73 : f32 to vector<8x128xf32>
    %229 = arith.mulf %228, %227 : vector<8x128xf32>
    %230 = math.tanh %229 : vector<8x128xf32>
    %cst_74 = arith.constant 1.000000e+00 : f32
    %231 = vector.broadcast %cst_74 : f32 to vector<8x128xf32>
    %232 = arith.addf %231, %230 : vector<8x128xf32>
    %cst_75 = arith.constant 5.000000e-01 : f32
    %233 = vector.broadcast %cst_75 : f32 to vector<8x128xf32>
    %234 = arith.mulf %233, %232 : vector<8x128xf32>
    %235 = arith.mulf %222, %234 : vector<8x128xf32>
    %236 = arith.truncf %235 : vector<8x128xf32> to vector<8x128xbf16>
    %c0_76 = arith.constant 0 : index
    %c0_77 = arith.constant 0 : index
    %237 = vector.load %arg11[%c0_76, %c0_77] : memref<128x32xbf16, #tpu.memory_space<vmem>>, vector<128x32xbf16>
    %cst_78 = arith.constant dense<0.000000e+00> : vector<8x32xf32>
    %238 = tpu.matmul %236, %237, %cst_78 {dimension_numbers = #tpu.dot_dimension_numbers<[1], [0], [0], [1], [0, 0, 1, 1], [], []>} : vector<8x128xbf16>, vector<128x32xbf16>, vector<8x32xf32> -> vector<8x32xf32>
    %c0_79 = arith.constant 0 : index
    %c0_80 = arith.constant 0 : index
    %239 = vector.load %arg12[%c0_79, %c0_80] : memref<1x32xf32, #tpu.memory_space<vmem>>, vector<1x32xf32>
    %240 = vector.broadcast %239 : vector<1x32xf32> to vector<8x32xf32>
    %241 = arith.addf %238, %240 : vector<8x32xf32>
    %242 = arith.addf %216, %241 : vector<8x32xf32>
    %c0_81 = arith.constant 0 : index
    %c0_82 = arith.constant 0 : index
    %243 = vector.load %arg13[%c0_81, %c0_82] : memref<1x32xf32, #tpu.memory_space<vmem>>, vector<1x32xf32>
    %c0_83 = arith.constant 0 : index
    %c0_84 = arith.constant 0 : index
    %244 = vector.load %arg14[%c0_83, %c0_84] : memref<1x32xf32, #tpu.memory_space<vmem>>, vector<1x32xf32>
    %cst_85 = arith.constant dense<0.000000e+00> : vector<8xf32>
    %245 = vector.multi_reduction <add>, %242, %cst_85 [1] : vector<8x32xf32> to vector<8xf32>
    %246 = vector.shape_cast %245 : vector<8xf32> to vector<8x1xf32>
    %cst_86 = arith.constant 3.200000e+01 : f32
    %247 = vector.broadcast %cst_86 : f32 to vector<8x1xf32>
    %248 = arith.divf %246, %247 : vector<8x1xf32>
    %249 = vector.broadcast %248 : vector<8x1xf32> to vector<8x32xf32>
    %250 = arith.subf %242, %249 : vector<8x32xf32>
    %251 = arith.mulf %250, %250 : vector<8x32xf32>
    %cst_87 = arith.constant dense<0.000000e+00> : vector<8xf32>
    %252 = vector.multi_reduction <add>, %251, %cst_87 [1] : vector<8x32xf32> to vector<8xf32>
    %253 = vector.shape_cast %252 : vector<8xf32> to vector<8x1xf32>
    %cst_88 = arith.constant 3.200000e+01 : f32
    %254 = vector.broadcast %cst_88 : f32 to vector<8x1xf32>
    %255 = arith.divf %253, %254 : vector<8x1xf32>
    %cst_89 = arith.constant 9.99999974E-6 : f32
    %256 = vector.broadcast %cst_89 : f32 to vector<8x1xf32>
    %257 = arith.addf %255, %256 : vector<8x1xf32>
    %258 = math.rsqrt %257 : vector<8x1xf32>
    %259 = vector.broadcast %258 : vector<8x1xf32> to vector<8x32xf32>
    %260 = arith.mulf %250, %259 : vector<8x32xf32>
    %261 = vector.broadcast %243 : vector<1x32xf32> to vector<8x32xf32>
    %262 = arith.mulf %260, %261 : vector<8x32xf32>
    %263 = vector.broadcast %244 : vector<1x32xf32> to vector<8x32xf32>
    %264 = arith.addf %262, %263 : vector<8x32xf32>
    %c0_90 = arith.constant 0 : index
    %c0_91 = arith.constant 0 : index
    %c0_92 = arith.constant 0 : index
    %265 = vector.load %arg15[%c0_90, %c0_91, %c0_92] : memref<1x8x32xf32, #tpu.memory_space<vmem>>, vector<1x8x32xf32>
    %266 = vector.shape_cast %265 : vector<1x8x32xf32> to vector<8x32xf32>
    %267 = vector.shape_cast %264 : vector<8x32xf32> to vector<1x8x32xf32>
    tpu.vector_store %arg15[%c0_90, %c0_91, %c0_92], %267 {strides = array<i32>} : memref<1x8x32xf32, #tpu.memory_space<vmem>>, vector<1x8x32xf32>,
    return
  }
  func.func @transform_0(%arg0: i32) -> (i32, i32, i32) {
    %c0_i32 = arith.constant 0 : i32
    %c0_i32_0 = arith.constant 0 : i32
    %c0_i32_1 = arith.constant 0 : i32
    return %arg0, %c0_i32, %c0_i32_0 : i32, i32, i32
  }
  func.func @transform_1(%arg0: i32) -> (i32, i32, i32) {
    %c0_i32 = arith.constant 0 : i32
    %c0_i32_0 = arith.constant 0 : i32
    %c0_i32_1 = arith.constant 0 : i32
    return %arg0, %c0_i32, %c0_i32_0 : i32, i32, i32
  }
  func.func @transform_2(%arg0: i32) -> (i32, i32) {
    %c0_i32 = arith.constant 0 : i32
    %c0_i32_0 = arith.constant 0 : i32
    %c0_i32_1 = arith.constant 0 : i32
    return %c0_i32, %c0_i32_0 : i32, i32
  }
  func.func @transform_3(%arg0: i32) -> (i32, i32) {
    %c0_i32 = arith.constant 0 : i32
    %c0_i32_0 = arith.constant 0 : i32
    %c0_i32_1 = arith.constant 0 : i32
    return %c0_i32, %c0_i32_0 : i32, i32
  }
  func.func @transform_4(%arg0: i32) -> (i32, i32) {
    %c0_i32 = arith.constant 0 : i32
    %c0_i32_0 = arith.constant 0 : i32
    %c0_i32_1 = arith.constant 0 : i32
    return %c0_i32, %c0_i32_0 : i32, i32
  }
  func.func @transform_5(%arg0: i32) -> (i32, i32) {
    %c0_i32 = arith.constant 0 : i32
    %c0_i32_0 = arith.constant 0 : i32
    %c0_i32_1 = arith.constant 0 : i32
    return %c0_i32, %c0_i32_0 : i32, i32
  }
  func.func @transform_6(%arg0: i32) -> (i32, i32) {
    %c0_i32 = arith.constant 0 : i32
    %c0_i32_0 = arith.constant 0 : i32
    %c0_i32_1 = arith.constant 0 : i32
    return %c0_i32, %c0_i32_0 : i32, i32
  }
  func.func @transform_7(%arg0: i32) -> (i32, i32) {
    %c0_i32 = arith.constant 0 : i32
    %c0_i32_0 = arith.constant 0 : i32
    %c0_i32_1 = arith.constant 0 : i32
    return %c0_i32, %c0_i32_0 : i32, i32
  }
  func.func @transform_8(%arg0: i32) -> (i32, i32) {
    %c0_i32 = arith.constant 0 : i32
    %c0_i32_0 = arith.constant 0 : i32
    %c0_i32_1 = arith.constant 0 : i32
    return %c0_i32, %c0_i32_0 : i32, i32
  }
  func.func @transform_9(%arg0: i32) -> (i32, i32) {
    %c0_i32 = arith.constant 0 : i32
    %c0_i32_0 = arith.constant 0 : i32
    %c0_i32_1 = arith.constant 0 : i32
    return %c0_i32, %c0_i32_0 : i32, i32
  }
  func.func @transform_10(%arg0: i32) -> (i32, i32) {
    %c0_i32 = arith.constant 0 : i32
    %c0_i32_0 = arith.constant 0 : i32
    %c0_i32_1 = arith.constant 0 : i32
    return %c0_i32, %c0_i32_0 : i32, i32
  }
  func.func @transform_11(%arg0: i32) -> (i32, i32) {
    %c0_i32 = arith.constant 0 : i32
    %c0_i32_0 = arith.constant 0 : i32
    %c0_i32_1 = arith.constant 0 : i32
    return %c0_i32, %c0_i32_0 : i32, i32
  }
  func.func @transform_12(%arg0: i32) -> (i32, i32) {
    %c0_i32 = arith.constant 0 : i32
    %c0_i32_0 = arith.constant 0 : i32
    %c0_i32_1 = arith.constant 0 : i32
    return %c0_i32, %c0_i32_0 : i32, i32
  }
  func.func @transform_13(%arg0: i32) -> (i32, i32) {
    %c0_i32 = arith.constant 0 : i32
    %c0_i32_0 = arith.constant 0 : i32
    %c0_i32_1 = arith.constant 0 : i32
    return %c0_i32, %c0_i32_0 : i32, i32
  }
  func.func @transform_14(%arg0: i32) -> (i32, i32, i32) {
    %c0_i32 = arith.constant 0 : i32
    %c0_i32_0 = arith.constant 0 : i32
    %c0_i32_1 = arith.constant 0 : i32
    return %arg0, %c0_i32, %c0_i32_0 : i32, i32, i32
  }
}

module attributes {stable_mosaic.version = 11 : i64} {
  func.func @kernel(%arg0: i32, %arg1: memref<1x8x32xf32, #tpu.memory_space<vmem>>, %arg2: memref<1x16x32xf32, #tpu.memory_space<vmem>>, %arg3: memref<32x96xbf16, #tpu.memory_space<vmem>>, %arg4: memref<1x96xf32, #tpu.memory_space<vmem>>, %arg5: memref<32x32xbf16, #tpu.memory_space<vmem>>, %arg6: memref<1x32xf32, #tpu.memory_space<vmem>>, %arg7: memref<1x8x32xf32, #tpu.memory_space<vmem>>) attributes {dimension_semantics = [#tpu.dimension_semantics<parallel>], iteration_bounds = array<i64: 2>, scalar_prefetch = 0 : i64, scratch_operands = 0 : i64, tpu.core_type = #tpu.core_type<tc>, window_params = [{transform_indices = @transform_0, window_bounds = array<i64: 1, 8, 32>}, {transform_indices = @transform_1, window_bounds = array<i64: 1, 16, 32>}, {pipeline_mode = #tpu.pipeline_mode<synchronous>, transform_indices = @transform_2, window_bounds = array<i64: 32, 96>}, {pipeline_mode = #tpu.pipeline_mode<synchronous>, transform_indices = @transform_3, window_bounds = array<i64: 1, 96>}, {pipeline_mode = #tpu.pipeline_mode<synchronous>, transform_indices = @transform_4, window_bounds = array<i64: 32, 32>}, {pipeline_mode = #tpu.pipeline_mode<synchronous>, transform_indices = @transform_5, window_bounds = array<i64: 1, 32>}, {transform_indices = @transform_6, window_bounds = array<i64: 1, 8, 32>}]} {
    %c0 = arith.constant 0 : index
    %c0_0 = arith.constant 0 : index
    %c0_1 = arith.constant 0 : index
    %0 = vector.load %arg1[%c0, %c0_0, %c0_1] : memref<1x8x32xf32, #tpu.memory_space<vmem>>, vector<1x8x32xf32>
    %1 = vector.shape_cast %0 : vector<1x8x32xf32> to vector<8x32xf32>
    %c0_2 = arith.constant 0 : index
    %c0_3 = arith.constant 0 : index
    %c0_4 = arith.constant 0 : index
    %2 = vector.load %arg1[%c0_2, %c0_3, %c0_4] : memref<1x8x32xf32, #tpu.memory_space<vmem>>, vector<1x8x32xf32>
    %3 = vector.shape_cast %2 : vector<1x8x32xf32> to vector<8x32xf32>
    %4 = arith.truncf %3 : vector<8x32xf32> to vector<8x32xbf16>
    %c0_5 = arith.constant 0 : index
    %c0_6 = arith.constant 0 : index
    %c0_7 = arith.constant 0 : index
    %5 = vector.load %arg2[%c0_5, %c0_6, %c0_7] : memref<1x16x32xf32, #tpu.memory_space<vmem>>, vector<1x16x32xf32>
    %6 = vector.shape_cast %5 : vector<1x16x32xf32> to vector<16x32xf32>
    %7 = arith.truncf %6 : vector<16x32xf32> to vector<16x32xbf16>
    %c0_8 = arith.constant 0 : index
    %c0_9 = arith.constant 0 : index
    %8 = vector.load %arg3[%c0_8, %c0_9] : memref<32x96xbf16, #tpu.memory_space<vmem>>, vector<32x96xbf16>
    %c0_10 = arith.constant 0 : index
    %c0_11 = arith.constant 0 : index
    %9 = vector.load %arg4[%c0_10, %c0_11] : memref<1x96xf32, #tpu.memory_space<vmem>>, vector<1x96xf32>
    %cst = arith.constant dense<0.000000e+00> : vector<8x96xf32>
    %10 = tpu.matmul %4, %8, %cst {dimension_numbers = #tpu.dot_dimension_numbers<[1], [0], [0], [1], [0, 0, 1, 1], [], []>} : vector<8x32xbf16>, vector<32x96xbf16>, vector<8x96xf32> -> vector<8x96xf32>
    %11 = vector.broadcast %9 : vector<1x96xf32> to vector<8x96xf32>
    %12 = arith.addf %10, %11 : vector<8x96xf32>
    %cst_12 = arith.constant dense<0.000000e+00> : vector<16x96xf32>
    %13 = tpu.matmul %7, %8, %cst_12 {dimension_numbers = #tpu.dot_dimension_numbers<[1], [0], [0], [1], [0, 0, 1, 1], [], []>} : vector<16x32xbf16>, vector<32x96xbf16>, vector<16x96xf32> -> vector<16x96xf32>
    %14 = vector.broadcast %9 : vector<1x96xf32> to vector<16x96xf32>
    %15 = arith.addf %13, %14 : vector<16x96xf32>
    %16 = vector.extract_strided_slice %12 {offsets = [0, 0], sizes = [8, 32], strides = [1, 1]} : vector<8x96xf32> to vector<8x32xf32>
    %17 = vector.extract_strided_slice %15 {offsets = [0, 32], sizes = [16, 32], strides = [1, 1]} : vector<16x96xf32> to vector<16x32xf32>
    %18 = vector.extract_strided_slice %15 {offsets = [0, 64], sizes = [16, 32], strides = [1, 1]} : vector<16x96xf32> to vector<16x32xf32>
    %19 = vector.extract_strided_slice %16 {offsets = [0, 0], sizes = [8, 8], strides = [1, 1]} : vector<8x32xf32> to vector<8x8xf32>
    %20 = arith.truncf %19 : vector<8x8xf32> to vector<8x8xbf16>
    %21 = vector.extract_strided_slice %17 {offsets = [0, 0], sizes = [16, 8], strides = [1, 1]} : vector<16x32xf32> to vector<16x8xf32>
    %22 = arith.truncf %21 : vector<16x8xf32> to vector<16x8xbf16>
    %23 = vector.extract_strided_slice %18 {offsets = [0, 0], sizes = [16, 8], strides = [1, 1]} : vector<16x32xf32> to vector<16x8xf32>
    %24 = arith.truncf %23 : vector<16x8xf32> to vector<16x8xbf16>
    %cst_13 = arith.constant dense<0.000000e+00> : vector<8x16xf32>
    %25 = tpu.matmul %20, %22, %cst_13 {dimension_numbers = #tpu.dot_dimension_numbers<[1], [1], [0], [0], [0, 0, 1, 0], [], []>} : vector<8x8xbf16>, vector<16x8xbf16>, vector<8x16xf32> -> vector<8x16xf32>
    %cst_14 = arith.constant 0.353553385 : f32
    %26 = vector.broadcast %cst_14 : f32 to vector<8x16xf32>
    %27 = arith.mulf %25, %26 : vector<8x16xf32>
    %cst_15 = arith.constant dense<0xFF800000> : vector<8xf32>
    %28 = vector.multi_reduction <maximumf>, %27, %cst_15 [1] : vector<8x16xf32> to vector<8xf32>
    %29 = vector.shape_cast %28 : vector<8xf32> to vector<8x1xf32>
    %30 = vector.broadcast %29 : vector<8x1xf32> to vector<8x16xf32>
    %31 = arith.subf %27, %30 : vector<8x16xf32>
    %32 = math.exp %31 : vector<8x16xf32>
    %cst_16 = arith.constant dense<0.000000e+00> : vector<8xf32>
    %33 = vector.multi_reduction <add>, %32, %cst_16 [1] : vector<8x16xf32> to vector<8xf32>
    %34 = vector.shape_cast %33 : vector<8xf32> to vector<8x1xf32>
    %35 = tpu.reciprocal %34 {approx = true} : vector<8x1xf32> -> vector<8x1xf32>
    %36 = vector.broadcast %35 : vector<8x1xf32> to vector<8x16xf32>
    %37 = arith.mulf %32, %36 : vector<8x16xf32>
    %38 = arith.truncf %37 : vector<8x16xf32> to vector<8x16xbf16>
    %cst_17 = arith.constant dense<0.000000e+00> : vector<8x8xf32>
    %39 = tpu.matmul %38, %24, %cst_17 {dimension_numbers = #tpu.dot_dimension_numbers<[1], [0], [0], [1], [0, 0, 1, 1], [], []>} : vector<8x16xbf16>, vector<16x8xbf16>, vector<8x8xf32> -> vector<8x8xf32>
    %40 = vector.extract_strided_slice %16 {offsets = [0, 8], sizes = [8, 8], strides = [1, 1]} : vector<8x32xf32> to vector<8x8xf32>
    %41 = arith.truncf %40 : vector<8x8xf32> to vector<8x8xbf16>
    %42 = vector.extract_strided_slice %17 {offsets = [0, 8], sizes = [16, 8], strides = [1, 1]} : vector<16x32xf32> to vector<16x8xf32>
    %43 = arith.truncf %42 : vector<16x8xf32> to vector<16x8xbf16>
    %44 = vector.extract_strided_slice %18 {offsets = [0, 8], sizes = [16, 8], strides = [1, 1]} : vector<16x32xf32> to vector<16x8xf32>
    %45 = arith.truncf %44 : vector<16x8xf32> to vector<16x8xbf16>
    %cst_18 = arith.constant dense<0.000000e+00> : vector<8x16xf32>
    %46 = tpu.matmul %41, %43, %cst_18 {dimension_numbers = #tpu.dot_dimension_numbers<[1], [1], [0], [0], [0, 0, 1, 0], [], []>} : vector<8x8xbf16>, vector<16x8xbf16>, vector<8x16xf32> -> vector<8x16xf32>
    %cst_19 = arith.constant 0.353553385 : f32
    %47 = vector.broadcast %cst_19 : f32 to vector<8x16xf32>
    %48 = arith.mulf %46, %47 : vector<8x16xf32>
    %cst_20 = arith.constant dense<0xFF800000> : vector<8xf32>
    %49 = vector.multi_reduction <maximumf>, %48, %cst_20 [1] : vector<8x16xf32> to vector<8xf32>
    %50 = vector.shape_cast %49 : vector<8xf32> to vector<8x1xf32>
    %51 = vector.broadcast %50 : vector<8x1xf32> to vector<8x16xf32>
    %52 = arith.subf %48, %51 : vector<8x16xf32>
    %53 = math.exp %52 : vector<8x16xf32>
    %cst_21 = arith.constant dense<0.000000e+00> : vector<8xf32>
    %54 = vector.multi_reduction <add>, %53, %cst_21 [1] : vector<8x16xf32> to vector<8xf32>
    %55 = vector.shape_cast %54 : vector<8xf32> to vector<8x1xf32>
    %56 = tpu.reciprocal %55 {approx = true} : vector<8x1xf32> -> vector<8x1xf32>
    %57 = vector.broadcast %56 : vector<8x1xf32> to vector<8x16xf32>
    %58 = arith.mulf %53, %57 : vector<8x16xf32>
    %59 = arith.truncf %58 : vector<8x16xf32> to vector<8x16xbf16>
    %cst_22 = arith.constant dense<0.000000e+00> : vector<8x8xf32>
    %60 = tpu.matmul %59, %45, %cst_22 {dimension_numbers = #tpu.dot_dimension_numbers<[1], [0], [0], [1], [0, 0, 1, 1], [], []>} : vector<8x16xbf16>, vector<16x8xbf16>, vector<8x8xf32> -> vector<8x8xf32>
    %61 = vector.extract_strided_slice %16 {offsets = [0, 16], sizes = [8, 8], strides = [1, 1]} : vector<8x32xf32> to vector<8x8xf32>
    %62 = arith.truncf %61 : vector<8x8xf32> to vector<8x8xbf16>
    %63 = vector.extract_strided_slice %17 {offsets = [0, 16], sizes = [16, 8], strides = [1, 1]} : vector<16x32xf32> to vector<16x8xf32>
    %64 = arith.truncf %63 : vector<16x8xf32> to vector<16x8xbf16>
    %65 = vector.extract_strided_slice %18 {offsets = [0, 16], sizes = [16, 8], strides = [1, 1]} : vector<16x32xf32> to vector<16x8xf32>
    %66 = arith.truncf %65 : vector<16x8xf32> to vector<16x8xbf16>
    %cst_23 = arith.constant dense<0.000000e+00> : vector<8x16xf32>
    %67 = tpu.matmul %62, %64, %cst_23 {dimension_numbers = #tpu.dot_dimension_numbers<[1], [1], [0], [0], [0, 0, 1, 0], [], []>} : vector<8x8xbf16>, vector<16x8xbf16>, vector<8x16xf32> -> vector<8x16xf32>
    %cst_24 = arith.constant 0.353553385 : f32
    %68 = vector.broadcast %cst_24 : f32 to vector<8x16xf32>
    %69 = arith.mulf %67, %68 : vector<8x16xf32>
    %cst_25 = arith.constant dense<0xFF800000> : vector<8xf32>
    %70 = vector.multi_reduction <maximumf>, %69, %cst_25 [1] : vector<8x16xf32> to vector<8xf32>
    %71 = vector.shape_cast %70 : vector<8xf32> to vector<8x1xf32>
    %72 = vector.broadcast %71 : vector<8x1xf32> to vector<8x16xf32>
    %73 = arith.subf %69, %72 : vector<8x16xf32>
    %74 = math.exp %73 : vector<8x16xf32>
    %cst_26 = arith.constant dense<0.000000e+00> : vector<8xf32>
    %75 = vector.multi_reduction <add>, %74, %cst_26 [1] : vector<8x16xf32> to vector<8xf32>
    %76 = vector.shape_cast %75 : vector<8xf32> to vector<8x1xf32>
    %77 = tpu.reciprocal %76 {approx = true} : vector<8x1xf32> -> vector<8x1xf32>
    %78 = vector.broadcast %77 : vector<8x1xf32> to vector<8x16xf32>
    %79 = arith.mulf %74, %78 : vector<8x16xf32>
    %80 = arith.truncf %79 : vector<8x16xf32> to vector<8x16xbf16>
    %cst_27 = arith.constant dense<0.000000e+00> : vector<8x8xf32>
    %81 = tpu.matmul %80, %66, %cst_27 {dimension_numbers = #tpu.dot_dimension_numbers<[1], [0], [0], [1], [0, 0, 1, 1], [], []>} : vector<8x16xbf16>, vector<16x8xbf16>, vector<8x8xf32> -> vector<8x8xf32>
    %82 = vector.extract_strided_slice %16 {offsets = [0, 24], sizes = [8, 8], strides = [1, 1]} : vector<8x32xf32> to vector<8x8xf32>
    %83 = arith.truncf %82 : vector<8x8xf32> to vector<8x8xbf16>
    %84 = vector.extract_strided_slice %17 {offsets = [0, 24], sizes = [16, 8], strides = [1, 1]} : vector<16x32xf32> to vector<16x8xf32>
    %85 = arith.truncf %84 : vector<16x8xf32> to vector<16x8xbf16>
    %86 = vector.extract_strided_slice %18 {offsets = [0, 24], sizes = [16, 8], strides = [1, 1]} : vector<16x32xf32> to vector<16x8xf32>
    %87 = arith.truncf %86 : vector<16x8xf32> to vector<16x8xbf16>
    %cst_28 = arith.constant dense<0.000000e+00> : vector<8x16xf32>
    %88 = tpu.matmul %83, %85, %cst_28 {dimension_numbers = #tpu.dot_dimension_numbers<[1], [1], [0], [0], [0, 0, 1, 0], [], []>} : vector<8x8xbf16>, vector<16x8xbf16>, vector<8x16xf32> -> vector<8x16xf32>
    %cst_29 = arith.constant 0.353553385 : f32
    %89 = vector.broadcast %cst_29 : f32 to vector<8x16xf32>
    %90 = arith.mulf %88, %89 : vector<8x16xf32>
    %cst_30 = arith.constant dense<0xFF800000> : vector<8xf32>
    %91 = vector.multi_reduction <maximumf>, %90, %cst_30 [1] : vector<8x16xf32> to vector<8xf32>
    %92 = vector.shape_cast %91 : vector<8xf32> to vector<8x1xf32>
    %93 = vector.broadcast %92 : vector<8x1xf32> to vector<8x16xf32>
    %94 = arith.subf %90, %93 : vector<8x16xf32>
    %95 = math.exp %94 : vector<8x16xf32>
    %cst_31 = arith.constant dense<0.000000e+00> : vector<8xf32>
    %96 = vector.multi_reduction <add>, %95, %cst_31 [1] : vector<8x16xf32> to vector<8xf32>
    %97 = vector.shape_cast %96 : vector<8xf32> to vector<8x1xf32>
    %98 = tpu.reciprocal %97 {approx = true} : vector<8x1xf32> -> vector<8x1xf32>
    %99 = vector.broadcast %98 : vector<8x1xf32> to vector<8x16xf32>
    %100 = arith.mulf %95, %99 : vector<8x16xf32>
    %101 = arith.truncf %100 : vector<8x16xf32> to vector<8x16xbf16>
    %cst_32 = arith.constant dense<0.000000e+00> : vector<8x8xf32>
    %102 = tpu.matmul %101, %87, %cst_32 {dimension_numbers = #tpu.dot_dimension_numbers<[1], [0], [0], [1], [0, 0, 1, 1], [], []>} : vector<8x16xbf16>, vector<16x8xbf16>, vector<8x8xf32> -> vector<8x8xf32>
    %103 = tpu.concatenate %39, %60, %81, %102 in 1 : vector<8x8xf32>, vector<8x8xf32>, vector<8x8xf32>, vector<8x8xf32> -> vector<8x32xf32>
    %104 = arith.truncf %103 : vector<8x32xf32> to vector<8x32xbf16>
    %c0_33 = arith.constant 0 : index
    %c0_34 = arith.constant 0 : index
    %105 = vector.load %arg5[%c0_33, %c0_34] : memref<32x32xbf16, #tpu.memory_space<vmem>>, vector<32x32xbf16>
    %cst_35 = arith.constant dense<0.000000e+00> : vector<8x32xf32>
    %106 = tpu.matmul %104, %105, %cst_35 {dimension_numbers = #tpu.dot_dimension_numbers<[1], [0], [0], [1], [0, 0, 1, 1], [], []>} : vector<8x32xbf16>, vector<32x32xbf16>, vector<8x32xf32> -> vector<8x32xf32>
    %c0_36 = arith.constant 0 : index
    %c0_37 = arith.constant 0 : index
    %107 = vector.load %arg6[%c0_36, %c0_37] : memref<1x32xf32, #tpu.memory_space<vmem>>, vector<1x32xf32>
    %108 = vector.broadcast %107 : vector<1x32xf32> to vector<8x32xf32>
    %109 = arith.addf %106, %108 : vector<8x32xf32>
    %110 = arith.addf %1, %109 : vector<8x32xf32>
    %c0_38 = arith.constant 0 : index
    %c0_39 = arith.constant 0 : index
    %c0_40 = arith.constant 0 : index
    %111 = vector.load %arg7[%c0_38, %c0_39, %c0_40] : memref<1x8x32xf32, #tpu.memory_space<vmem>>, vector<1x8x32xf32>
    %112 = vector.shape_cast %111 : vector<1x8x32xf32> to vector<8x32xf32>
    %113 = vector.shape_cast %110 : vector<8x32xf32> to vector<1x8x32xf32>
    tpu.vector_store %arg7[%c0_38, %c0_39, %c0_40], %113 {strides = array<i32>} : memref<1x8x32xf32, #tpu.memory_space<vmem>>, vector<1x8x32xf32>,
    return
  }
  func.func @transform_0(%arg0: i32) -> (i32, i32, i32) {
    %c0_i32 = arith.constant 0 : i32
    %c0_i32_0 = arith.constant 0 : i32
    %c0_i32_1 = arith.constant 0 : i32
    return %arg0, %c0_i32, %c0_i32_0 : i32, i32, i32
  }
  func.func @transform_1(%arg0: i32) -> (i32, i32, i32) {
    %c0_i32 = arith.constant 0 : i32
    %c0_i32_0 = arith.constant 0 : i32
    %c0_i32_1 = arith.constant 0 : i32
    return %arg0, %c0_i32, %c0_i32_0 : i32, i32, i32
  }
  func.func @transform_2(%arg0: i32) -> (i32, i32) {
    %c0_i32 = arith.constant 0 : i32
    %c0_i32_0 = arith.constant 0 : i32
    %c0_i32_1 = arith.constant 0 : i32
    return %c0_i32, %c0_i32_0 : i32, i32
  }
  func.func @transform_3(%arg0: i32) -> (i32, i32) {
    %c0_i32 = arith.constant 0 : i32
    %c0_i32_0 = arith.constant 0 : i32
    %c0_i32_1 = arith.constant 0 : i32
    return %c0_i32, %c0_i32_0 : i32, i32
  }
  func.func @transform_4(%arg0: i32) -> (i32, i32) {
    %c0_i32 = arith.constant 0 : i32
    %c0_i32_0 = arith.constant 0 : i32
    %c0_i32_1 = arith.constant 0 : i32
    return %c0_i32, %c0_i32_0 : i32, i32
  }
  func.func @transform_5(%arg0: i32) -> (i32, i32) {
    %c0_i32 = arith.constant 0 : i32
    %c0_i32_0 = arith.constant 0 : i32
    %c0_i32_1 = arith.constant 0 : i32
    return %c0_i32, %c0_i32_0 : i32, i32
  }
  func.func @transform_6(%arg0: i32) -> (i32, i32, i32) {
    %c0_i32 = arith.constant 0 : i32
    %c0_i32_0 = arith.constant 0 : i32
    %c0_i32_1 = arith.constant 0 : i32
    return %arg0, %c0_i32, %c0_i32_0 : i32, i32, i32
  }
}

module attributes {stable_mosaic.version = 11 : i64} {
  func.func @kernel(%arg0: i32, %arg1: memref<1x16x32xf32, #tpu.memory_space<vmem>>, %arg2: memref<1x16x32xf32, #tpu.memory_space<vmem>>, %arg3: memref<1x16x16xf32, #tpu.memory_space<vmem>>, %arg4: memref<32x96xbf16, #tpu.memory_space<vmem>>, %arg5: memref<1x96xf32, #tpu.memory_space<vmem>>, %arg6: memref<32x32xbf16, #tpu.memory_space<vmem>>, %arg7: memref<1x32xf32, #tpu.memory_space<vmem>>, %arg8: memref<1x32xf32, #tpu.memory_space<vmem>>, %arg9: memref<1x32xf32, #tpu.memory_space<vmem>>, %arg10: memref<32x128xbf16, #tpu.memory_space<vmem>>, %arg11: memref<1x128xf32, #tpu.memory_space<vmem>>, %arg12: memref<128x32xbf16, #tpu.memory_space<vmem>>, %arg13: memref<1x32xf32, #tpu.memory_space<vmem>>, %arg14: memref<1x32xf32, #tpu.memory_space<vmem>>, %arg15: memref<1x32xf32, #tpu.memory_space<vmem>>, %arg16: memref<1x16x32xf32, #tpu.memory_space<vmem>>) attributes {dimension_semantics = [#tpu.dimension_semantics<parallel>], iteration_bounds = array<i64: 2>, scalar_prefetch = 0 : i64, scratch_operands = 0 : i64, tpu.core_type = #tpu.core_type<tc>, window_params = [{transform_indices = @transform_0, window_bounds = array<i64: 1, 16, 32>}, {transform_indices = @transform_1, window_bounds = array<i64: 1, 16, 32>}, {transform_indices = @transform_2, window_bounds = array<i64: 1, 16, 16>}, {pipeline_mode = #tpu.pipeline_mode<synchronous>, transform_indices = @transform_3, window_bounds = array<i64: 32, 96>}, {pipeline_mode = #tpu.pipeline_mode<synchronous>, transform_indices = @transform_4, window_bounds = array<i64: 1, 96>}, {pipeline_mode = #tpu.pipeline_mode<synchronous>, transform_indices = @transform_5, window_bounds = array<i64: 32, 32>}, {pipeline_mode = #tpu.pipeline_mode<synchronous>, transform_indices = @transform_6, window_bounds = array<i64: 1, 32>}, {pipeline_mode = #tpu.pipeline_mode<synchronous>, transform_indices = @transform_7, window_bounds = array<i64: 1, 32>}, {pipeline_mode = #tpu.pipeline_mode<synchronous>, transform_indices = @transform_8, window_bounds = array<i64: 1, 32>}, {pipeline_mode = #tpu.pipeline_mode<synchronous>, transform_indices = @transform_9, window_bounds = array<i64: 32, 128>}, {pipeline_mode = #tpu.pipeline_mode<synchronous>, transform_indices = @transform_10, window_bounds = array<i64: 1, 128>}, {pipeline_mode = #tpu.pipeline_mode<synchronous>, transform_indices = @transform_11, window_bounds = array<i64: 128, 32>}, {pipeline_mode = #tpu.pipeline_mode<synchronous>, transform_indices = @transform_12, window_bounds = array<i64: 1, 32>}, {pipeline_mode = #tpu.pipeline_mode<synchronous>, transform_indices = @transform_13, window_bounds = array<i64: 1, 32>}, {pipeline_mode = #tpu.pipeline_mode<synchronous>, transform_indices = @transform_14, window_bounds = array<i64: 1, 32>}, {transform_indices = @transform_15, window_bounds = array<i64: 1, 16, 32>}]} {
    %c0 = arith.constant 0 : index
    %c0_0 = arith.constant 0 : index
    %c0_1 = arith.constant 0 : index
    %0 = vector.load %arg1[%c0, %c0_0, %c0_1] : memref<1x16x32xf32, #tpu.memory_space<vmem>>, vector<1x16x32xf32>
    %1 = vector.shape_cast %0 : vector<1x16x32xf32> to vector<16x32xf32>
    %c0_2 = arith.constant 0 : index
    %c0_3 = arith.constant 0 : index
    %c0_4 = arith.constant 0 : index
    %2 = vector.load %arg1[%c0_2, %c0_3, %c0_4] : memref<1x16x32xf32, #tpu.memory_space<vmem>>, vector<1x16x32xf32>
    %3 = vector.shape_cast %2 : vector<1x16x32xf32> to vector<16x32xf32>
    %4 = arith.truncf %3 : vector<16x32xf32> to vector<16x32xbf16>
    %c0_5 = arith.constant 0 : index
    %c0_6 = arith.constant 0 : index
    %c0_7 = arith.constant 0 : index
    %5 = vector.load %arg2[%c0_5, %c0_6, %c0_7] : memref<1x16x32xf32, #tpu.memory_space<vmem>>, vector<1x16x32xf32>
    %6 = vector.shape_cast %5 : vector<1x16x32xf32> to vector<16x32xf32>
    %7 = arith.truncf %6 : vector<16x32xf32> to vector<16x32xbf16>
    %c0_8 = arith.constant 0 : index
    %c0_9 = arith.constant 0 : index
    %8 = vector.load %arg4[%c0_8, %c0_9] : memref<32x96xbf16, #tpu.memory_space<vmem>>, vector<32x96xbf16>
    %c0_10 = arith.constant 0 : index
    %c0_11 = arith.constant 0 : index
    %9 = vector.load %arg5[%c0_10, %c0_11] : memref<1x96xf32, #tpu.memory_space<vmem>>, vector<1x96xf32>
    %cst = arith.constant dense<0.000000e+00> : vector<16x96xf32>
    %10 = tpu.matmul %4, %8, %cst {dimension_numbers = #tpu.dot_dimension_numbers<[1], [0], [0], [1], [0, 0, 1, 1], [], []>} : vector<16x32xbf16>, vector<32x96xbf16>, vector<16x96xf32> -> vector<16x96xf32>
    %11 = vector.broadcast %9 : vector<1x96xf32> to vector<16x96xf32>
    %12 = arith.addf %10, %11 : vector<16x96xf32>
    %cst_12 = arith.constant dense<0.000000e+00> : vector<16x96xf32>
    %13 = tpu.matmul %7, %8, %cst_12 {dimension_numbers = #tpu.dot_dimension_numbers<[1], [0], [0], [1], [0, 0, 1, 1], [], []>} : vector<16x32xbf16>, vector<32x96xbf16>, vector<16x96xf32> -> vector<16x96xf32>
    %14 = vector.broadcast %9 : vector<1x96xf32> to vector<16x96xf32>
    %15 = arith.addf %13, %14 : vector<16x96xf32>
    %16 = vector.extract_strided_slice %12 {offsets = [0, 0], sizes = [16, 32], strides = [1, 1]} : vector<16x96xf32> to vector<16x32xf32>
    %17 = vector.extract_strided_slice %15 {offsets = [0, 32], sizes = [16, 32], strides = [1, 1]} : vector<16x96xf32> to vector<16x32xf32>
    %18 = vector.extract_strided_slice %15 {offsets = [0, 64], sizes = [16, 32], strides = [1, 1]} : vector<16x96xf32> to vector<16x32xf32>
    %19 = vector.extract_strided_slice %16 {offsets = [0, 0], sizes = [16, 8], strides = [1, 1]} : vector<16x32xf32> to vector<16x8xf32>
    %20 = arith.truncf %19 : vector<16x8xf32> to vector<16x8xbf16>
    %21 = vector.extract_strided_slice %17 {offsets = [0, 0], sizes = [16, 8], strides = [1, 1]} : vector<16x32xf32> to vector<16x8xf32>
    %22 = arith.truncf %21 : vector<16x8xf32> to vector<16x8xbf16>
    %23 = vector.extract_strided_slice %18 {offsets = [0, 0], sizes = [16, 8], strides = [1, 1]} : vector<16x32xf32> to vector<16x8xf32>
    %24 = arith.truncf %23 : vector<16x8xf32> to vector<16x8xbf16>
    %cst_13 = arith.constant dense<0.000000e+00> : vector<16x16xf32>
    %25 = tpu.matmul %20, %22, %cst_13 {dimension_numbers = #tpu.dot_dimension_numbers<[1], [1], [0], [0], [0, 0, 1, 0], [], []>} : vector<16x8xbf16>, vector<16x8xbf16>, vector<16x16xf32> -> vector<16x16xf32>
    %cst_14 = arith.constant 0.353553385 : f32
    %26 = vector.broadcast %cst_14 : f32 to vector<16x16xf32>
    %27 = arith.mulf %25, %26 : vector<16x16xf32>
    %c0_15 = arith.constant 0 : index
    %c0_16 = arith.constant 0 : index
    %c0_17 = arith.constant 0 : index
    %28 = vector.load %arg3[%c0_15, %c0_16, %c0_17] : memref<1x16x16xf32, #tpu.memory_space<vmem>>, vector<1x16x16xf32>
    %29 = vector.shape_cast %28 : vector<1x16x16xf32> to vector<16x16xf32>
    %30 = arith.addf %27, %29 : vector<16x16xf32>
    %cst_18 = arith.constant dense<0xFF800000> : vector<16xf32>
    %31 = vector.multi_reduction <maximumf>, %30, %cst_18 [1] : vector<16x16xf32> to vector<16xf32>
    %32 = vector.shape_cast %31 : vector<16xf32> to vector<16x1xf32>
    %33 = vector.broadcast %32 : vector<16x1xf32> to vector<16x16xf32>
    %34 = arith.subf %30, %33 : vector<16x16xf32>
    %35 = math.exp %34 : vector<16x16xf32>
    %cst_19 = arith.constant dense<0.000000e+00> : vector<16xf32>
    %36 = vector.multi_reduction <add>, %35, %cst_19 [1] : vector<16x16xf32> to vector<16xf32>
    %37 = vector.shape_cast %36 : vector<16xf32> to vector<16x1xf32>
    %38 = tpu.reciprocal %37 {approx = true} : vector<16x1xf32> -> vector<16x1xf32>
    %39 = vector.broadcast %38 : vector<16x1xf32> to vector<16x16xf32>
    %40 = arith.mulf %35, %39 : vector<16x16xf32>
    %41 = arith.truncf %40 : vector<16x16xf32> to vector<16x16xbf16>
    %cst_20 = arith.constant dense<0.000000e+00> : vector<16x8xf32>
    %42 = tpu.matmul %41, %24, %cst_20 {dimension_numbers = #tpu.dot_dimension_numbers<[1], [0], [0], [1], [0, 0, 1, 1], [], []>} : vector<16x16xbf16>, vector<16x8xbf16>, vector<16x8xf32> -> vector<16x8xf32>
    %43 = vector.extract_strided_slice %16 {offsets = [0, 8], sizes = [16, 8], strides = [1, 1]} : vector<16x32xf32> to vector<16x8xf32>
    %44 = arith.truncf %43 : vector<16x8xf32> to vector<16x8xbf16>
    %45 = vector.extract_strided_slice %17 {offsets = [0, 8], sizes = [16, 8], strides = [1, 1]} : vector<16x32xf32> to vector<16x8xf32>
    %46 = arith.truncf %45 : vector<16x8xf32> to vector<16x8xbf16>
    %47 = vector.extract_strided_slice %18 {offsets = [0, 8], sizes = [16, 8], strides = [1, 1]} : vector<16x32xf32> to vector<16x8xf32>
    %48 = arith.truncf %47 : vector<16x8xf32> to vector<16x8xbf16>
    %cst_21 = arith.constant dense<0.000000e+00> : vector<16x16xf32>
    %49 = tpu.matmul %44, %46, %cst_21 {dimension_numbers = #tpu.dot_dimension_numbers<[1], [1], [0], [0], [0, 0, 1, 0], [], []>} : vector<16x8xbf16>, vector<16x8xbf16>, vector<16x16xf32> -> vector<16x16xf32>
    %cst_22 = arith.constant 0.353553385 : f32
    %50 = vector.broadcast %cst_22 : f32 to vector<16x16xf32>
    %51 = arith.mulf %49, %50 : vector<16x16xf32>
    %c0_23 = arith.constant 0 : index
    %c0_24 = arith.constant 0 : index
    %c0_25 = arith.constant 0 : index
    %52 = vector.load %arg3[%c0_23, %c0_24, %c0_25] : memref<1x16x16xf32, #tpu.memory_space<vmem>>, vector<1x16x16xf32>
    %53 = vector.shape_cast %52 : vector<1x16x16xf32> to vector<16x16xf32>
    %54 = arith.addf %51, %53 : vector<16x16xf32>
    %cst_26 = arith.constant dense<0xFF800000> : vector<16xf32>
    %55 = vector.multi_reduction <maximumf>, %54, %cst_26 [1] : vector<16x16xf32> to vector<16xf32>
    %56 = vector.shape_cast %55 : vector<16xf32> to vector<16x1xf32>
    %57 = vector.broadcast %56 : vector<16x1xf32> to vector<16x16xf32>
    %58 = arith.subf %54, %57 : vector<16x16xf32>
    %59 = math.exp %58 : vector<16x16xf32>
    %cst_27 = arith.constant dense<0.000000e+00> : vector<16xf32>
    %60 = vector.multi_reduction <add>, %59, %cst_27 [1] : vector<16x16xf32> to vector<16xf32>
    %61 = vector.shape_cast %60 : vector<16xf32> to vector<16x1xf32>
    %62 = tpu.reciprocal %61 {approx = true} : vector<16x1xf32> -> vector<16x1xf32>
    %63 = vector.broadcast %62 : vector<16x1xf32> to vector<16x16xf32>
    %64 = arith.mulf %59, %63 : vector<16x16xf32>
    %65 = arith.truncf %64 : vector<16x16xf32> to vector<16x16xbf16>
    %cst_28 = arith.constant dense<0.000000e+00> : vector<16x8xf32>
    %66 = tpu.matmul %65, %48, %cst_28 {dimension_numbers = #tpu.dot_dimension_numbers<[1], [0], [0], [1], [0, 0, 1, 1], [], []>} : vector<16x16xbf16>, vector<16x8xbf16>, vector<16x8xf32> -> vector<16x8xf32>
    %67 = vector.extract_strided_slice %16 {offsets = [0, 16], sizes = [16, 8], strides = [1, 1]} : vector<16x32xf32> to vector<16x8xf32>
    %68 = arith.truncf %67 : vector<16x8xf32> to vector<16x8xbf16>
    %69 = vector.extract_strided_slice %17 {offsets = [0, 16], sizes = [16, 8], strides = [1, 1]} : vector<16x32xf32> to vector<16x8xf32>
    %70 = arith.truncf %69 : vector<16x8xf32> to vector<16x8xbf16>
    %71 = vector.extract_strided_slice %18 {offsets = [0, 16], sizes = [16, 8], strides = [1, 1]} : vector<16x32xf32> to vector<16x8xf32>
    %72 = arith.truncf %71 : vector<16x8xf32> to vector<16x8xbf16>
    %cst_29 = arith.constant dense<0.000000e+00> : vector<16x16xf32>
    %73 = tpu.matmul %68, %70, %cst_29 {dimension_numbers = #tpu.dot_dimension_numbers<[1], [1], [0], [0], [0, 0, 1, 0], [], []>} : vector<16x8xbf16>, vector<16x8xbf16>, vector<16x16xf32> -> vector<16x16xf32>
    %cst_30 = arith.constant 0.353553385 : f32
    %74 = vector.broadcast %cst_30 : f32 to vector<16x16xf32>
    %75 = arith.mulf %73, %74 : vector<16x16xf32>
    %c0_31 = arith.constant 0 : index
    %c0_32 = arith.constant 0 : index
    %c0_33 = arith.constant 0 : index
    %76 = vector.load %arg3[%c0_31, %c0_32, %c0_33] : memref<1x16x16xf32, #tpu.memory_space<vmem>>, vector<1x16x16xf32>
    %77 = vector.shape_cast %76 : vector<1x16x16xf32> to vector<16x16xf32>
    %78 = arith.addf %75, %77 : vector<16x16xf32>
    %cst_34 = arith.constant dense<0xFF800000> : vector<16xf32>
    %79 = vector.multi_reduction <maximumf>, %78, %cst_34 [1] : vector<16x16xf32> to vector<16xf32>
    %80 = vector.shape_cast %79 : vector<16xf32> to vector<16x1xf32>
    %81 = vector.broadcast %80 : vector<16x1xf32> to vector<16x16xf32>
    %82 = arith.subf %78, %81 : vector<16x16xf32>
    %83 = math.exp %82 : vector<16x16xf32>
    %cst_35 = arith.constant dense<0.000000e+00> : vector<16xf32>
    %84 = vector.multi_reduction <add>, %83, %cst_35 [1] : vector<16x16xf32> to vector<16xf32>
    %85 = vector.shape_cast %84 : vector<16xf32> to vector<16x1xf32>
    %86 = tpu.reciprocal %85 {approx = true} : vector<16x1xf32> -> vector<16x1xf32>
    %87 = vector.broadcast %86 : vector<16x1xf32> to vector<16x16xf32>
    %88 = arith.mulf %83, %87 : vector<16x16xf32>
    %89 = arith.truncf %88 : vector<16x16xf32> to vector<16x16xbf16>
    %cst_36 = arith.constant dense<0.000000e+00> : vector<16x8xf32>
    %90 = tpu.matmul %89, %72, %cst_36 {dimension_numbers = #tpu.dot_dimension_numbers<[1], [0], [0], [1], [0, 0, 1, 1], [], []>} : vector<16x16xbf16>, vector<16x8xbf16>, vector<16x8xf32> -> vector<16x8xf32>
    %91 = vector.extract_strided_slice %16 {offsets = [0, 24], sizes = [16, 8], strides = [1, 1]} : vector<16x32xf32> to vector<16x8xf32>
    %92 = arith.truncf %91 : vector<16x8xf32> to vector<16x8xbf16>
    %93 = vector.extract_strided_slice %17 {offsets = [0, 24], sizes = [16, 8], strides = [1, 1]} : vector<16x32xf32> to vector<16x8xf32>
    %94 = arith.truncf %93 : vector<16x8xf32> to vector<16x8xbf16>
    %95 = vector.extract_strided_slice %18 {offsets = [0, 24], sizes = [16, 8], strides = [1, 1]} : vector<16x32xf32> to vector<16x8xf32>
    %96 = arith.truncf %95 : vector<16x8xf32> to vector<16x8xbf16>
    %cst_37 = arith.constant dense<0.000000e+00> : vector<16x16xf32>
    %97 = tpu.matmul %92, %94, %cst_37 {dimension_numbers = #tpu.dot_dimension_numbers<[1], [1], [0], [0], [0, 0, 1, 0], [], []>} : vector<16x8xbf16>, vector<16x8xbf16>, vector<16x16xf32> -> vector<16x16xf32>
    %cst_38 = arith.constant 0.353553385 : f32
    %98 = vector.broadcast %cst_38 : f32 to vector<16x16xf32>
    %99 = arith.mulf %97, %98 : vector<16x16xf32>
    %c0_39 = arith.constant 0 : index
    %c0_40 = arith.constant 0 : index
    %c0_41 = arith.constant 0 : index
    %100 = vector.load %arg3[%c0_39, %c0_40, %c0_41] : memref<1x16x16xf32, #tpu.memory_space<vmem>>, vector<1x16x16xf32>
    %101 = vector.shape_cast %100 : vector<1x16x16xf32> to vector<16x16xf32>
    %102 = arith.addf %99, %101 : vector<16x16xf32>
    %cst_42 = arith.constant dense<0xFF800000> : vector<16xf32>
    %103 = vector.multi_reduction <maximumf>, %102, %cst_42 [1] : vector<16x16xf32> to vector<16xf32>
    %104 = vector.shape_cast %103 : vector<16xf32> to vector<16x1xf32>
    %105 = vector.broadcast %104 : vector<16x1xf32> to vector<16x16xf32>
    %106 = arith.subf %102, %105 : vector<16x16xf32>
    %107 = math.exp %106 : vector<16x16xf32>
    %cst_43 = arith.constant dense<0.000000e+00> : vector<16xf32>
    %108 = vector.multi_reduction <add>, %107, %cst_43 [1] : vector<16x16xf32> to vector<16xf32>
    %109 = vector.shape_cast %108 : vector<16xf32> to vector<16x1xf32>
    %110 = tpu.reciprocal %109 {approx = true} : vector<16x1xf32> -> vector<16x1xf32>
    %111 = vector.broadcast %110 : vector<16x1xf32> to vector<16x16xf32>
    %112 = arith.mulf %107, %111 : vector<16x16xf32>
    %113 = arith.truncf %112 : vector<16x16xf32> to vector<16x16xbf16>
    %cst_44 = arith.constant dense<0.000000e+00> : vector<16x8xf32>
    %114 = tpu.matmul %113, %96, %cst_44 {dimension_numbers = #tpu.dot_dimension_numbers<[1], [0], [0], [1], [0, 0, 1, 1], [], []>} : vector<16x16xbf16>, vector<16x8xbf16>, vector<16x8xf32> -> vector<16x8xf32>
    %115 = tpu.concatenate %42, %66, %90, %114 in 1 : vector<16x8xf32>, vector<16x8xf32>, vector<16x8xf32>, vector<16x8xf32> -> vector<16x32xf32>
    %116 = arith.truncf %115 : vector<16x32xf32> to vector<16x32xbf16>
    %c0_45 = arith.constant 0 : index
    %c0_46 = arith.constant 0 : index
    %117 = vector.load %arg6[%c0_45, %c0_46] : memref<32x32xbf16, #tpu.memory_space<vmem>>, vector<32x32xbf16>
    %cst_47 = arith.constant dense<0.000000e+00> : vector<16x32xf32>
    %118 = tpu.matmul %116, %117, %cst_47 {dimension_numbers = #tpu.dot_dimension_numbers<[1], [0], [0], [1], [0, 0, 1, 1], [], []>} : vector<16x32xbf16>, vector<32x32xbf16>, vector<16x32xf32> -> vector<16x32xf32>
    %c0_48 = arith.constant 0 : index
    %c0_49 = arith.constant 0 : index
    %119 = vector.load %arg7[%c0_48, %c0_49] : memref<1x32xf32, #tpu.memory_space<vmem>>, vector<1x32xf32>
    %120 = vector.broadcast %119 : vector<1x32xf32> to vector<16x32xf32>
    %121 = arith.addf %118, %120 : vector<16x32xf32>
    %122 = arith.addf %1, %121 : vector<16x32xf32>
    %c0_50 = arith.constant 0 : index
    %c0_51 = arith.constant 0 : index
    %123 = vector.load %arg8[%c0_50, %c0_51] : memref<1x32xf32, #tpu.memory_space<vmem>>, vector<1x32xf32>
    %c0_52 = arith.constant 0 : index
    %c0_53 = arith.constant 0 : index
    %124 = vector.load %arg9[%c0_52, %c0_53] : memref<1x32xf32, #tpu.memory_space<vmem>>, vector<1x32xf32>
    %cst_54 = arith.constant dense<0.000000e+00> : vector<16xf32>
    %125 = vector.multi_reduction <add>, %122, %cst_54 [1] : vector<16x32xf32> to vector<16xf32>
    %126 = vector.shape_cast %125 : vector<16xf32> to vector<16x1xf32>
    %cst_55 = arith.constant 3.200000e+01 : f32
    %127 = vector.broadcast %cst_55 : f32 to vector<16x1xf32>
    %128 = arith.divf %126, %127 : vector<16x1xf32>
    %129 = vector.broadcast %128 : vector<16x1xf32> to vector<16x32xf32>
    %130 = arith.subf %122, %129 : vector<16x32xf32>
    %131 = arith.mulf %130, %130 : vector<16x32xf32>
    %cst_56 = arith.constant dense<0.000000e+00> : vector<16xf32>
    %132 = vector.multi_reduction <add>, %131, %cst_56 [1] : vector<16x32xf32> to vector<16xf32>
    %133 = vector.shape_cast %132 : vector<16xf32> to vector<16x1xf32>
    %cst_57 = arith.constant 3.200000e+01 : f32
    %134 = vector.broadcast %cst_57 : f32 to vector<16x1xf32>
    %135 = arith.divf %133, %134 : vector<16x1xf32>
    %cst_58 = arith.constant 9.99999974E-6 : f32
    %136 = vector.broadcast %cst_58 : f32 to vector<16x1xf32>
    %137 = arith.addf %135, %136 : vector<16x1xf32>
    %138 = math.rsqrt %137 : vector<16x1xf32>
    %139 = vector.broadcast %138 : vector<16x1xf32> to vector<16x32xf32>
    %140 = arith.mulf %130, %139 : vector<16x32xf32>
    %141 = vector.broadcast %123 : vector<1x32xf32> to vector<16x32xf32>
    %142 = arith.mulf %140, %141 : vector<16x32xf32>
    %143 = vector.broadcast %124 : vector<1x32xf32> to vector<16x32xf32>
    %144 = arith.addf %142, %143 : vector<16x32xf32>
    %145 = arith.truncf %144 : vector<16x32xf32> to vector<16x32xbf16>
    %c0_59 = arith.constant 0 : index
    %c0_60 = arith.constant 0 : index
    %146 = vector.load %arg10[%c0_59, %c0_60] : memref<32x128xbf16, #tpu.memory_space<vmem>>, vector<32x128xbf16>
    %cst_61 = arith.constant dense<0.000000e+00> : vector<16x128xf32>
    %147 = tpu.matmul %145, %146, %cst_61 {dimension_numbers = #tpu.dot_dimension_numbers<[1], [0], [0], [1], [0, 0, 1, 1], [], []>} : vector<16x32xbf16>, vector<32x128xbf16>, vector<16x128xf32> -> vector<16x128xf32>
    %c0_62 = arith.constant 0 : index
    %c0_63 = arith.constant 0 : index
    %148 = vector.load %arg11[%c0_62, %c0_63] : memref<1x128xf32, #tpu.memory_space<vmem>>, vector<1x128xf32>
    %149 = vector.broadcast %148 : vector<1x128xf32> to vector<16x128xf32>
    %150 = arith.addf %147, %149 : vector<16x128xf32>
    %cst_64 = arith.constant 0.000000e+00 : f32
    %151 = vector.broadcast %cst_64 : f32 to vector<16x128xf32>
    %152 = arith.maximumf %150, %151 : vector<16x128xf32>
    %153 = arith.truncf %152 : vector<16x128xf32> to vector<16x128xbf16>
    %c0_65 = arith.constant 0 : index
    %c0_66 = arith.constant 0 : index
    %154 = vector.load %arg12[%c0_65, %c0_66] : memref<128x32xbf16, #tpu.memory_space<vmem>>, vector<128x32xbf16>
    %cst_67 = arith.constant dense<0.000000e+00> : vector<16x32xf32>
    %155 = tpu.matmul %153, %154, %cst_67 {dimension_numbers = #tpu.dot_dimension_numbers<[1], [0], [0], [1], [0, 0, 1, 1], [], []>} : vector<16x128xbf16>, vector<128x32xbf16>, vector<16x32xf32> -> vector<16x32xf32>
    %c0_68 = arith.constant 0 : index
    %c0_69 = arith.constant 0 : index
    %156 = vector.load %arg13[%c0_68, %c0_69] : memref<1x32xf32, #tpu.memory_space<vmem>>, vector<1x32xf32>
    %157 = vector.broadcast %156 : vector<1x32xf32> to vector<16x32xf32>
    %158 = arith.addf %155, %157 : vector<16x32xf32>
    %159 = arith.addf %144, %158 : vector<16x32xf32>
    %c0_70 = arith.constant 0 : index
    %c0_71 = arith.constant 0 : index
    %160 = vector.load %arg14[%c0_70, %c0_71] : memref<1x32xf32, #tpu.memory_space<vmem>>, vector<1x32xf32>
    %c0_72 = arith.constant 0 : index
    %c0_73 = arith.constant 0 : index
    %161 = vector.load %arg15[%c0_72, %c0_73] : memref<1x32xf32, #tpu.memory_space<vmem>>, vector<1x32xf32>
    %cst_74 = arith.constant dense<0.000000e+00> : vector<16xf32>
    %162 = vector.multi_reduction <add>, %159, %cst_74 [1] : vector<16x32xf32> to vector<16xf32>
    %163 = vector.shape_cast %162 : vector<16xf32> to vector<16x1xf32>
    %cst_75 = arith.constant 3.200000e+01 : f32
    %164 = vector.broadcast %cst_75 : f32 to vector<16x1xf32>
    %165 = arith.divf %163, %164 : vector<16x1xf32>
    %166 = vector.broadcast %165 : vector<16x1xf32> to vector<16x32xf32>
    %167 = arith.subf %159, %166 : vector<16x32xf32>
    %168 = arith.mulf %167, %167 : vector<16x32xf32>
    %cst_76 = arith.constant dense<0.000000e+00> : vector<16xf32>
    %169 = vector.multi_reduction <add>, %168, %cst_76 [1] : vector<16x32xf32> to vector<16xf32>
    %170 = vector.shape_cast %169 : vector<16xf32> to vector<16x1xf32>
    %cst_77 = arith.constant 3.200000e+01 : f32
    %171 = vector.broadcast %cst_77 : f32 to vector<16x1xf32>
    %172 = arith.divf %170, %171 : vector<16x1xf32>
    %cst_78 = arith.constant 9.99999974E-6 : f32
    %173 = vector.broadcast %cst_78 : f32 to vector<16x1xf32>
    %174 = arith.addf %172, %173 : vector<16x1xf32>
    %175 = math.rsqrt %174 : vector<16x1xf32>
    %176 = vector.broadcast %175 : vector<16x1xf32> to vector<16x32xf32>
    %177 = arith.mulf %167, %176 : vector<16x32xf32>
    %178 = vector.broadcast %160 : vector<1x32xf32> to vector<16x32xf32>
    %179 = arith.mulf %177, %178 : vector<16x32xf32>
    %180 = vector.broadcast %161 : vector<1x32xf32> to vector<16x32xf32>
    %181 = arith.addf %179, %180 : vector<16x32xf32>
    %c0_79 = arith.constant 0 : index
    %c0_80 = arith.constant 0 : index
    %c0_81 = arith.constant 0 : index
    %182 = vector.load %arg16[%c0_79, %c0_80, %c0_81] : memref<1x16x32xf32, #tpu.memory_space<vmem>>, vector<1x16x32xf32>
    %183 = vector.shape_cast %182 : vector<1x16x32xf32> to vector<16x32xf32>
    %184 = vector.shape_cast %181 : vector<16x32xf32> to vector<1x16x32xf32>
    tpu.vector_store %arg16[%c0_79, %c0_80, %c0_81], %184 {strides = array<i32>} : memref<1x16x32xf32, #tpu.memory_space<vmem>>, vector<1x16x32xf32>,
    return
  }
  func.func @transform_0(%arg0: i32) -> (i32, i32, i32) {
    %c0_i32 = arith.constant 0 : i32
    %c0_i32_0 = arith.constant 0 : i32
    %c0_i32_1 = arith.constant 0 : i32
    return %arg0, %c0_i32, %c0_i32_0 : i32, i32, i32
  }
  func.func @transform_1(%arg0: i32) -> (i32, i32, i32) {
    %c0_i32 = arith.constant 0 : i32
    %c0_i32_0 = arith.constant 0 : i32
    %c0_i32_1 = arith.constant 0 : i32
    return %arg0, %c0_i32, %c0_i32_0 : i32, i32, i32
  }
  func.func @transform_2(%arg0: i32) -> (i32, i32, i32) {
    %c0_i32 = arith.constant 0 : i32
    %c0_i32_0 = arith.constant 0 : i32
    %c0_i32_1 = arith.constant 0 : i32
    return %arg0, %c0_i32, %c0_i32_0 : i32, i32, i32
  }
  func.func @transform_3(%arg0: i32) -> (i32, i32) {
    %c0_i32 = arith.constant 0 : i32
    %c0_i32_0 = arith.constant 0 : i32
    %c0_i32_1 = arith.constant 0 : i32
    return %c0_i32, %c0_i32_0 : i32, i32
  }
  func.func @transform_4(%arg0: i32) -> (i32, i32) {
    %c0_i32 = arith.constant 0 : i32
    %c0_i32_0 = arith.constant 0 : i32
    %c0_i32_1 = arith.constant 0 : i32
    return %c0_i32, %c0_i32_0 : i32, i32
  }
  func.func @transform_5(%arg0: i32) -> (i32, i32) {
    %c0_i32 = arith.constant 0 : i32
    %c0_i32_0 = arith.constant 0 : i32
    %c0_i32_1 = arith.constant 0 : i32
    return %c0_i32, %c0_i32_0 : i32, i32
  }
  func.func @transform_6(%arg0: i32) -> (i32, i32) {
    %c0_i32 = arith.constant 0 : i32
    %c0_i32_0 = arith.constant 0 : i32
    %c0_i32_1 = arith.constant 0 : i32
    return %c0_i32, %c0_i32_0 : i32, i32
  }
  func.func @transform_7(%arg0: i32) -> (i32, i32) {
    %c0_i32 = arith.constant 0 : i32
    %c0_i32_0 = arith.constant 0 : i32
    %c0_i32_1 = arith.constant 0 : i32
    return %c0_i32, %c0_i32_0 : i32, i32
  }
  func.func @transform_8(%arg0: i32) -> (i32, i32) {
    %c0_i32 = arith.constant 0 : i32
    %c0_i32_0 = arith.constant 0 : i32
    %c0_i32_1 = arith.constant 0 : i32
    return %c0_i32, %c0_i32_0 : i32, i32
  }
  func.func @transform_9(%arg0: i32) -> (i32, i32) {
    %c0_i32 = arith.constant 0 : i32
    %c0_i32_0 = arith.constant 0 : i32
    %c0_i32_1 = arith.constant 0 : i32
    return %c0_i32, %c0_i32_0 : i32, i32
  }
  func.func @transform_10(%arg0: i32) -> (i32, i32) {
    %c0_i32 = arith.constant 0 : i32
    %c0_i32_0 = arith.constant 0 : i32
    %c0_i32_1 = arith.constant 0 : i32
    return %c0_i32, %c0_i32_0 : i32, i32
  }
  func.func @transform_11(%arg0: i32) -> (i32, i32) {
    %c0_i32 = arith.constant 0 : i32
    %c0_i32_0 = arith.constant 0 : i32
    %c0_i32_1 = arith.constant 0 : i32
    return %c0_i32, %c0_i32_0 : i32, i32
  }
  func.func @transform_12(%arg0: i32) -> (i32, i32) {
    %c0_i32 = arith.constant 0 : i32
    %c0_i32_0 = arith.constant 0 : i32
    %c0_i32_1 = arith.constant 0 : i32
    return %c0_i32, %c0_i32_0 : i32, i32
  }
  func.func @transform_13(%arg0: i32) -> (i32, i32) {
    %c0_i32 = arith.constant 0 : i32
    %c0_i32_0 = arith.constant 0 : i32
    %c0_i32_1 = arith.constant 0 : i32
    return %c0_i32, %c0_i32_0 : i32, i32
  }
  func.func @transform_14(%arg0: i32) -> (i32, i32) {
    %c0_i32 = arith.constant 0 : i32
    %c0_i32_0 = arith.constant 0 : i32
    %c0_i32_1 = arith.constant 0 : i32
    return %c0_i32, %c0_i32_0 : i32, i32
  }
  func.func @transform_15(%arg0: i32) -> (i32, i32, i32) {
    %c0_i32 = arith.constant 0 : i32
    %c0_i32_0 = arith.constant 0 : i32
    %c0_i32_1 = arith.constant 0 : i32
    return %arg0, %c0_i32, %c0_i32_0 : i32, i32, i32
  }
}

module attributes {stable_mosaic.version = 11 : i64} {
  func.func @kernel(%arg0: i32, %arg1: memref<32x32xf32, #tpu.memory_space<vmem>>, %arg2: memref<1x32xf32, #tpu.memory_space<vmem>>, %arg3: memref<1x32xf32, #tpu.memory_space<vmem>>, %arg4: memref<32x128xbf16, #tpu.memory_space<vmem>>, %arg5: memref<32x128xf32, #tpu.memory_space<vmem>>) attributes {dimension_semantics = [#tpu.dimension_semantics<arbitrary>], iteration_bounds = array<i64: 1>, scalar_prefetch = 0 : i64, scratch_operands = 0 : i64, tpu.core_type = #tpu.core_type<tc>, window_params = [{pipeline_mode = #tpu.pipeline_mode<synchronous>, transform_indices = @transform_0, window_bounds = array<i64: 32, 32>}, {pipeline_mode = #tpu.pipeline_mode<synchronous>, transform_indices = @transform_1, window_bounds = array<i64: 1, 32>}, {pipeline_mode = #tpu.pipeline_mode<synchronous>, transform_indices = @transform_2, window_bounds = array<i64: 1, 32>}, {pipeline_mode = #tpu.pipeline_mode<synchronous>, transform_indices = @transform_3, window_bounds = array<i64: 32, 128>}, {pipeline_mode = #tpu.pipeline_mode<synchronous>, transform_indices = @transform_4, window_bounds = array<i64: 32, 128>}]} {
    %c0 = arith.constant 0 : index
    %c0_0 = arith.constant 0 : index
    %0 = vector.load %arg1[%c0, %c0_0] : memref<32x32xf32, #tpu.memory_space<vmem>>, vector<32x32xf32>
    %cst = arith.constant dense<0.000000e+00> : vector<32xf32>
    %1 = vector.multi_reduction <add>, %0, %cst [1] : vector<32x32xf32> to vector<32xf32>
    %2 = vector.shape_cast %1 : vector<32xf32> to vector<32x1xf32>
    %cst_1 = arith.constant 3.200000e+01 : f32
    %3 = vector.broadcast %cst_1 : f32 to vector<32x1xf32>
    %4 = arith.divf %2, %3 : vector<32x1xf32>
    %5 = vector.broadcast %4 : vector<32x1xf32> to vector<32x32xf32>
    %6 = arith.subf %0, %5 : vector<32x32xf32>
    %7 = arith.mulf %6, %6 : vector<32x32xf32>
    %cst_2 = arith.constant dense<0.000000e+00> : vector<32xf32>
    %8 = vector.multi_reduction <add>, %7, %cst_2 [1] : vector<32x32xf32> to vector<32xf32>
    %9 = vector.shape_cast %8 : vector<32xf32> to vector<32x1xf32>
    %cst_3 = arith.constant 3.200000e+01 : f32
    %10 = vector.broadcast %cst_3 : f32 to vector<32x1xf32>
    %11 = arith.divf %9, %10 : vector<32x1xf32>
    %cst_4 = arith.constant 9.99999974E-6 : f32
    %12 = vector.broadcast %cst_4 : f32 to vector<32x1xf32>
    %13 = arith.addf %11, %12 : vector<32x1xf32>
    %14 = math.rsqrt %13 : vector<32x1xf32>
    %15 = vector.broadcast %14 : vector<32x1xf32> to vector<32x32xf32>
    %16 = arith.mulf %6, %15 : vector<32x32xf32>
    %c0_5 = arith.constant 0 : index
    %c0_6 = arith.constant 0 : index
    %17 = vector.load %arg2[%c0_5, %c0_6] : memref<1x32xf32, #tpu.memory_space<vmem>>, vector<1x32xf32>
    %18 = vector.broadcast %17 : vector<1x32xf32> to vector<32x32xf32>
    %19 = arith.mulf %16, %18 : vector<32x32xf32>
    %c0_7 = arith.constant 0 : index
    %c0_8 = arith.constant 0 : index
    %20 = vector.load %arg3[%c0_7, %c0_8] : memref<1x32xf32, #tpu.memory_space<vmem>>, vector<1x32xf32>
    %21 = vector.broadcast %20 : vector<1x32xf32> to vector<32x32xf32>
    %22 = arith.addf %19, %21 : vector<32x32xf32>
    %23 = arith.truncf %22 : vector<32x32xf32> to vector<32x32xbf16>
    %c0_9 = arith.constant 0 : index
    %c0_10 = arith.constant 0 : index
    %24 = vector.load %arg4[%c0_9, %c0_10] : memref<32x128xbf16, #tpu.memory_space<vmem>>, vector<32x128xbf16>
    %cst_11 = arith.constant dense<0.000000e+00> : vector<32x128xf32>
    %25 = tpu.matmul %23, %24, %cst_11 {dimension_numbers = #tpu.dot_dimension_numbers<[1], [0], [0], [1], [0, 0, 1, 1], [], []>} : vector<32x32xbf16>, vector<32x128xbf16>, vector<32x128xf32> -> vector<32x128xf32>
    %c0_12 = arith.constant 0 : index
    %c0_13 = arith.constant 0 : index
    %26 = vector.load %arg5[%c0_12, %c0_13] : memref<32x128xf32, #tpu.memory_space<vmem>>, vector<32x128xf32>
    tpu.vector_store %arg5[%c0_12, %c0_13], %25 {strides = array<i32>} : memref<32x128xf32, #tpu.memory_space<vmem>>, vector<32x128xf32>,
    return
  }
  func.func @transform_0(%arg0: i32) -> (i32, i32) {
    %c0_i32 = arith.constant 0 : i32
    %c0_i32_0 = arith.constant 0 : i32
    %c0_i32_1 = arith.constant 0 : i32
    return %c0_i32, %c0_i32_0 : i32, i32
  }
  func.func @transform_1(%arg0: i32) -> (i32, i32) {
    %c0_i32 = arith.constant 0 : i32
    %c0_i32_0 = arith.constant 0 : i32
    %c0_i32_1 = arith.constant 0 : i32
    return %c0_i32, %c0_i32_0 : i32, i32
  }
  func.func @transform_2(%arg0: i32) -> (i32, i32) {
    %c0_i32 = arith.constant 0 : i32
    %c0_i32_0 = arith.constant 0 : i32
    %c0_i32_1 = arith.constant 0 : i32
    return %c0_i32, %c0_i32_0 : i32, i32
  }
  func.func @transform_3(%arg0: i32) -> (i32, i32) {
    %c0_i32 = arith.constant 0 : i32
    %c0_i32_0 = arith.constant 0 : i32
    %c0_i32_1 = arith.constant 0 : i32
    return %c0_i32, %c0_i32_0 : i32, i32
  }
  func.func @transform_4(%arg0: i32) -> (i32, i32) {
    %c0_i32 = arith.constant 0 : i32
    %c0_i32_0 = arith.constant 0 : i32
    %c0_i32_1 = arith.constant 0 : i32
    return %c0_i32, %c0_i32_0 : i32, i32
  }
}

module attributes {stable_mosaic.version = 11 : i64} {
  func.func @kernel(%arg0: i32, %arg1: memref<1x16x32xf32, #tpu.memory_space<vmem>>, %arg2: memref<1x8x32xf32, #tpu.memory_space<vmem>>, %arg3: memref<32x96xbf16, #tpu.memory_space<vmem>>, %arg4: memref<1x96xf32, #tpu.memory_space<vmem>>, %arg5: memref<32x32xbf16, #tpu.memory_space<vmem>>, %arg6: memref<1x32xf32, #tpu.memory_space<vmem>>, %arg7: memref<1x32xf32, #tpu.memory_space<vmem>>, %arg8: memref<1x32xf32, #tpu.memory_space<vmem>>, %arg9: memref<32x128xbf16, #tpu.memory_space<vmem>>, %arg10: memref<1x128xf32, #tpu.memory_space<vmem>>, %arg11: memref<128x32xbf16, #tpu.memory_space<vmem>>, %arg12: memref<1x32xf32, #tpu.memory_space<vmem>>, %arg13: memref<1x32xf32, #tpu.memory_space<vmem>>, %arg14: memref<1x32xf32, #tpu.memory_space<vmem>>, %arg15: memref<1x16x32xf32, #tpu.memory_space<vmem>>) attributes {dimension_semantics = [#tpu.dimension_semantics<parallel>], iteration_bounds = array<i64: 2>, scalar_prefetch = 0 : i64, scratch_operands = 0 : i64, tpu.core_type = #tpu.core_type<tc>, window_params = [{transform_indices = @transform_0, window_bounds = array<i64: 1, 16, 32>}, {transform_indices = @transform_1, window_bounds = array<i64: 1, 8, 32>}, {pipeline_mode = #tpu.pipeline_mode<synchronous>, transform_indices = @transform_2, window_bounds = array<i64: 32, 96>}, {pipeline_mode = #tpu.pipeline_mode<synchronous>, transform_indices = @transform_3, window_bounds = array<i64: 1, 96>}, {pipeline_mode = #tpu.pipeline_mode<synchronous>, transform_indices = @transform_4, window_bounds = array<i64: 32, 32>}, {pipeline_mode = #tpu.pipeline_mode<synchronous>, transform_indices = @transform_5, window_bounds = array<i64: 1, 32>}, {pipeline_mode = #tpu.pipeline_mode<synchronous>, transform_indices = @transform_6, window_bounds = array<i64: 1, 32>}, {pipeline_mode = #tpu.pipeline_mode<synchronous>, transform_indices = @transform_7, window_bounds = array<i64: 1, 32>}, {pipeline_mode = #tpu.pipeline_mode<synchronous>, transform_indices = @transform_8, window_bounds = array<i64: 32, 128>}, {pipeline_mode = #tpu.pipeline_mode<synchronous>, transform_indices = @transform_9, window_bounds = array<i64: 1, 128>}, {pipeline_mode = #tpu.pipeline_mode<synchronous>, transform_indices = @transform_10, window_bounds = array<i64: 128, 32>}, {pipeline_mode = #tpu.pipeline_mode<synchronous>, transform_indices = @transform_11, window_bounds = array<i64: 1, 32>}, {pipeline_mode = #tpu.pipeline_mode<synchronous>, transform_indices = @transform_12, window_bounds = array<i64: 1, 32>}, {pipeline_mode = #tpu.pipeline_mode<synchronous>, transform_indices = @transform_13, window_bounds = array<i64: 1, 32>}, {transform_indices = @transform_14, window_bounds = array<i64: 1, 16, 32>}]} {
    %c0 = arith.constant 0 : index
    %c0_0 = arith.constant 0 : index
    %c0_1 = arith.constant 0 : index
    %0 = vector.load %arg1[%c0, %c0_0, %c0_1] : memref<1x16x32xf32, #tpu.memory_space<vmem>>, vector<1x16x32xf32>
    %1 = vector.shape_cast %0 : vector<1x16x32xf32> to vector<16x32xf32>
    %c0_2 = arith.constant 0 : index
    %c0_3 = arith.constant 0 : index
    %c0_4 = arith.constant 0 : index
    %2 = vector.load %arg1[%c0_2, %c0_3, %c0_4] : memref<1x16x32xf32, #tpu.memory_space<vmem>>, vector<1x16x32xf32>
    %3 = vector.shape_cast %2 : vector<1x16x32xf32> to vector<16x32xf32>
    %4 = arith.truncf %3 : vector<16x32xf32> to vector<16x32xbf16>
    %c0_5 = arith.constant 0 : index
    %c0_6 = arith.constant 0 : index
    %c0_7 = arith.constant 0 : index
    %5 = vector.load %arg2[%c0_5, %c0_6, %c0_7] : memref<1x8x32xf32, #tpu.memory_space<vmem>>, vector<1x8x32xf32>
    %6 = vector.shape_cast %5 : vector<1x8x32xf32> to vector<8x32xf32>
    %7 = arith.truncf %6 : vector<8x32xf32> to vector<8x32xbf16>
    %c0_8 = arith.constant 0 : index
    %c0_9 = arith.constant 0 : index
    %8 = vector.load %arg3[%c0_8, %c0_9] : memref<32x96xbf16, #tpu.memory_space<vmem>>, vector<32x96xbf16>
    %c0_10 = arith.constant 0 : index
    %c0_11 = arith.constant 0 : index
    %9 = vector.load %arg4[%c0_10, %c0_11] : memref<1x96xf32, #tpu.memory_space<vmem>>, vector<1x96xf32>
    %cst = arith.constant dense<0.000000e+00> : vector<16x96xf32>
    %10 = tpu.matmul %4, %8, %cst {dimension_numbers = #tpu.dot_dimension_numbers<[1], [0], [0], [1], [0, 0, 1, 1], [], []>} : vector<16x32xbf16>, vector<32x96xbf16>, vector<16x96xf32> -> vector<16x96xf32>
    %11 = vector.broadcast %9 : vector<1x96xf32> to vector<16x96xf32>
    %12 = arith.addf %10, %11 : vector<16x96xf32>
    %cst_12 = arith.constant dense<0.000000e+00> : vector<8x96xf32>
    %13 = tpu.matmul %7, %8, %cst_12 {dimension_numbers = #tpu.dot_dimension_numbers<[1], [0], [0], [1], [0, 0, 1, 1], [], []>} : vector<8x32xbf16>, vector<32x96xbf16>, vector<8x96xf32> -> vector<8x96xf32>
    %14 = vector.broadcast %9 : vector<1x96xf32> to vector<8x96xf32>
    %15 = arith.addf %13, %14 : vector<8x96xf32>
    %16 = vector.extract_strided_slice %12 {offsets = [0, 0], sizes = [16, 32], strides = [1, 1]} : vector<16x96xf32> to vector<16x32xf32>
    %17 = vector.extract_strided_slice %15 {offsets = [0, 32], sizes = [8, 32], strides = [1, 1]} : vector<8x96xf32> to vector<8x32xf32>
    %18 = vector.extract_strided_slice %15 {offsets = [0, 64], sizes = [8, 32], strides = [1, 1]} : vector<8x96xf32> to vector<8x32xf32>
    %19 = vector.extract_strided_slice %16 {offsets = [0, 0], sizes = [16, 8], strides = [1, 1]} : vector<16x32xf32> to vector<16x8xf32>
    %20 = arith.truncf %19 : vector<16x8xf32> to vector<16x8xbf16>
    %21 = vector.extract_strided_slice %17 {offsets = [0, 0], sizes = [8, 8], strides = [1, 1]} : vector<8x32xf32> to vector<8x8xf32>
    %22 = arith.truncf %21 : vector<8x8xf32> to vector<8x8xbf16>
    %23 = vector.extract_strided_slice %18 {offsets = [0, 0], sizes = [8, 8], strides = [1, 1]} : vector<8x32xf32> to vector<8x8xf32>
    %24 = arith.truncf %23 : vector<8x8xf32> to vector<8x8xbf16>
    %cst_13 = arith.constant dense<0.000000e+00> : vector<16x8xf32>
    %25 = tpu.matmul %20, %22, %cst_13 {dimension_numbers = #tpu.dot_dimension_numbers<[1], [1], [0], [0], [0, 0, 1, 0], [], []>} : vector<16x8xbf16>, vector<8x8xbf16>, vector<16x8xf32> -> vector<16x8xf32>
    %cst_14 = arith.constant 0.353553385 : f32
    %26 = vector.broadcast %cst_14 : f32 to vector<16x8xf32>
    %27 = arith.mulf %25, %26 : vector<16x8xf32>
    %cst_15 = arith.constant dense<0xFF800000> : vector<16xf32>
    %28 = vector.multi_reduction <maximumf>, %27, %cst_15 [1] : vector<16x8xf32> to vector<16xf32>
    %29 = vector.shape_cast %28 : vector<16xf32> to vector<16x1xf32>
    %30 = vector.broadcast %29 : vector<16x1xf32> to vector<16x8xf32>
    %31 = arith.subf %27, %30 : vector<16x8xf32>
    %32 = math.exp %31 : vector<16x8xf32>
    %cst_16 = arith.constant dense<0.000000e+00> : vector<16xf32>
    %33 = vector.multi_reduction <add>, %32, %cst_16 [1] : vector<16x8xf32> to vector<16xf32>
    %34 = vector.shape_cast %33 : vector<16xf32> to vector<16x1xf32>
    %35 = tpu.reciprocal %34 {approx = true} : vector<16x1xf32> -> vector<16x1xf32>
    %36 = vector.broadcast %35 : vector<16x1xf32> to vector<16x8xf32>
    %37 = arith.mulf %32, %36 : vector<16x8xf32>
    %38 = arith.truncf %37 : vector<16x8xf32> to vector<16x8xbf16>
    %cst_17 = arith.constant dense<0.000000e+00> : vector<16x8xf32>
    %39 = tpu.matmul %38, %24, %cst_17 {dimension_numbers = #tpu.dot_dimension_numbers<[1], [0], [0], [1], [0, 0, 1, 1], [], []>} : vector<16x8xbf16>, vector<8x8xbf16>, vector<16x8xf32> -> vector<16x8xf32>
    %40 = vector.extract_strided_slice %16 {offsets = [0, 8], sizes = [16, 8], strides = [1, 1]} : vector<16x32xf32> to vector<16x8xf32>
    %41 = arith.truncf %40 : vector<16x8xf32> to vector<16x8xbf16>
    %42 = vector.extract_strided_slice %17 {offsets = [0, 8], sizes = [8, 8], strides = [1, 1]} : vector<8x32xf32> to vector<8x8xf32>
    %43 = arith.truncf %42 : vector<8x8xf32> to vector<8x8xbf16>
    %44 = vector.extract_strided_slice %18 {offsets = [0, 8], sizes = [8, 8], strides = [1, 1]} : vector<8x32xf32> to vector<8x8xf32>
    %45 = arith.truncf %44 : vector<8x8xf32> to vector<8x8xbf16>
    %cst_18 = arith.constant dense<0.000000e+00> : vector<16x8xf32>
    %46 = tpu.matmul %41, %43, %cst_18 {dimension_numbers = #tpu.dot_dimension_numbers<[1], [1], [0], [0], [0, 0, 1, 0], [], []>} : vector<16x8xbf16>, vector<8x8xbf16>, vector<16x8xf32> -> vector<16x8xf32>
    %cst_19 = arith.constant 0.353553385 : f32
    %47 = vector.broadcast %cst_19 : f32 to vector<16x8xf32>
    %48 = arith.mulf %46, %47 : vector<16x8xf32>
    %cst_20 = arith.constant dense<0xFF800000> : vector<16xf32>
    %49 = vector.multi_reduction <maximumf>, %48, %cst_20 [1] : vector<16x8xf32> to vector<16xf32>
    %50 = vector.shape_cast %49 : vector<16xf32> to vector<16x1xf32>
    %51 = vector.broadcast %50 : vector<16x1xf32> to vector<16x8xf32>
    %52 = arith.subf %48, %51 : vector<16x8xf32>
    %53 = math.exp %52 : vector<16x8xf32>
    %cst_21 = arith.constant dense<0.000000e+00> : vector<16xf32>
    %54 = vector.multi_reduction <add>, %53, %cst_21 [1] : vector<16x8xf32> to vector<16xf32>
    %55 = vector.shape_cast %54 : vector<16xf32> to vector<16x1xf32>
    %56 = tpu.reciprocal %55 {approx = true} : vector<16x1xf32> -> vector<16x1xf32>
    %57 = vector.broadcast %56 : vector<16x1xf32> to vector<16x8xf32>
    %58 = arith.mulf %53, %57 : vector<16x8xf32>
    %59 = arith.truncf %58 : vector<16x8xf32> to vector<16x8xbf16>
    %cst_22 = arith.constant dense<0.000000e+00> : vector<16x8xf32>
    %60 = tpu.matmul %59, %45, %cst_22 {dimension_numbers = #tpu.dot_dimension_numbers<[1], [0], [0], [1], [0, 0, 1, 1], [], []>} : vector<16x8xbf16>, vector<8x8xbf16>, vector<16x8xf32> -> vector<16x8xf32>
    %61 = vector.extract_strided_slice %16 {offsets = [0, 16], sizes = [16, 8], strides = [1, 1]} : vector<16x32xf32> to vector<16x8xf32>
    %62 = arith.truncf %61 : vector<16x8xf32> to vector<16x8xbf16>
    %63 = vector.extract_strided_slice %17 {offsets = [0, 16], sizes = [8, 8], strides = [1, 1]} : vector<8x32xf32> to vector<8x8xf32>
    %64 = arith.truncf %63 : vector<8x8xf32> to vector<8x8xbf16>
    %65 = vector.extract_strided_slice %18 {offsets = [0, 16], sizes = [8, 8], strides = [1, 1]} : vector<8x32xf32> to vector<8x8xf32>
    %66 = arith.truncf %65 : vector<8x8xf32> to vector<8x8xbf16>
    %cst_23 = arith.constant dense<0.000000e+00> : vector<16x8xf32>
    %67 = tpu.matmul %62, %64, %cst_23 {dimension_numbers = #tpu.dot_dimension_numbers<[1], [1], [0], [0], [0, 0, 1, 0], [], []>} : vector<16x8xbf16>, vector<8x8xbf16>, vector<16x8xf32> -> vector<16x8xf32>
    %cst_24 = arith.constant 0.353553385 : f32
    %68 = vector.broadcast %cst_24 : f32 to vector<16x8xf32>
    %69 = arith.mulf %67, %68 : vector<16x8xf32>
    %cst_25 = arith.constant dense<0xFF800000> : vector<16xf32>
    %70 = vector.multi_reduction <maximumf>, %69, %cst_25 [1] : vector<16x8xf32> to vector<16xf32>
    %71 = vector.shape_cast %70 : vector<16xf32> to vector<16x1xf32>
    %72 = vector.broadcast %71 : vector<16x1xf32> to vector<16x8xf32>
    %73 = arith.subf %69, %72 : vector<16x8xf32>
    %74 = math.exp %73 : vector<16x8xf32>
    %cst_26 = arith.constant dense<0.000000e+00> : vector<16xf32>
    %75 = vector.multi_reduction <add>, %74, %cst_26 [1] : vector<16x8xf32> to vector<16xf32>
    %76 = vector.shape_cast %75 : vector<16xf32> to vector<16x1xf32>
    %77 = tpu.reciprocal %76 {approx = true} : vector<16x1xf32> -> vector<16x1xf32>
    %78 = vector.broadcast %77 : vector<16x1xf32> to vector<16x8xf32>
    %79 = arith.mulf %74, %78 : vector<16x8xf32>
    %80 = arith.truncf %79 : vector<16x8xf32> to vector<16x8xbf16>
    %cst_27 = arith.constant dense<0.000000e+00> : vector<16x8xf32>
    %81 = tpu.matmul %80, %66, %cst_27 {dimension_numbers = #tpu.dot_dimension_numbers<[1], [0], [0], [1], [0, 0, 1, 1], [], []>} : vector<16x8xbf16>, vector<8x8xbf16>, vector<16x8xf32> -> vector<16x8xf32>
    %82 = vector.extract_strided_slice %16 {offsets = [0, 24], sizes = [16, 8], strides = [1, 1]} : vector<16x32xf32> to vector<16x8xf32>
    %83 = arith.truncf %82 : vector<16x8xf32> to vector<16x8xbf16>
    %84 = vector.extract_strided_slice %17 {offsets = [0, 24], sizes = [8, 8], strides = [1, 1]} : vector<8x32xf32> to vector<8x8xf32>
    %85 = arith.truncf %84 : vector<8x8xf32> to vector<8x8xbf16>
    %86 = vector.extract_strided_slice %18 {offsets = [0, 24], sizes = [8, 8], strides = [1, 1]} : vector<8x32xf32> to vector<8x8xf32>
    %87 = arith.truncf %86 : vector<8x8xf32> to vector<8x8xbf16>
    %cst_28 = arith.constant dense<0.000000e+00> : vector<16x8xf32>
    %88 = tpu.matmul %83, %85, %cst_28 {dimension_numbers = #tpu.dot_dimension_numbers<[1], [1], [0], [0], [0, 0, 1, 0], [], []>} : vector<16x8xbf16>, vector<8x8xbf16>, vector<16x8xf32> -> vector<16x8xf32>
    %cst_29 = arith.constant 0.353553385 : f32
    %89 = vector.broadcast %cst_29 : f32 to vector<16x8xf32>
    %90 = arith.mulf %88, %89 : vector<16x8xf32>
    %cst_30 = arith.constant dense<0xFF800000> : vector<16xf32>
    %91 = vector.multi_reduction <maximumf>, %90, %cst_30 [1] : vector<16x8xf32> to vector<16xf32>
    %92 = vector.shape_cast %91 : vector<16xf32> to vector<16x1xf32>
    %93 = vector.broadcast %92 : vector<16x1xf32> to vector<16x8xf32>
    %94 = arith.subf %90, %93 : vector<16x8xf32>
    %95 = math.exp %94 : vector<16x8xf32>
    %cst_31 = arith.constant dense<0.000000e+00> : vector<16xf32>
    %96 = vector.multi_reduction <add>, %95, %cst_31 [1] : vector<16x8xf32> to vector<16xf32>
    %97 = vector.shape_cast %96 : vector<16xf32> to vector<16x1xf32>
    %98 = tpu.reciprocal %97 {approx = true} : vector<16x1xf32> -> vector<16x1xf32>
    %99 = vector.broadcast %98 : vector<16x1xf32> to vector<16x8xf32>
    %100 = arith.mulf %95, %99 : vector<16x8xf32>
    %101 = arith.truncf %100 : vector<16x8xf32> to vector<16x8xbf16>
    %cst_32 = arith.constant dense<0.000000e+00> : vector<16x8xf32>
    %102 = tpu.matmul %101, %87, %cst_32 {dimension_numbers = #tpu.dot_dimension_numbers<[1], [0], [0], [1], [0, 0, 1, 1], [], []>} : vector<16x8xbf16>, vector<8x8xbf16>, vector<16x8xf32> -> vector<16x8xf32>
    %103 = tpu.concatenate %39, %60, %81, %102 in 1 : vector<16x8xf32>, vector<16x8xf32>, vector<16x8xf32>, vector<16x8xf32> -> vector<16x32xf32>
    %104 = arith.truncf %103 : vector<16x32xf32> to vector<16x32xbf16>
    %c0_33 = arith.constant 0 : index
    %c0_34 = arith.constant 0 : index
    %105 = vector.load %arg5[%c0_33, %c0_34] : memref<32x32xbf16, #tpu.memory_space<vmem>>, vector<32x32xbf16>
    %cst_35 = arith.constant dense<0.000000e+00> : vector<16x32xf32>
    %106 = tpu.matmul %104, %105, %cst_35 {dimension_numbers = #tpu.dot_dimension_numbers<[1], [0], [0], [1], [0, 0, 1, 1], [], []>} : vector<16x32xbf16>, vector<32x32xbf16>, vector<16x32xf32> -> vector<16x32xf32>
    %c0_36 = arith.constant 0 : index
    %c0_37 = arith.constant 0 : index
    %107 = vector.load %arg6[%c0_36, %c0_37] : memref<1x32xf32, #tpu.memory_space<vmem>>, vector<1x32xf32>
    %108 = vector.broadcast %107 : vector<1x32xf32> to vector<16x32xf32>
    %109 = arith.addf %106, %108 : vector<16x32xf32>
    %110 = arith.addf %1, %109 : vector<16x32xf32>
    %c0_38 = arith.constant 0 : index
    %c0_39 = arith.constant 0 : index
    %111 = vector.load %arg7[%c0_38, %c0_39] : memref<1x32xf32, #tpu.memory_space<vmem>>, vector<1x32xf32>
    %c0_40 = arith.constant 0 : index
    %c0_41 = arith.constant 0 : index
    %112 = vector.load %arg8[%c0_40, %c0_41] : memref<1x32xf32, #tpu.memory_space<vmem>>, vector<1x32xf32>
    %cst_42 = arith.constant dense<0.000000e+00> : vector<16xf32>
    %113 = vector.multi_reduction <add>, %110, %cst_42 [1] : vector<16x32xf32> to vector<16xf32>
    %114 = vector.shape_cast %113 : vector<16xf32> to vector<16x1xf32>
    %cst_43 = arith.constant 3.200000e+01 : f32
    %115 = vector.broadcast %cst_43 : f32 to vector<16x1xf32>
    %116 = arith.divf %114, %115 : vector<16x1xf32>
    %117 = vector.broadcast %116 : vector<16x1xf32> to vector<16x32xf32>
    %118 = arith.subf %110, %117 : vector<16x32xf32>
    %119 = arith.mulf %118, %118 : vector<16x32xf32>
    %cst_44 = arith.constant dense<0.000000e+00> : vector<16xf32>
    %120 = vector.multi_reduction <add>, %119, %cst_44 [1] : vector<16x32xf32> to vector<16xf32>
    %121 = vector.shape_cast %120 : vector<16xf32> to vector<16x1xf32>
    %cst_45 = arith.constant 3.200000e+01 : f32
    %122 = vector.broadcast %cst_45 : f32 to vector<16x1xf32>
    %123 = arith.divf %121, %122 : vector<16x1xf32>
    %cst_46 = arith.constant 9.99999974E-6 : f32
    %124 = vector.broadcast %cst_46 : f32 to vector<16x1xf32>
    %125 = arith.addf %123, %124 : vector<16x1xf32>
    %126 = math.rsqrt %125 : vector<16x1xf32>
    %127 = vector.broadcast %126 : vector<16x1xf32> to vector<16x32xf32>
    %128 = arith.mulf %118, %127 : vector<16x32xf32>
    %129 = vector.broadcast %111 : vector<1x32xf32> to vector<16x32xf32>
    %130 = arith.mulf %128, %129 : vector<16x32xf32>
    %131 = vector.broadcast %112 : vector<1x32xf32> to vector<16x32xf32>
    %132 = arith.addf %130, %131 : vector<16x32xf32>
    %133 = arith.truncf %132 : vector<16x32xf32> to vector<16x32xbf16>
    %c0_47 = arith.constant 0 : index
    %c0_48 = arith.constant 0 : index
    %134 = vector.load %arg9[%c0_47, %c0_48] : memref<32x128xbf16, #tpu.memory_space<vmem>>, vector<32x128xbf16>
    %cst_49 = arith.constant dense<0.000000e+00> : vector<16x128xf32>
    %135 = tpu.matmul %133, %134, %cst_49 {dimension_numbers = #tpu.dot_dimension_numbers<[1], [0], [0], [1], [0, 0, 1, 1], [], []>} : vector<16x32xbf16>, vector<32x128xbf16>, vector<16x128xf32> -> vector<16x128xf32>
    %c0_50 = arith.constant 0 : index
    %c0_51 = arith.constant 0 : index
    %136 = vector.load %arg10[%c0_50, %c0_51] : memref<1x128xf32, #tpu.memory_space<vmem>>, vector<1x128xf32>
    %137 = vector.broadcast %136 : vector<1x128xf32> to vector<16x128xf32>
    %138 = arith.addf %135, %137 : vector<16x128xf32>
    %139 = arith.mulf %138, %138 : vector<16x128xf32>
    %140 = arith.mulf %138, %139 : vector<16x128xf32>
    %cst_52 = arith.constant 4.471500e-02 : f32
    %141 = vector.broadcast %cst_52 : f32 to vector<16x128xf32>
    %142 = arith.mulf %141, %140 : vector<16x128xf32>
    %143 = arith.addf %138, %142 : vector<16x128xf32>
    %cst_53 = arith.constant 0.797884583 : f32
    %144 = vector.broadcast %cst_53 : f32 to vector<16x128xf32>
    %145 = arith.mulf %144, %143 : vector<16x128xf32>
    %146 = math.tanh %145 : vector<16x128xf32>
    %cst_54 = arith.constant 1.000000e+00 : f32
    %147 = vector.broadcast %cst_54 : f32 to vector<16x128xf32>
    %148 = arith.addf %147, %146 : vector<16x128xf32>
    %cst_55 = arith.constant 5.000000e-01 : f32
    %149 = vector.broadcast %cst_55 : f32 to vector<16x128xf32>
    %150 = arith.mulf %149, %148 : vector<16x128xf32>
    %151 = arith.mulf %138, %150 : vector<16x128xf32>
    %152 = arith.truncf %151 : vector<16x128xf32> to vector<16x128xbf16>
    %c0_56 = arith.constant 0 : index
    %c0_57 = arith.constant 0 : index
    %153 = vector.load %arg11[%c0_56, %c0_57] : memref<128x32xbf16, #tpu.memory_space<vmem>>, vector<128x32xbf16>
    %cst_58 = arith.constant dense<0.000000e+00> : vector<16x32xf32>
    %154 = tpu.matmul %152, %153, %cst_58 {dimension_numbers = #tpu.dot_dimension_numbers<[1], [0], [0], [1], [0, 0, 1, 1], [], []>} : vector<16x128xbf16>, vector<128x32xbf16>, vector<16x32xf32> -> vector<16x32xf32>
    %c0_59 = arith.constant 0 : index
    %c0_60 = arith.constant 0 : index
    %155 = vector.load %arg12[%c0_59, %c0_60] : memref<1x32xf32, #tpu.memory_space<vmem>>, vector<1x32xf32>
    %156 = vector.broadcast %155 : vector<1x32xf32> to vector<16x32xf32>
    %157 = arith.addf %154, %156 : vector<16x32xf32>
    %158 = arith.addf %132, %157 : vector<16x32xf32>
    %c0_61 = arith.constant 0 : index
    %c0_62 = arith.constant 0 : index
    %159 = vector.load %arg13[%c0_61, %c0_62] : memref<1x32xf32, #tpu.memory_space<vmem>>, vector<1x32xf32>
    %c0_63 = arith.constant 0 : index
    %c0_64 = arith.constant 0 : index
    %160 = vector.load %arg14[%c0_63, %c0_64] : memref<1x32xf32, #tpu.memory_space<vmem>>, vector<1x32xf32>
    %cst_65 = arith.constant dense<0.000000e+00> : vector<16xf32>
    %161 = vector.multi_reduction <add>, %158, %cst_65 [1] : vector<16x32xf32> to vector<16xf32>
    %162 = vector.shape_cast %161 : vector<16xf32> to vector<16x1xf32>
    %cst_66 = arith.constant 3.200000e+01 : f32
    %163 = vector.broadcast %cst_66 : f32 to vector<16x1xf32>
    %164 = arith.divf %162, %163 : vector<16x1xf32>
    %165 = vector.broadcast %164 : vector<16x1xf32> to vector<16x32xf32>
    %166 = arith.subf %158, %165 : vector<16x32xf32>
    %167 = arith.mulf %166, %166 : vector<16x32xf32>
    %cst_67 = arith.constant dense<0.000000e+00> : vector<16xf32>
    %168 = vector.multi_reduction <add>, %167, %cst_67 [1] : vector<16x32xf32> to vector<16xf32>
    %169 = vector.shape_cast %168 : vector<16xf32> to vector<16x1xf32>
    %cst_68 = arith.constant 3.200000e+01 : f32
    %170 = vector.broadcast %cst_68 : f32 to vector<16x1xf32>
    %171 = arith.divf %169, %170 : vector<16x1xf32>
    %cst_69 = arith.constant 9.99999974E-6 : f32
    %172 = vector.broadcast %cst_69 : f32 to vector<16x1xf32>
    %173 = arith.addf %171, %172 : vector<16x1xf32>
    %174 = math.rsqrt %173 : vector<16x1xf32>
    %175 = vector.broadcast %174 : vector<16x1xf32> to vector<16x32xf32>
    %176 = arith.mulf %166, %175 : vector<16x32xf32>
    %177 = vector.broadcast %159 : vector<1x32xf32> to vector<16x32xf32>
    %178 = arith.mulf %176, %177 : vector<16x32xf32>
    %179 = vector.broadcast %160 : vector<1x32xf32> to vector<16x32xf32>
    %180 = arith.addf %178, %179 : vector<16x32xf32>
    %c0_70 = arith.constant 0 : index
    %c0_71 = arith.constant 0 : index
    %c0_72 = arith.constant 0 : index
    %181 = vector.load %arg15[%c0_70, %c0_71, %c0_72] : memref<1x16x32xf32, #tpu.memory_space<vmem>>, vector<1x16x32xf32>
    %182 = vector.shape_cast %181 : vector<1x16x32xf32> to vector<16x32xf32>
    %183 = vector.shape_cast %180 : vector<16x32xf32> to vector<1x16x32xf32>
    tpu.vector_store %arg15[%c0_70, %c0_71, %c0_72], %183 {strides = array<i32>} : memref<1x16x32xf32, #tpu.memory_space<vmem>>, vector<1x16x32xf32>,
    return
  }
  func.func @transform_0(%arg0: i32) -> (i32, i32, i32) {
    %c0_i32 = arith.constant 0 : i32
    %c0_i32_0 = arith.constant 0 : i32
    %c0_i32_1 = arith.constant 0 : i32
    return %arg0, %c0_i32, %c0_i32_0 : i32, i32, i32
  }
  func.func @transform_1(%arg0: i32) -> (i32, i32, i32) {
    %c0_i32 = arith.constant 0 : i32
    %c0_i32_0 = arith.constant 0 : i32
    %c0_i32_1 = arith.constant 0 : i32
    return %arg0, %c0_i32, %c0_i32_0 : i32, i32, i32
  }
  func.func @transform_2(%arg0: i32) -> (i32, i32) {
    %c0_i32 = arith.constant 0 : i32
    %c0_i32_0 = arith.constant 0 : i32
    %c0_i32_1 = arith.constant 0 : i32
    return %c0_i32, %c0_i32_0 : i32, i32
  }
  func.func @transform_3(%arg0: i32) -> (i32, i32) {
    %c0_i32 = arith.constant 0 : i32
    %c0_i32_0 = arith.constant 0 : i32
    %c0_i32_1 = arith.constant 0 : i32
    return %c0_i32, %c0_i32_0 : i32, i32
  }
  func.func @transform_4(%arg0: i32) -> (i32, i32) {
    %c0_i32 = arith.constant 0 : i32
    %c0_i32_0 = arith.constant 0 : i32
    %c0_i32_1 = arith.constant 0 : i32
    return %c0_i32, %c0_i32_0 : i32, i32
  }
  func.func @transform_5(%arg0: i32) -> (i32, i32) {
    %c0_i32 = arith.constant 0 : i32
    %c0_i32_0 = arith.constant 0 : i32
    %c0_i32_1 = arith.constant 0 : i32
    return %c0_i32, %c0_i32_0 : i32, i32
  }
  func.func @transform_6(%arg0: i32) -> (i32, i32) {
    %c0_i32 = arith.constant 0 : i32
    %c0_i32_0 = arith.constant 0 : i32
    %c0_i32_1 = arith.constant 0 : i32
    return %c0_i32, %c0_i32_0 : i32, i32
  }
  func.func @transform_7(%arg0: i32) -> (i32, i32) {
    %c0_i32 = arith.constant 0 : i32
    %c0_i32_0 = arith.constant 0 : i32
    %c0_i32_1 = arith.constant 0 : i32
    return %c0_i32, %c0_i32_0 : i32, i32
  }
  func.func @transform_8(%arg0: i32) -> (i32, i32) {
    %c0_i32 = arith.constant 0 : i32
    %c0_i32_0 = arith.constant 0 : i32
    %c0_i32_1 = arith.constant 0 : i32
    return %c0_i32, %c0_i32_0 : i32, i32
  }
  func.func @transform_9(%arg0: i32) -> (i32, i32) {
    %c0_i32 = arith.constant 0 : i32
    %c0_i32_0 = arith.constant 0 : i32
    %c0_i32_1 = arith.constant 0 : i32
    return %c0_i32, %c0_i32_0 : i32, i32
  }
  func.func @transform_10(%arg0: i32) -> (i32, i32) {
    %c0_i32 = arith.constant 0 : i32
    %c0_i32_0 = arith.constant 0 : i32
    %c0_i32_1 = arith.constant 0 : i32
    return %c0_i32, %c0_i32_0 : i32, i32
  }
  func.func @transform_11(%arg0: i32) -> (i32, i32) {
    %c0_i32 = arith.constant 0 : i32
    %c0_i32_0 = arith.constant 0 : i32
    %c0_i32_1 = arith.constant 0 : i32
    return %c0_i32, %c0_i32_0 : i32, i32
  }
  func.func @transform_12(%arg0: i32) -> (i32, i32) {
    %c0_i32 = arith.constant 0 : i32
    %c0_i32_0 = arith.constant 0 : i32
    %c0_i32_1 = arith.constant 0 : i32
    return %c0_i32, %c0_i32_0 : i32, i32
  }
  func.func @transform_13(%arg0: i32) -> (i32, i32) {
    %c0_i32 = arith.constant 0 : i32
    %c0_i32_0 = arith.constant 0 : i32
    %c0_i32_1 = arith.constant 0 : i32
    return %c0_i32, %c0_i32_0 : i32, i32
  }
  func.func @transform_14(%arg0: i32) -> (i32, i32, i32) {
    %c0_i32 = arith.constant 0 : i32
    %c0_i32_0 = arith.constant 0 : i32
    %c0_i32_1 = arith.constant 0 : i32
    return %arg0, %c0_i32, %c0_i32_0 : i32, i32, i32
  }
}

</mosaic_0001>

<bundles_post_ra>
// kernel: hybrid_blip2_flamingo_forward.13
= control target key start
LH: loop header
LB: loop body
LE: loop exit
PB: predicated region body
PF: predicated region fallthrough
CT: control target
= control target key end

     0   :  { %vm49_vm0 = vcmask 392192   ;;  %vm75_vm1 = vcmask 261120   ;;  %s161_s1 = inlined_call_operand.vmem [shape: bf16[48,32], index: 1, kind: input, shape index: {}]   ;;  %s162_s2 = inlined_call_operand.vmem [shape: f32[1,32], index: 2, kind: input, shape index: {}]   ;;  %s163_s0 = inlined_call_operand.vmem [shape: f32[32,48], index: 0, kind: input, shape index: {}]   ;;  %s164_s3 = inlined_call_operand.vmem [shape: f32[32,32], index: 3, kind: output, shape index: {}]  }
   0x1   :  { %v100_v0 = vld [vmem:[%s161_s1 + $0x10] sm:$0xff]  ;;  %v99_v1 = vld [vmem:[%s161_s1 + $0x8] sm:$0xff]  ;;  %v98_v2 = vld [vmem:[%s161_s1] sm:$0xff] }
   0x2   :  { %61 = vmatpush.bf16.msra.mxu0 %v100_v0  ;;  %101 = vmatpush.bf16.msra.mxu1 %v100_v0  ;;  %v15_v3 = vld [vmem:[%s163_s0] sm:$0xff]  ;;  %v16_v4 = vld [vmem:[%s163_s0 + $0x8] sm:$0xff]  ;;  %v17_v5 = vld [vmem:[%s163_s0 + $0x10] sm:$0xff] }
   0x3   :  { %v18_v6 = vld [vmem:[%s163_s0 + $0x18] sm:$0xff]  ;;  %v19_v7 = vpack.c.bf16 %v16_v4, %v15_v3  ;;  %v104_v9 = vld [vmem:[%s162_s2] ss:$0 sm:$0xff] }
   0x4   :  { %v20_v8 = vpack.c.bf16 %v18_v6, %v17_v5 }
   0x6   :  { %62 = vmatpush.bf16.msra.mxu0 %v99_v1  ;;  %102 = vmatpush.bf16.msra.mxu1 %v99_v1 }
   0xa   :  { %63 = vmatpush.bf16.msra.mxu0 %v98_v2  ;;  %103 = vmatpush.bf16.msra.mxu1 %v98_v2 }
   0xd   :  { %96 = vmatmul.msk.bf16.vlgmr.msra.gmra.mxu0 %vm49_vm0, %v19_v7  ;;  %97 = vmatmul.msk.bf16.vlgmr.msra.gmra.mxu1 %vm49_vm0, %v20_v8 }
  0x8a   :  { %v65_v10 = vpop.f32.mrf.mxu0  ;;  %v70_v11 = vpop.f32.mrf.mxu1 }
  0x8b   :  { %v66_v12 = vadd.f32 %v104_v9, %v65_v10  ;;  %v71_v13 = vadd.f32 %v104_v9, %v70_v11 }
  0x8d   :  { %76 = vst.msk [vmem:[%s164_s3] sm:$0xff] %vm75_vm1, %v66_v12 }
  0x8e   :  { %78 = vst.msk [vmem:[%s164_s3 + $0x10] sm:$0xff] %vm75_vm1, %v71_v13 }
  0x92   :  { %v67_v14 = vpop.f32.mrf.mxu0  ;;  %v72_v15 = vpop.f32.mrf.mxu1 }
  0x93   :  { %v68_v16 = vadd.f32 %v104_v9, %v67_v14  ;;  %v73_v17 = vadd.f32 %v104_v9, %v72_v15 }
  0x95   :  { %77 = vst.msk [vmem:[%s164_s3 + $0x8] sm:$0xff] %vm75_vm1, %v68_v16 }
  0x96   :  { %79 = vst.msk [vmem:[%s164_s3 + $0x18] sm:$0xff] %vm75_vm1, %v73_v17 }

// kernel: hybrid_blip2_flamingo_forward.18
= control target key start
LH: loop header
LB: loop body
LE: loop exit
PB: predicated region body
PF: predicated region fallthrough
CT: control target
= control target key end

     0   :  { %vm38_vm0 = vcmask 261120   ;;  %s115_s1 = inlined_call_operand.vmem [shape: bf16[32,32], index: 1, kind: input, shape index: {}]   ;;  %s116_s0 = inlined_call_operand.vmem [shape: f32[16,32], index: 0, kind: input, shape index: {}]   ;;  %s117_s2 = inlined_call_operand.vmem [shape: f32[1,32], index: 2, kind: input, shape index: {}]   ;;  %s118_s3 = inlined_call_operand.vmem [shape: f32[16,32], index: 3, kind: output, shape index: {}]  }
   0x1   :  { %v72_v0 = vld [vmem:[%s115_s1 + $0x8] sm:$0xff]  ;;  %v71_v1 = vld [vmem:[%s115_s1] sm:$0xff] }
   0x2   :  { %48 = vmatpush.bf16.msra.mxu0 %v72_v0  ;;  %v15_v2 = vld [vmem:[%s116_s0] sm:$0xff]  ;;  %v16_v3 = vld [vmem:[%s116_s0 + $0x8] sm:$0xff] }
   0x3   :  { %v17_v4 = vpack.c.bf16 %v16_v3, %v15_v2  ;;  %v73_v5 = vld [vmem:[%s117_s2] ss:$0 sm:$0xff] }
   0x6   :  { %49 = vmatpush.bf16.msra.mxu0 %v71_v1 }
   0x9   :  { %70 = vmatmul.msk.bf16.vlgmr.msra.gmra.mxu0 %vm38_vm0, %v17_v4 }
  0x86   :  { %v51_v6 = vpop.f32.mrf.mxu0 }
  0x87   :  { %v52_v7 = vadd.f32 %v73_v5, %v51_v6 }
  0x89   :  { %56 = vst.msk [vmem:[%s118_s3] sm:$0xff] %vm38_vm0, %v52_v7 }
  0x8e   :  { %v53_v8 = vpop.f32.mrf.mxu0 }
  0x8f   :  { %v54_v9 = vadd.f32 %v73_v5, %v53_v8 }
  0x91   :  { %57 = vst.msk [vmem:[%s118_s3 + $0x8] sm:$0xff] %vm38_vm0, %v54_v9 }

// kernel: hybrid_blip2_flamingo_forward.14
= control target key start
LH: loop header
LB: loop body
LE: loop exit
PB: predicated region body
PF: predicated region fallthrough
CT: control target
= control target key end

     0   :  { %s811_s21 = smov 0   ;;  %s901_s0 = inlined_call_operand.vmem [shape: f32[2,8,32], index: 0, kind: input, shape index: {}]   ;;  %s902_s1 = inlined_call_operand.vmem [shape: f32[2,16,32], index: 1, kind: input, shape index: {}]   ;;  %s903_s2 = inlined_call_operand.vmem [shape: bf16[32,96], index: 2, kind: input, shape index: {}]   ;;  %s904_s3 = inlined_call_operand.vmem [shape: f32[1,96], index: 3, kind: input, shape index: {}]   ;;  %s905_s4 = inlined_call_operand.vmem [shape: bf16[32,32], index: 4, kind: input, shape index: {}]   ;;  %s906_s5 = inlined_call_operand.vmem [shape: f32[1,32], index: 5, kind: input, shape index: {}]   ;;  %s907_s6 = inlined_call_operand.vmem [shape: f32[2,8,32], index: 6, kind: output, shape index: {}]  }
   0x1 LB: > { %s671_s22 = sadd.s32 4294967295, %s760_s21   ;;  %p675_p0 = scmp.ge.s32.totalorder %s760_s21, 1  ;;  %s760_s21 = sphi %s811_s21, %s16_s21  }
   0x2   : > { %p221_p1 = scmp.lt.s32.totalorder %s760_s21, 3 }
   0x4   : > { %p222_p2 = pnand %p675_p0, %p221_p1 }
   0x5   : > { %p254_p3 = scmp.lt.s32.totalorder (!%p222_p2), %s671_s22, 1  ;;  %s762_s13 = smov (!%p222_p2), 88  }
   0x6   : > { %225 = sbr.rel (%p222_p2) target bundleno = 1495 (0x5d7), region = 44  ;;  %s763_s14 = smov (!%p222_p2), 96  }
   0x7   : > { %s764_s15 = smov (!%p222_p2), 120   ;;  %s765_s16 = smov (!%p222_p2), 80  }
   0x8   : > { %s766_s17 = smov (!%p222_p2), 72   ;;  %s767_s18 = smov (!%p222_p2), 112  }
   0x9   : > { %s768_s19 = smov (!%p222_p2), 64   ;;  %s769_s20 = smov (!%p222_p2), 104  }
   0xa   : > { %s770_s23 = smov (!%p222_p2), 40   ;;  %s771_s24 = smov (!%p222_p2), 56  }
   0xb   : > { %v711_v0 = vld [vmem:[%s903_s2 + $0x8] sm:$0xff]  ;;  %v710_v1 = vld [vmem:[%s903_s2] sm:$0xff]  ;;  %s909_s22 = smov (!%p254_p3, %s671_s22), 1  ;;  %vm293_vm0 = vcmask 261120   ;;  %vm332_vm1 = vcmask 64512   ;;  %vm353_vm2 = vcmask 130048  }
   0xc   : > { %319 = vmatpush.bf16.msra.mxu1 %v711_v0  ;;  %303 = vmatpush.bf16.msra.mxu0 %v711_v0  ;;  %s709_s27 = sshll.u32 %s909_s22, 4  ;;  %s676_s28 = sshll.u32 %s909_s22, 3  ;;  %v736_v9 = vld [vmem:[%s904_s3] ss:$0 sm:$0xff]  ;;  %vm565_vm3 = vcmask 195584  }
   0xd   : > { %s262_s7 = scalar_lea.vmem %s902_s1, %s709_s27  ;;  %s257_s10 = scalar_lea.vmem %s901_s0, %s676_s28 }
   0xe   : > { %v270_v2 = vld [vmem:[%s262_s7] sm:$0xff]  ;;  %v271_v3 = vld [vmem:[%s262_s7 + $0x8] sm:$0xff]  ;;  %s772_s25 = smov 48   ;;  %s773_s26 = smov 8  }
   0xf   : > { %v837_v4 = vld [vmem:[%s257_s10] sm:$0xff]  ;;  %v272_v5 = vpack.c.bf16 %v271_v3, %v270_v2  ;;  %s774_s27 = smov 16   ;;  %s775_s29 = smov 24  }
  0x10   : > { %320 = vmatpush.bf16.msra.mxu1 %v710_v1  ;;  %304 = vmatpush.bf16.msra.mxu0 %v710_v1  ;;  %v269_v6 = vpack.c.bf16 %v837_v4, %v837_v4 }
  0x13   : > { %689 = vmatmul.msk.bf16.vlgmr.msra.gmra.mxu1 %vm293_vm0, %v272_v5  ;;  %688 = vmatmul.msk.bf16.vlgmr.msra.gmra.mxu0 %vm293_vm0, %v269_v6 }
  0x90   : > { %v322_v7 = vpop.f32.mrf.mxu1  ;;  %v306_v8 = vpop.f32.mrf.mxu0 }
  0x91   : > { %v323_v12 = vadd.f32 %v736_v9, %v322_v7  ;;  %v307_v15 = vadd.f32 %v736_v9, %v306_v8 }
  0x93   : > { %v327_v16 = vpack.c.bf16 %v307_v15, %v307_v15 }
  0x98   : > { %v324_v10 = vpop.f32.mrf.mxu1  ;;  %v308_v11 = vpop.f32.mrf.mxu0 }
  0x99   : > { %v325_v13 = vadd.f32 %v736_v9, %v324_v10 }
  0x9b   : > { %v846_v14 = vpack.c.bf16 %v325_v13, %v323_v12 }
  0x9d   : > { %388 = vrot.lane.b32.xlu2 %v846_v14, %s762_s13  ;;  %330 = vrot.lane.b32.xlu0 %v846_v14, %s763_s14  ;;  %s266_s14 = scalar_lea.vmem %s907_s6, %s676_s28 }
  0xa5   : > { %386 = vrot.lane.b32.xlu2 %v327_v16, %s764_s15 }
  0xad   : > { %443 = vrot.lane.b32.xlu2 %v846_v14, %s765_s16 }
  0xb5   : > { %498 = vrot.lane.b32.xlu2 %v846_v14, %s766_s17 }
  0xbd   : > { %441 = vrot.lane.b32.xlu2 %v327_v16, %s767_s18 }
  0xf7   : > { %v389_v17 = vpop.permute.xlu2 %388 }
  0xf8   : > { %v394_v42 = vsel %vm332_vm1, %v389_v17, 0 }
  0xff   : > { %v387_v18 = vpop.permute.xlu2 %386 }
 0x107   : > { %v444_v19 = vpop.permute.xlu2 %443 }
 0x108   : > { %v449_v20 = vsel %vm332_vm1, %v444_v19, 0 }
 0x109   : > { %458 = vmatpush.bf16.xpose.msrb.mxu1 %v449_v20 }
 0x10f   : > { %v331_v21 = vpop.permute.xlu0 %330  ;;  %v499_v22 = vpop.permute.xlu2 %498 }
 0x110   : > { %v337_v23 = vsel %vm332_vm1, %v331_v21, 0  ;;  %v504_v44 = vsel %vm332_vm1, %v499_v22, 0 }
 0x111   : > { %346 = vmatpush.bf16.xpose.msra.mxu2 %v337_v23 }
 0x117   : > { %v442_v24 = vpop.permute.xlu2 %441 }
 0x118   : > { %690 = vmatmul.msk.bf16.vlgmr.msra.gmra.mxu2 %vm332_vm1, %v327_v16  ;;  %694 = vmatmul.msk.bf16.vlgmr.msrb.gmra.mxu1 %vm332_vm1, %v442_v24 }
 0x195   : > { %v460_v25 = vpop.f32.mrf.mxu1 }
 0x196   : > { %v464_v36 = vmul.f32 0.35355338, %v460_v25 }
 0x198   : > { %v465_v37 = vsel %vm353_vm2, %v464_v36, -inf }
 0x19b   : > { %v348_v26 = vpop.f32.mrf.mxu2 }
 0x19c   : > { %v352_v27 = vmul.f32 0.35355338, %v348_v26 }
 0x19d   : > { %v462_v28 = vpop.f32.mrf.mxu1 }
 0x19e   : > { %v354_v29 = vsel %vm353_vm2, %v352_v27, -inf }
 0x19f   : > { %355 = vmax.xlane.f32.xlu0 %v354_v29  ;;  %v713_v29 = vld [vmem:[%s905_s4 + $0x8] sm:$0xff] }
 0x1a0   : > { %597 = vmatpush.bf16.msra.mxu1 %v713_v29 }
 0x1a3   : > { %v350_v30 = vpop.f32.mrf.mxu2 }
 0x1a4   : > { %v712_v30 = vld [vmem:[%s905_s4] sm:$0xff] }
 0x1a5   : > { %598 = vmatpush.bf16.msra.mxu1 %v712_v30 }
 0x212   : > { %v356_v31 = vpop.xlane.xlu0 %355 }
 0x213   : > { %v357_v32 = vsub.f32 %v352_v27, %v356_v31 }
 0x215   : > { %v358_v33 = vmul.f32 1.442695, %v357_v32 }
 0x217   : > { %738 = vpow2.f32 %v358_v33 }
 0x21d   : > { %v739_v34 = vpop.eup %738 }
 0x21e   : > { %v360_v35 = vsel %vm353_vm2, %v739_v34, 0.0 }
 0x21f   : > { %361 = vadd.xlane.f32.xlu1 %v360_v35 }
 0x238   : > { %366 = vrot.lane.b32.xlu1 %v846_v14, %s768_s19 }
 0x240   : > { %496 = vrot.lane.b32.xlu1 %v327_v16, %s769_s20 }
 0x26a   : > { %466 = vmax.xlane.f32.xlu1 %v465_v37 }
 0x292   : > { %v362_v38 = vpop.xlane.xlu1 %361 }
 0x293   : > { %740 = vrcp.f32 %v362_v38  ;;  %v737_v38 = vld [vmem:[%s906_s5] ss:$0 sm:$0xff] }
 0x299   : > { %v741_v39 = vpop.eup %740 }
 0x29a   : > { %v364_v40 = vmul.f32 %v741_v39, %v739_v34 }
 0x29c   : > { %v365_v43 = vpack.c.bf16 %v364_v40, %v364_v40 }
 0x2aa   : > { %v367_v41 = vpop.permute.xlu1 %366 }
 0x2ab   : > { %379 = vmatpush.bf16.msra.mxu3 %v367_v41 }
 0x2ae   : > { %691 = vmatmul.msk.bf16.vlgmr.msra.gmra.mxu3 %vm353_vm2, %v365_v43 }
 0x2af   : > { %403 = vmatpush.bf16.xpose.msrb.mxu3 %v394_v42 }
 0x2b2   : > { %v497_v45 = vpop.permute.xlu1 %496 }
 0x2b7   : > { %513 = vmatpush.bf16.xpose.msra.mxu3 %v504_v44 }
 0x2be   : > { %692 = vmatmul.msk.bf16.vlgmr.msrb.gmra.mxu3 %vm332_vm1, %v387_v18 }
 0x2ce   : > { %696 = vmatmul.msk.bf16.vlgmr.msra.gmra.mxu3 %vm332_vm1, %v497_v45 }
 0x2dd   : > { %v467_v47 = vpop.xlane.xlu1 %466 }
 0x2de   : > { %v468_v49 = vsub.f32 %v464_v36, %v467_v47 }
 0x2e0   : > { %v469_v50 = vmul.f32 1.442695, %v468_v49 }
 0x2e2   : > { %742 = vpow2.f32 %v469_v50 }
 0x2e8   : > { %v743_v54 = vpop.eup %742 }
 0x2e9   : > { %v471_v56 = vsel %vm353_vm2, %v743_v54, 0.0 }
 0x331   : > { %v865_v46 = vpop.f32.mrf.mxu3 }
 0x339   : > { %v383_v48 = vpop.f32.mrf.mxu3 }
 0x341   : > { %v405_v51 = vpop.f32.mrf.mxu3 }
 0x342   : > { %v409_v52 = vmul.f32 0.35355338, %v405_v51 }
 0x344   : > { %v410_v53 = vsel %vm353_vm2, %v409_v52, -inf }
 0x345   : > { %411 = vmax.xlane.f32.xlu2 %v410_v53 }
 0x349   : > { %v407_v55 = vpop.f32.mrf.mxu3 }
 0x34d   : > { %472 = vadd.xlane.f32.xlu2 %v471_v56 }
 0x351   : > { %v515_v57 = vpop.f32.mrf.mxu3 }
 0x352   : > { %v519_v58 = vmul.f32 0.35355338, %v515_v57 }
 0x354   : > { %v520_v59 = vsel %vm353_vm2, %v519_v58, -inf }
 0x355   : > { %521 = vmax.xlane.f32.xlu0 %v520_v59 }
 0x359   : > { %v517_v60 = vpop.f32.mrf.mxu3 }
 0x365   : > { %532 = vrot.lane.b32.xlu2 %v846_v14, %s770_s23 }
 0x369   : > { %422 = vrot.lane.b32.xlu0 %v846_v14, %s771_s24 }
 0x3b8   : > { %v412_v61 = vpop.xlane.xlu2 %411 }
 0x3b9   : > { %v413_v62 = vsub.f32 %v409_v52, %v412_v61 }
 0x3bb   : > { %v414_v63 = vmul.f32 1.442695, %v413_v62 }
 0x3bd   : > { %744 = vpow2.f32 %v414_v63 }
 0x3c0   : > { %v473_v6 = vpop.xlane.xlu2 %472 }
 0x3c3   : > { %v745_v0 = vpop.eup %744 }
 0x3c4   : > { %v416_v1 = vsel %vm353_vm2, %v745_v0, 0.0 }
 0x3c5   : > { %417 = vadd.xlane.f32.xlu0 %v416_v1 }
 0x3c8   : > { %v522_v2 = vpop.xlane.xlu0 %521  ;;  %v533_v10 = vpop.permute.xlu2 %532 }
 0x3c9   : > { %v523_v3 = vsub.f32 %v519_v58, %v522_v2 }
 0x3cb   : > { %v524_v5 = vmul.f32 1.442695, %v523_v3 }
 0x3cd   : > { %746 = vpow2.f32 %v524_v5 }
 0x3d3   : > { %v747_v7 = vpop.eup %746 }
 0x3d4   : > { %v526_v8 = vsel %vm353_vm2, %v747_v7, 0.0 }
 0x3d5   : > { %527 = vadd.xlane.f32.xlu1 %v526_v8 }
 0x3d9   : > { %477 = vrot.lane.b32.xlu0 %v846_v14, %s772_s25 }
 0x3db   : > { %v423_v9 = vpop.permute.xlu0 %422 }
 0x3dc   : > { %435 = vmatpush.bf16.msrb.mxu0 %v423_v9 }
 0x3e0   : > { %545 = vmatpush.bf16.msra.mxu0 %v533_v10 }
 0x438   : > { %v418_v11 = vpop.xlane.xlu0 %417 }
 0x439   : > { %748 = vrcp.f32 %v418_v11 }
 0x43a   : > { %750 = vrcp.f32 %v473_v6 }
 0x43f   : > { %v749_v12 = vpop.eup %748 }
 0x440   : > { %v420_v13 = vmul.f32 %v749_v12, %v745_v0  ;;  %v751_v16 = vpop.eup %750 }
 0x441   : > { %v475_v18 = vmul.f32 %v751_v16, %v743_v54 }
 0x442   : > { %v421_v15 = vpack.c.bf16 %v420_v13, %v420_v13 }
 0x443   : > { %v476_v20 = vpack.c.bf16 %v475_v18, %v475_v18 }
 0x444   : > { %693 = vmatmul.msk.bf16.vlgmr.msrb.gmra.mxu0 %vm353_vm2, %v421_v15 }
 0x448   : > { %v528_v17 = vpop.xlane.xlu1 %527 }
 0x449   : > { %752 = vrcp.f32 %v528_v17 }
 0x44b   : > { %v478_v19 = vpop.permute.xlu0 %477 }
 0x44c   : > { %490 = vmatpush.bf16.msrb.mxu2 %v478_v19 }
 0x44f   : > { %v753_v14 = vpop.eup %752  ;;  %695 = vmatmul.msk.bf16.vlgmr.msrb.gmra.mxu2 %vm353_vm2, %v476_v20 }
 0x450   : > { %v530_v21 = vmul.f32 %v753_v14, %v747_v7 }
 0x452   : > { %v531_v22 = vpack.c.bf16 %v530_v21, %v530_v21 }
 0x454   : > { %697 = vmatmul.msk.bf16.vlgmr.msra.gmra.mxu0 %vm353_vm2, %v531_v22 }
 0x4c1   : > { %v437_v23 = vpop.f32.mrf.mxu0 }
 0x4c2   : > { %552 = vrot.lane.b32.xlu1 %v437_v23, %s773_s26 }
 0x4c9   : > { %v439_v24 = vpop.f32.mrf.mxu0 }
 0x4d1   : > { %v547_v25 = vpop.f32.mrf.mxu0 }
 0x4d2   : > { %v492_v26 = vpop.f32.mrf.mxu2 }
 0x4d3   : > { %556 = vrot.lane.b32.xlu0 %v492_v26, %s774_s27 }
 0x4d9   : > { %v549_v27 = vpop.f32.mrf.mxu0 }
 0x4da   : > { %v494_v28 = vpop.f32.mrf.mxu2 }
 0x4db   : > { %560 = vrot.lane.b32.xlu0 %v547_v25, %s775_s29 }
 0x534   : > { %v553_v32 = vpop.permute.xlu1 %552 }
 0x535   : > { %v563_v33 = vsel %vm332_vm1, %v865_v46, %v553_v32 }
 0x545   : > { %v557_v31 = vpop.permute.xlu0 %556 }
 0x546   : > { %v564_v34 = vsel %vm353_vm2, %v563_v33, %v557_v31 }
 0x54d   : > { %v561_v35 = vpop.permute.xlu0 %560 }
 0x54e   : > { %v566_v36 = vsel %vm565_vm3, %v564_v34, %v561_v35 }
 0x54f   : > { %v567_v37 = vpack.c.bf16 %v566_v36, %v566_v36 }
 0x551   : > { %706 = vmatmul.msk.bf16.vlgmr.msra.gmra.mxu1 %vm293_vm0, %v567_v37 }
 0x5ce   : > { %v600_v39 = vpop.f32.mrf.mxu1 }
 0x5cf   : > { %v601_v40 = vadd.f32 %v737_v38, %v600_v39 }
 0x5d1   : > { %v604_v41 = vadd.f32 %v601_v40, %v837_v4 }
 0x5d3   : > { %605 = vst.msk [vmem:[%s266_s14] sm:$0xff] %vm293_vm0, %v604_v41 }
 0x5d6   : > { %v602_v42 = vpop.f32.mrf.mxu1 }
 0x5d7 PF: > { %s16_s21 = sadd.s32 1, %s760_s21  }
 0x5d8   : > { %p13_p4 = scmp.ge.s32.totalorder %s16_s21, 4  }
 0x5da   :  { %15 = sbr.rel (!%p13_p4) target bundleno = 1 (0x1), region = 77 }

// kernel: hybrid_blip2_flamingo_forward.16
= control target key start
LH: loop header
LB: loop body
LE: loop exit
PB: predicated region body
PF: predicated region fallthrough
CT: control target
= control target key end

     0   :  { %s1728_s29 = smov 0   ;;  %s1986_s0 = inlined_call_operand.vmem [shape: f32[2,8,32], index: 0, kind: input, shape index: {}]   ;;  %s1987_s1 = inlined_call_operand.vmem [shape: f32[2,24,32], index: 1, kind: input, shape index: {}]   ;;  %s1988_s2 = inlined_call_operand.vmem [shape: bf16[32,96], index: 2, kind: input, shape index: {}]   ;;  %s1989_s3 = inlined_call_operand.vmem [shape: f32[1,96], index: 3, kind: input, shape index: {}]   ;;  %s1990_s4 = inlined_call_operand.vmem [shape: bf16[32,32], index: 4, kind: input, shape index: {}]   ;;  %s1991_s5 = inlined_call_operand.vmem [shape: f32[1,32], index: 5, kind: input, shape index: {}]   ;;  %s1992_s6 = inlined_call_operand.vmem [shape: f32[1,32], index: 6, kind: input, shape index: {}]   ;;  %s1993_s7 = inlined_call_operand.vmem [shape: f32[1,32], index: 7, kind: input, shape index: {}]   ;;  %s1994_s8 = inlined_call_operand.vmem [shape: bf16[32,128], index: 8, kind: input, shape index: {}]   ;;  %s1995_s9 = inlined_call_operand.vmem [shape: f32[1,128], index: 9, kind: input, shape index: {}]   ;;  %s1996_s10 = inlined_call_operand.vmem [shape: bf16[128,32], index: 10, kind: input, shape index: {}]   ;;  %s1997_s11 = inlined_call_operand.vmem [shape: f32[1,32], index: 11, kind: input, shape index: {}]   ;;  %s1998_s12 = inlined_call_operand.vmem [shape: f32[1,32], index: 12, kind: input, shape index: {}]   ;;  %s1999_s13 = inlined_call_operand.vmem [shape: f32[1,32], index: 13, kind: input, shape index: {}]   ;;  %s2000_s14 = inlined_call_operand.vmem [shape: f32[2,8,32], index: 14, kind: output, shape index: {}]  }
   0x1 LB: > { %s1423_s30 = sadd.s32 4294967295, %s1620_s29   ;;  %p1427_p0 = scmp.ge.s32.totalorder %s1620_s29, 1  ;;  %s1620_s29 = sphi %s1728_s29, %s24_s29  }
   0x2   : > { %p421_p1 = scmp.lt.s32.totalorder %s1620_s29, 3 }
   0x4   : > { %p422_p2 = pnand %p1427_p0, %p421_p1 }
   0x5   : > { %p470_p3 = scmp.lt.s32.totalorder (!%p422_p2), %s1423_s30, 1  ;;  %s1622_s15 = smov (!%p422_p2), 88  }
   0x6   : > { %425 = sbr.rel (%p422_p2) target bundleno = 1986 (0x7c2), region = 76  ;;  %s1623_s16 = smov (!%p422_p2), 92  }
   0x7   : > { %s1624_s17 = smov (!%p422_p2), 96   ;;  %s1625_s18 = smov (!%p422_p2), 124  }
   0x8   : > { %s1627_s21 = smov (!%p422_p2), 80   ;;  %s1628_s22 = smov (!%p422_p2), 116  }
   0x9   : > { %s1630_s24 = smov (!%p422_p2), 76   ;;  %s1631_s25 = smov (!%p422_p2), 72  }
   0xa   : > { %s1633_s27 = smov (!%p422_p2), 112   ;;  %s1634_s28 = smov (!%p422_p2), 68  }
   0xb   : > { %v1511_v0 = vld [vmem:[%s1988_s2 + $0x8] sm:$0xff]  ;;  %v1510_v1 = vld [vmem:[%s1988_s2] sm:$0xff]  ;;  %s2002_s30 = smov (!%p470_p3, %s1423_s30), 1  ;;  %vm511_vm0 = vcmask 261120   ;;  %vm561_vm1 = vcmask 31744   ;;  %vm606_vm2 = vcmask 1043456  }
   0xc   : > { %540 = vmatpush.bf16.msra.mxu1 %v1511_v0  ;;  %1524 = vmatpush.bf16.msra.mxu3 %v1511_v0  ;;  %s1526_s19 = smul.u32 24, %s2002_s30  ;;  %s1428_s20 = sshll.u32 %s2002_s30, 3  ;;  %v1566_v11 = vld [vmem:[%s1989_s3] ss:$0 sm:$0xff]  ;;  %vm585_vm3 = vcmask 195584   ;;  %vm1108_vm4 = vcmask 64512  }
   0xd   : > { %521 = vmatpush.bf16.msra.mxu0 %v1511_v0  ;;  %s473_s23 = scalar_lea.vmem %s1986_s0, %s1428_s20  ;;  %vm1110_vm5 = vcmask 97280   ;;  %vm1112_vm6 = vcmask 130048   ;;  %vm1114_vm7 = vcmask 162816   ;;  %vm1117_vm8 = vcmask 228352  }
   0xe   : > { %s478_s26 = scalar_lea.vmem %s1987_s1, %s1526_s19  ;;  %v1754_v2 = vld [vmem:[%s473_s23] sm:$0xff]  ;;  %s1626_s19 = smov 84  }
   0xf   : > { %v486_v3 = vld [vmem:[%s478_s26] sm:$0xff]  ;;  %v487_v4 = vld [vmem:[%s478_s26 + $0x8] sm:$0xff]  ;;  %v488_v5 = vld [vmem:[%s478_s26 + $0x10] sm:$0xff]  ;;  %v485_v6 = vpack.c.bf16 %v1754_v2, %v1754_v2  ;;  %s1629_s23 = smov 120   ;;  %s1632_s26 = smov 108  }
  0x10   : > { %541 = vmatpush.bf16.msra.mxu1 %v1510_v1  ;;  %1525 = vmatpush.bf16.msra.mxu3 %v1510_v1  ;;  %v489_v7 = vpack.c.bf16 %v487_v4, %v486_v3  ;;  %v490_v8 = vpack.c.bf16 %v488_v5, %v488_v5 }
  0x11   : > { %522 = vmatpush.bf16.msra.mxu0 %v1510_v1 }
  0x13   : > { %1440 = vmatmul.msk.bf16.vlgmr.msra.gmra.mxu1 %vm511_vm0, %v489_v7  ;;  %1441 = vmatmul.msk.bf16.vlgmr.msra.gmra.mxu3 %vm511_vm0, %v490_v8 }
  0x14   : > { %1439 = vmatmul.msk.bf16.vlgmr.msra.gmra.mxu0 %vm511_vm0, %v485_v6 }
  0x90   : > { %v543_v9 = vpop.f32.mrf.mxu1 }
  0x91   : > { %v524_v10 = vpop.f32.mrf.mxu0  ;;  %v544_v20 = vadd.f32 %v1566_v11, %v543_v9 }
  0x92   : > { %v525_v17 = vadd.f32 %v1566_v11, %v524_v10 }
  0x94   : > { %v1769_v21 = vpack.c.bf16 %v525_v17, %v525_v17 }
  0x96   : > { %v548_v12 = vpop.f32.mrf.mxu3 }
  0x97   : > { %v549_v13 = vadd.f32 %v1566_v11, %v548_v12 }
  0x98   : > { %v545_v16 = vpop.f32.mrf.mxu1 }
  0x99   : > { %v1764_v14 = vpack.c.bf16 %v549_v13, %v549_v13  ;;  %v526_v15 = vpop.f32.mrf.mxu0  ;;  %v546_v18 = vadd.f32 %v1566_v11, %v545_v16 }
  0x9b   : > { %693 = vrot.lane.b32.xlu2 %v1764_v14, %s1622_s15  ;;  %628 = vrot.lane.b32.xlu1 %v1764_v14, %s1623_s16  ;;  %v1771_v22 = vpack.c.bf16 %v546_v18, %v544_v20 }
  0x9c   : > { %559 = vrot.lane.b32.xlu0 %v1764_v14, %s1624_s17 }
  0x9e   : > { %v550_v19 = vpop.f32.mrf.mxu3 }
  0xa3   : > { %626 = vrot.lane.b32.xlu1 %v1771_v22, %s1623_s16  ;;  %624 = vrot.lane.b32.xlu2 %v1769_v21, %s1625_s18  ;;  %s1636_s16 = smov 64   ;;  %s1638_s18 = smov 56  }
  0xa4   : > { %557 = vrot.lane.b32.xlu0 %v1771_v22, %s1624_s17  ;;  %s1637_s17 = smov 104  }
  0xab   : > { %691 = vrot.lane.b32.xlu1 %v1771_v22, %s1622_s15  ;;  %756 = vrot.lane.b32.xlu2 %v1771_v22, %s1626_s19  ;;  %s1635_s15 = smov 100  }
  0xac   : > { %758 = vrot.lane.b32.xlu0 %v1764_v14, %s1626_s19  ;;  %s1639_s19 = smov 60  }
  0xb3   : > { %823 = vrot.lane.b32.xlu1 %v1764_v14, %s1627_s21  ;;  %754 = vrot.lane.b32.xlu2 %v1769_v21, %s1628_s22  ;;  %s1641_s22 = smov 48  }
  0xb4   : > { %689 = vrot.lane.b32.xlu0 %v1769_v21, %s1629_s23  ;;  %s1642_s23 = smov 52  }
  0xbb   : > { %821 = vrot.lane.b32.xlu1 %v1771_v22, %s1627_s21  ;;  %886 = vrot.lane.b32.xlu2 %v1771_v22, %s1630_s24  ;;  %s1640_s21 = smov 44  }
  0xbc   : > { %888 = vrot.lane.b32.xlu0 %v1764_v14, %s1630_s24  ;;  %s1643_s24 = smov 36  }
  0xc3   : > { %953 = vrot.lane.b32.xlu1 %v1764_v14, %s1631_s25  ;;  %884 = vrot.lane.b32.xlu2 %v1769_v21, %s1632_s26  ;;  %s1645_s26 = smov 4  }
  0xc4   : > { %819 = vrot.lane.b32.xlu0 %v1769_v21, %s1633_s27  ;;  %s1646_s27 = smov 8  }
  0xcb   : > { %951 = vrot.lane.b32.xlu1 %v1771_v22, %s1631_s25  ;;  %1016 = vrot.lane.b32.xlu2 %v1771_v22, %s1634_s28  ;;  %s1644_s25 = smov 40  }
  0xcc   : > { %1018 = vrot.lane.b32.xlu0 %v1764_v14, %s1634_s28  ;;  %s1647_s28 = smov 20  }
  0xd3   : > { %1014 = vrot.lane.b32.xlu1 %v1769_v21, %s1635_s15  ;;  %600 = vrot.lane.b32.xlu2 %v1764_v14, %s1636_s16  ;;  %s1648_s15 = smov 16  }
  0xd4   : > { %949 = vrot.lane.b32.xlu0 %v1769_v21, %s1637_s17  ;;  %s1650_s17 = smov 24  }
  0xdb   : > { %732 = vrot.lane.b32.xlu1 %v1764_v14, %s1638_s18  ;;  %665 = vrot.lane.b32.xlu2 %v1771_v22, %s1639_s19 }
  0xdc   : > { %667 = vrot.lane.b32.xlu0 %v1764_v14, %s1639_s19 }
  0xe3   : > { %927 = vrot.lane.b32.xlu1 %v1764_v14, %s1640_s21  ;;  %862 = vrot.lane.b32.xlu2 %v1764_v14, %s1641_s22 }
  0xe4   : > { %797 = vrot.lane.b32.xlu0 %v1764_v14, %s1642_s23 }
  0xec   : > { %598 = vrot.lane.b32.xlu0 %v1771_v22, %s1636_s16  ;;  %s1649_s16 = smov 12  }
  0xf4   : > { %795 = vrot.lane.b32.xlu0 %v1771_v22, %s1642_s23 }
  0xf5   : > { %v694_v23 = vpop.permute.xlu2 %693 }
  0xf6   : > { %v702_v36 = vsel %vm561_vm1, %v694_v23, 0 }
  0xfd   : > { %v625_v24 = vpop.permute.xlu2 %624 }
 0x105   : > { %v757_v25 = vpop.permute.xlu2 %756 }
 0x106   : > { %v764_v46 = vsel %vm561_vm1, %v757_v25, 0 }
 0x10d   : > { %v629_v26 = vpop.permute.xlu1 %628  ;;  %v755_v27 = vpop.permute.xlu2 %754 }
 0x10e   : > { %v560_v28 = vpop.permute.xlu0 %559  ;;  %v637_v29 = vsel %vm561_vm1, %v629_v26, 0 }
 0x10f   : > { %v569_v30 = vsel %vm561_vm1, %v560_v28, 0  ;;  %645 = vmatpush.bf16.xpose.msrb.mxu0 %v637_v29 }
 0x110   : > { %577 = vmatpush.bf16.xpose.msra.mxu2 %v569_v30 }
 0x115   : > { %v627_v31 = vpop.permute.xlu1 %626  ;;  %v887_v32 = vpop.permute.xlu2 %886 }
 0x116   : > { %v558_v33 = vpop.permute.xlu0 %557  ;;  %v634_v34 = vsel %vm561_vm1, %v627_v31, 0  ;;  %v894_v56 = vsel %vm561_vm1, %v887_v32, 0 }
 0x117   : > { %v566_v35 = vsel %vm561_vm1, %v558_v33, 0  ;;  %646 = vmatpush.bf16.xpose.msrb.mxu0 %v634_v34 }
 0x118   : > { %578 = vmatpush.bf16.xpose.msra.mxu2 %v566_v35 }
 0x11d   : > { %v692_v37 = vpop.permute.xlu1 %691  ;;  %v885_v38 = vpop.permute.xlu2 %884 }
 0x11e   : > { %v759_v39 = vpop.permute.xlu0 %758  ;;  %1444 = vmatmul.msk.bf16.vlgmr.msrb.gmra.mxu0 %vm561_vm1, %v625_v24  ;;  %v699_v40 = vsel %vm561_vm1, %v692_v37, 0 }
 0x11f   : > { %1442 = vmatmul.msk.bf16.vlgmr.msra.gmra.mxu2 %vm561_vm1, %v1769_v21  ;;  %v767_v41 = vsel %vm561_vm1, %v759_v39, 0 }
 0x120   : > { %710 = vmatpush.bf16.xpose.msrb.mxu2 %v702_v36  ;;  %775 = vmatpush.bf16.xpose.msrb.mxu1 %v767_v41 }
 0x125   : > { %v824_v42 = vpop.permute.xlu1 %823  ;;  %v1017_v43 = vpop.permute.xlu2 %1016 }
 0x126   : > { %v832_v44 = vsel %vm561_vm1, %v824_v42, 0  ;;  %v690_v45 = vpop.permute.xlu0 %689  ;;  %v1024_v63 = vsel %vm561_vm1, %v1017_v43, 0 }
 0x128   : > { %711 = vmatpush.bf16.xpose.msrb.mxu2 %v699_v40  ;;  %776 = vmatpush.bf16.xpose.msrb.mxu1 %v764_v46 }
 0x12d   : > { %v822_v47 = vpop.permute.xlu1 %821  ;;  %v601_v48 = vpop.permute.xlu2 %600 }
 0x12e   : > { %v829_v49 = vsel %vm561_vm1, %v822_v47, 0  ;;  %v889_v50 = vpop.permute.xlu0 %888  ;;  %v608_v51 = vsel %vm606_vm2, %v601_v48, 0 }
 0x12f   : > { %v897_v52 = vsel %vm561_vm1, %v889_v50, 0  ;;  %1446 = vmatmul.msk.bf16.vlgmr.msrb.gmra.mxu2 %vm561_vm1, %v690_v45  ;;  %1448 = vmatmul.msk.bf16.vlgmr.msrb.gmra.mxu1 %vm561_vm1, %v755_v27 }
 0x130   : > { %840 = vmatpush.bf16.xpose.msra.mxu2 %v832_v44  ;;  %616 = vmatpush.bf16.msrb.mxu3 %v608_v51 }
 0x131   : > { %905 = vmatpush.bf16.xpose.msra.mxu1 %v897_v52 }
 0x135   : > { %v954_v53 = vpop.permute.xlu1 %953  ;;  %v666_v7 = vpop.permute.xlu2 %665 }
 0x136   : > { %v962_v54 = vsel %vm561_vm1, %v954_v53, 0  ;;  %v820_v55 = vpop.permute.xlu0 %819 }
 0x138   : > { %841 = vmatpush.bf16.xpose.msra.mxu2 %v829_v49 }
 0x139   : > { %906 = vmatpush.bf16.xpose.msra.mxu1 %v894_v56 }
 0x13d   : > { %v952_v57 = vpop.permute.xlu1 %951  ;;  %v863_v43 = vpop.permute.xlu2 %862 }
 0x13e   : > { %v959_v58 = vsel %vm561_vm1, %v952_v57, 0  ;;  %v1019_v59 = vpop.permute.xlu0 %1018 }
 0x13f   : > { %v1027_v60 = vsel %vm561_vm1, %v1019_v59, 0  ;;  %1450 = vmatmul.msk.bf16.vlgmr.msra.gmra.mxu2 %vm561_vm1, %v820_v55 }
 0x140   : > { %970 = vmatpush.bf16.xpose.msrb.mxu2 %v962_v54  ;;  %1452 = vmatmul.msk.bf16.vlgmr.msra.gmra.mxu1 %vm561_vm1, %v885_v38 }
 0x141   : > { %1035 = vmatpush.bf16.xpose.msrb.mxu1 %v1027_v60 }
 0x145   : > { %v1015_v61 = vpop.permute.xlu1 %1014 }
 0x146   : > { %v950_v62 = vpop.permute.xlu0 %949 }
 0x148   : > { %971 = vmatpush.bf16.xpose.msrb.mxu2 %v959_v58  ;;  %v869_v58 = vsel %vm606_vm2, %v863_v43, 0 }
 0x149   : > { %1036 = vmatpush.bf16.xpose.msrb.mxu1 %v1024_v63 }
 0x14d   : > { %v733_v0 = vpop.permute.xlu1 %732 }
 0x14e   : > { %v739_v1 = vsel %vm606_vm2, %v733_v0, 0  ;;  %v668_v3 = vpop.permute.xlu0 %667 }
 0x14f   : > { %1454 = vmatmul.msk.bf16.vlgmr.msrb.gmra.mxu2 %vm561_vm1, %v950_v62  ;;  %747 = vmatpush.bf16.msra.mxu0 %v739_v1  ;;  %v674_v6 = vsel %vm606_vm2, %v668_v3, 0 }
 0x150   : > { %1456 = vmatmul.msk.bf16.vlgmr.msrb.gmra.mxu1 %vm561_vm1, %v1015_v61 }
 0x155   : > { %v1855_v49 = vpop.permute.xlu1 %927 }
 0x156   : > { %v1832_v4 = vpop.permute.xlu0 %797 }
 0x15e   : > { %v599_v5 = vpop.permute.xlu0 %598 }
 0x15f   : > { %617 = vmatpush.bf16.msrb.mxu3 %v599_v5 }
 0x163   : > { %682 = vmatpush.bf16.msra.mxu3 %v674_v6 }
 0x166   : > { %v1853_v42 = vpop.permute.xlu0 %795 }
 0x167   : > { %683 = vmatpush.bf16.msra.mxu3 %v666_v7 }
 0x19b   : > { %v648_v8 = vpop.f32.mrf.mxu0 }
 0x19c   : > { %v652_v9 = vmul.f32 0.5, %v648_v8 }
 0x19e   : > { %v653_v10 = vsel %vm585_vm3, %v652_v9, -inf }
 0x19f   : > { %654 = vmax.xlane.f32.xlu0 %v653_v10 }
 0x1a2   : > { %v580_v11 = vpop.f32.mrf.mxu2 }
 0x1a3   : > { %v584_v12 = vmul.f32 0.5, %v580_v11  ;;  %v650_v13 = vpop.f32.mrf.mxu0 }
 0x1a5   : > { %v586_v15 = vsel %vm585_vm3, %v584_v12, -inf }
 0x1a6   : > { %587 = vmax.xlane.f32.xlu2 %v586_v15 }
 0x1aa   : > { %v582_v16 = vpop.f32.mrf.mxu2 }
 0x1ac   : > { %v778_v17 = vpop.f32.mrf.mxu1 }
 0x1ad   : > { %v782_v18 = vmul.f32 0.5, %v778_v17 }
 0x1af   : > { %v783_v19 = vsel %vm585_vm3, %v782_v18, -inf }
 0x1b0   : > { %784 = vmax.xlane.f32.xlu1 %v783_v19 }
 0x1b2   : > { %v713_v20 = vpop.f32.mrf.mxu2 }
 0x1b3   : > { %730 = vrot.lane.b32.xlu0 %v1771_v22, %s1638_s18  ;;  %v717_v28 = vmul.f32 0.5, %v713_v20  ;;  %s1651_s18 = smov 28  }
 0x1b4   : > { %v780_v21 = vpop.f32.mrf.mxu1 }
 0x1b5   : > { %v718_v30 = vsel %vm585_vm3, %v717_v28, -inf }
 0x1ba   : > { %v715_v23 = vpop.f32.mrf.mxu2 }
 0x1bd   : > { %v908_v24 = vpop.f32.mrf.mxu1 }
 0x1be   : > { %v912_v25 = vmul.f32 0.5, %v908_v24 }
 0x1c0   : > { %v913_v26 = vsel %vm585_vm3, %v912_v25, -inf }
 0x1c1   : > { %914 = vmax.xlane.f32.xlu2 %v913_v26 }
 0x1c2   : > { %v843_v27 = vpop.f32.mrf.mxu2 }
 0x1c3   : > { %v1843_v36 = vmul.f32 0.5, %v843_v27 }
 0x1c5   : > { %v910_v29 = vpop.f32.mrf.mxu1  ;;  %v848_v38 = vsel %vm585_vm3, %v1843_v36, -inf }
 0x1c9   : > { %719 = vmax.xlane.f32.xlu2 %v718_v30 }
 0x1ca   : > { %v845_v31 = vpop.f32.mrf.mxu2 }
 0x1cd   : > { %v1038_v32 = vpop.f32.mrf.mxu1 }
 0x1ce   : > { %v1042_v33 = vmul.f32 0.5, %v1038_v32 }
 0x1d0   : > { %v1043_v34 = vsel %vm585_vm3, %v1042_v33, -inf }
 0x1d1   : > { %1044 = vmax.xlane.f32.xlu1 %v1043_v34 }
 0x1d2   : > { %v973_v35 = vpop.f32.mrf.mxu2 }
 0x1d3   : > { %v1847_v40 = vmul.f32 0.5, %v973_v35 }
 0x1d5   : > { %v1040_v37 = vpop.f32.mrf.mxu1  ;;  %v978_v41 = vsel %vm585_vm3, %v1847_v40, -inf }
 0x1d9   : > { %849 = vmax.xlane.f32.xlu1 %v848_v38 }
 0x1da   : > { %v975_v39 = vpop.f32.mrf.mxu2 }
 0x1e1   : > { %860 = vrot.lane.b32.xlu2 %v1771_v22, %s1641_s22  ;;  %979 = vmax.xlane.f32.xlu1 %v978_v41 }
 0x212   : > { %v655_v44 = vpop.xlane.xlu0 %654 }
 0x213   : > { %v656_v45 = vsub.f32 %v652_v9, %v655_v44 }
 0x215   : > { %v657_v46 = vmul.f32 1.442695, %v656_v45 }
 0x217   : > { %1574 = vpow2.f32 %v657_v46 }
 0x219   : > { %v588_v47 = vpop.xlane.xlu2 %587 }
 0x21a   : > { %v589_v48 = vsub.f32 %v584_v12, %v588_v47 }
 0x21c   : > { %v590_v50 = vmul.f32 1.442695, %v589_v48 }
 0x21d   : > { %v1857_v51 = vpop.eup %1574 }
 0x21e   : > { %1576 = vpow2.f32 %v590_v50  ;;  %v659_v52 = vsel %vm585_vm3, %v1857_v51, 0.0 }
 0x21f   : > { %660 = vadd.xlane.f32.xlu1 %v659_v52 }
 0x223   : > { %v785_v53 = vpop.xlane.xlu1 %784 }
 0x224   : > { %v1577_v54 = vpop.eup %1576  ;;  %v786_v55 = vsub.f32 %v782_v18, %v785_v53 }
 0x225   : > { %v731_v56 = vpop.permute.xlu0 %730  ;;  %v592_v57 = vsel %vm585_vm3, %v1577_v54, 0.0 }
 0x226   : > { %v787_v59 = vmul.f32 1.442695, %v786_v55  ;;  %593 = vadd.xlane.f32.xlu0 %v592_v57  ;;  %748 = vmatpush.bf16.msra.mxu0 %v731_v56 }
 0x228   : > { %1578 = vpow2.f32 %v787_v59 }
 0x22a   : > { %877 = vmatpush.bf16.msrb.mxu0 %v869_v58 }
 0x22e   : > { %v1863_v60 = vpop.eup %1578 }
 0x22f   : > { %v789_v61 = vsel %vm585_vm3, %v1863_v60, 0.0 }
 0x230   : > { %790 = vadd.xlane.f32.xlu1 %v789_v61 }
 0x234   : > { %v915_v62 = vpop.xlane.xlu2 %914 }
 0x235   : > { %v916_v63 = vsub.f32 %v912_v25, %v915_v62 }
 0x237   : > { %v917_v0 = vmul.f32 1.442695, %v916_v63 }
 0x239   : > { %1580 = vpow2.f32 %v917_v0 }
 0x23c   : > { %v720_v1 = vpop.xlane.xlu2 %719 }
 0x23d   : > { %v721_v3 = vsub.f32 %v717_v28, %v720_v1 }
 0x23f   : > { %v1867_v5 = vpop.eup %1580  ;;  %v722_v6 = vmul.f32 1.442695, %v721_v3 }
 0x240   : > { %v919_v7 = vsel %vm585_vm3, %v1867_v5, 0.0 }
 0x241   : > { %1582 = vpow2.f32 %v722_v6  ;;  %920 = vadd.xlane.f32.xlu0 %v919_v7 }
 0x244   : > { %v1045_v8 = vpop.xlane.xlu1 %1044  ;;  %v861_v9 = vpop.permute.xlu2 %860 }
 0x245   : > { %v1046_v10 = vsub.f32 %v1042_v33, %v1045_v8  ;;  %878 = vmatpush.bf16.msrb.mxu0 %v861_v9  ;;  %v804_v33 = vsel %vm606_vm2, %v1832_v4, 0 }
 0x247   : > { %v1583_v11 = vpop.eup %1582  ;;  %v1047_v12 = vmul.f32 1.442695, %v1046_v10 }
 0x248   : > { %v724_v13 = vsel %vm585_vm3, %v1583_v11, 0.0 }
 0x249   : > { %1584 = vpow2.f32 %v1047_v12  ;;  %725 = vadd.xlane.f32.xlu2 %v724_v13  ;;  %1057 = vrot.lane.b32.xlu1 %v1764_v14, %s1643_s24 }
 0x24c   : > { %v850_v17 = vpop.xlane.xlu1 %849 }
 0x24d   : > { %v851_v18 = vsub.f32 %v1843_v36, %v850_v17  ;;  %v934_v36 = vsel %vm606_vm2, %v1855_v49, 0 }
 0x24f   : > { %v1873_v15 = vpop.eup %1584  ;;  %v852_v19 = vmul.f32 1.442695, %v851_v18 }
 0x250   : > { %v1049_v16 = vsel %vm585_vm3, %v1873_v15, 0.0 }
 0x251   : > { %1050 = vadd.xlane.f32.xlu2 %v1049_v16  ;;  %1586 = vpow2.f32 %v852_v19 }
 0x254   : > { %v980_v20 = vpop.xlane.xlu1 %979 }
 0x255   : > { %925 = vrot.lane.b32.xlu0 %v1771_v22, %s1640_s21  ;;  %v981_v21 = vsub.f32 %v1847_v40, %v980_v20  ;;  %s482_s21 = scalar_lea.vmem %s2000_s14, %s1428_s20 }
 0x257   : > { %v1587_v23 = vpop.eup %1586  ;;  %v982_v24 = vmul.f32 1.442695, %v981_v21  ;;  %v1513_v21 = vld [vmem:[%s1990_s4 + $0x8] sm:$0xff] }
 0x258   : > { %v854_v25 = vsel %vm585_vm3, %v1587_v23, 0.0  ;;  %1149 = vmatpush.bf16.msra.mxu2 %v1513_v21 }
 0x259   : > { %1588 = vpow2.f32 %v982_v24 }
 0x25f   : > { %v1589_v26 = vpop.eup %1588 }
 0x260   : > { %v984_v27 = vsel %vm585_vm3, %v1589_v26, 0.0 }
 0x269   : > { %990 = vrot.lane.b32.xlu2 %v1771_v22, %s1644_s25 }
 0x273   : > { %855 = vadd.xlane.f32.xlu1 %v854_v25 }
 0x27f   : > { %985 = vadd.xlane.f32.xlu0 %v984_v27 }
 0x28c   : > { %992 = vrot.lane.b32.xlu1 %v1764_v14, %s1644_s25 }
 0x292   : > { %v661_v31 = vpop.xlane.xlu1 %660 }
 0x294   : > { %1055 = vrot.lane.b32.xlu1 %v1771_v22, %s1643_s24 }
 0x299   : > { %v594_v28 = vpop.xlane.xlu0 %593 }
 0x29a   : > { %1590 = vrcp.f32 %v594_v28 }
 0x29b   : > { %1592 = vrcp.f32 %v661_v31 }
 0x2a0   : > { %v1591_v29 = vpop.eup %1590 }
 0x2a1   : > { %v596_v30 = vmul.f32 %v1591_v29, %v1577_v54  ;;  %v1593_v34 = vpop.eup %1592 }
 0x2a2   : > { %v663_v14 = vmul.f32 %v1593_v34, %v1857_v51 }
 0x2a3   : > { %v597_v32 = vpack.c.bf16 %v596_v30, %v596_v30  ;;  %v791_v22 = vpop.xlane.xlu1 %790 }
 0x2a4   : > { %v664_v35 = vpack.c.bf16 %v663_v14, %v663_v14  ;;  %1594 = vrcp.f32 %v791_v22 }
 0x2a5   : > { %1443 = vmatmul.msk.bf16.vlgmr.msrb.gmra.mxu3 %vm585_vm3, %v597_v32 }
 0x2a6   : > { %812 = vmatpush.bf16.msrb.mxu3 %v804_v33 }
 0x2aa   : > { %813 = vmatpush.bf16.msrb.mxu3 %v1853_v42  ;;  %v1595_v37 = vpop.eup %1594 }
 0x2ab   : > { %v793_v38 = vmul.f32 %v1595_v37, %v1863_v60  ;;  %v1567_v37 = vld [vmem:[%s1991_s5] ss:$0 sm:$0xff] }
 0x2ad   : > { %v794_v41 = vpack.c.bf16 %v793_v38, %v793_v38 }
 0x2b4   : > { %v921_v39 = vpop.xlane.xlu0 %920 }
 0x2b5   : > { %1445 = vmatmul.msk.bf16.vlgmr.msra.gmra.mxu3 %vm585_vm3, %v664_v35 }
 0x2b6   : > { %942 = vmatpush.bf16.msra.mxu3 %v934_v36 }
 0x2bb   : > { %v1058_v43 = vpop.permute.xlu1 %1057 }
 0x2bc   : > { %v726_v4 = vpop.xlane.xlu2 %725  ;;  %v1064_v46 = vsel %vm606_vm2, %v1058_v43, 0 }
 0x2bd   : > { %1596 = vrcp.f32 %v726_v4 }
 0x2be   : > { %1598 = vrcp.f32 %v921_v39 }
 0x2c3   : > { %v1597_v40 = vpop.eup %1596 }
 0x2c4   : > { %v728_v42 = vmul.f32 %v1597_v40, %v1583_v11  ;;  %v1599_v47 = vpop.eup %1598  ;;  %v1051_v55 = vpop.xlane.xlu2 %1050 }
 0x2c5   : > { %1449 = vmatmul.msk.bf16.vlgmr.msrb.gmra.mxu3 %vm585_vm3, %v794_v41  ;;  %v923_v48 = vmul.f32 %v1599_v47, %v1867_v5 }
 0x2c6   : > { %v729_v44 = vpack.c.bf16 %v728_v42, %v728_v42  ;;  %v1652_v42 = vmov 32.0  }
 0x2c7   : > { %v926_v45 = vpop.permute.xlu0 %925  ;;  %v924_v49 = vpack.c.bf16 %v923_v48, %v923_v48 }
 0x2c8   : > { %1447 = vmatmul.msk.bf16.vlgmr.msra.gmra.mxu0 %vm585_vm3, %v729_v44  ;;  %943 = vmatpush.bf16.msra.mxu3 %v926_v45 }
 0x2cc   : > { %1072 = vmatpush.bf16.msrb.mxu3 %v1064_v46  ;;  %v991_v61 = vpop.permute.xlu2 %990 }
 0x2d5   : > { %1453 = vmatmul.msk.bf16.vlgmr.msra.gmra.mxu3 %vm585_vm3, %v924_v49 }
 0x2e6   : > { %v856_v50 = vpop.xlane.xlu1 %855 }
 0x2e7   : > { %1600 = vrcp.f32 %v856_v50 }
 0x2ed   : > { %v1601_v51 = vpop.eup %1600 }
 0x2ee   : > { %v858_v52 = vmul.f32 %v1601_v51, %v1587_v23  ;;  %v1512_v23 = vld [vmem:[%s1990_s4] sm:$0xff] }
 0x2ef   : > { %1150 = vmatpush.bf16.msra.mxu2 %v1512_v23 }
 0x2f0   : > { %v859_v53 = vpack.c.bf16 %v858_v52, %v858_v52 }
 0x2f2   : > { %1451 = vmatmul.msk.bf16.vlgmr.msrb.gmra.mxu0 %vm585_vm3, %v859_v53  ;;  %v986_v54 = vpop.xlane.xlu0 %985  ;;  %v1515_v53 = vld [vmem:[%s1994_s8 + $0x8] sm:$0xff] }
 0x2f3   : > { %1602 = vrcp.f32 %v986_v54  ;;  %v1514_v54 = vld [vmem:[%s1994_s8] sm:$0xff] }
 0x2f4   : > { %1604 = vrcp.f32 %v1051_v55  ;;  %v1523_v55 = vld [vmem:[%s1996_s10 + $0x38] sm:$0xff] }
 0x2f5   : > { %1606 = vrcp.f32 %v1652_v42  ;;  %1311 = vmatpush.bf16.msra.mxu1 %v1523_v55 }
 0x2f9   : > { %v1603_v56 = vpop.eup %1602 }
 0x2fa   : > { %v1605_v59 = vpop.eup %1604  ;;  %v988_v60 = vmul.f32 %v1603_v56, %v1589_v26 }
 0x2fb   : > { %v1053_v62 = vmul.f32 %v1605_v59, %v1873_v15  ;;  %v1607_v43 = vpop.eup %1606 }
 0x2fc   : > { %v989_v63 = vpack.c.bf16 %v988_v60, %v988_v60  ;;  %v1163_v44 = vmul.f32 32.0, %v1607_v43  ;;  %vm1167_vm9 = vweird.f32 %v1607_v43 }
 0x2fd   : > { %v1054_v1 = vpack.c.bf16 %v1053_v62, %v1053_v62 }
 0x2fe   : > { %v993_v57 = vpop.permute.xlu1 %992  ;;  %v1164_v45 = vsub.f32 1.0, %v1163_v44 }
 0x2ff   : > { %v999_v58 = vsel %vm606_vm2, %v993_v57, 0 }
 0x300   : > { %1007 = vmatpush.bf16.msra.mxu0 %v999_v58  ;;  %v1165_v46 = vmul.f32 %v1607_v43, %v1164_v45 }
 0x302   : > { %v1166_v47 = vadd.f32 %v1607_v43, %v1165_v46 }
 0x304   : > { %1008 = vmatpush.bf16.msra.mxu0 %v991_v61  ;;  %v1919_v48 = vsel %vm1167_vm9, %v1607_v43, %v1166_v47 }
 0x306   : > { %v1056_v0 = vpop.permute.xlu1 %1055 }
 0x307   : > { %1455 = vmatmul.msk.bf16.vlgmr.msra.gmra.mxu0 %vm585_vm3, %v989_v63  ;;  %1073 = vmatpush.bf16.msrb.mxu3 %v1056_v0 }
 0x308   : > { %1226 = vmatpush.bf16.msrb.mxu0 %v1515_v53 }
 0x30a   : > { %1457 = vmatmul.msk.bf16.vlgmr.msrb.gmra.mxu3 %vm585_vm3, %v1054_v1  ;;  %v1568_v1 = vld [vmem:[%s1992_s6] ss:$0 sm:$0xff] }
 0x30c   : > { %1227 = vmatpush.bf16.msrb.mxu0 %v1514_v54 }
 0x328   : > { %v619_v3 = vpop.f32.mrf.mxu3 }
 0x330   : > { %v621_v5 = vpop.f32.mrf.mxu3 }
 0x331   : > { %v1569_v5 = vld [vmem:[%s1993_s7] ss:$0 sm:$0xff] }
 0x338   : > { %v685_v6 = vpop.f32.mrf.mxu3 }
 0x339   : > { %1080 = vrot.lane.b32.xlu1 %v685_v6, %s1645_s26 }
 0x340   : > { %v687_v7 = vpop.f32.mrf.mxu3 }
 0x345   : > { %v750_v8 = vpop.f32.mrf.mxu0 }
 0x346   : > { %1084 = vrot.lane.b32.xlu0 %v750_v8, %s1646_s27 }
 0x348   : > { %v815_v9 = vpop.f32.mrf.mxu3 }
 0x34d   : > { %v752_v10 = vpop.f32.mrf.mxu0 }
 0x34e   : > { %v1522_v10 = vld [vmem:[%s1996_s10 + $0x30] sm:$0xff] }
 0x34f   : > { %1312 = vmatpush.bf16.msra.mxu1 %v1522_v10 }
 0x350   : > { %v817_v11 = vpop.f32.mrf.mxu3 }
 0x351   : > { %v1521_v11 = vld [vmem:[%s1996_s10 + $0x28] sm:$0xff] }
 0x353   : > { %1313 = vmatpush.bf16.msra.mxu1 %v1521_v11 }
 0x358   : > { %v945_v12 = vpop.f32.mrf.mxu3 }
 0x359   : > { %1096 = vrot.lane.b32.xlu2 %v945_v12, %s1647_s28  ;;  %v1520_v12 = vld [vmem:[%s1996_s10 + $0x20] sm:$0xff] }
 0x35a   : > { %1314 = vmatpush.bf16.msra.mxu1 %v1520_v12 }
 0x360   : > { %v947_v13 = vpop.f32.mrf.mxu3 }
 0x361   : > { %v1519_v13 = vld [vmem:[%s1996_s10 + $0x18] sm:$0xff] }
 0x362   : > { %1315 = vmatpush.bf16.msra.mxu1 %v1519_v13 }
 0x36f   : > { %v880_v15 = vpop.f32.mrf.mxu0 }
 0x370   : > { %1092 = vrot.lane.b32.xlu1 %v880_v15, %s1648_s15  ;;  %v1518_v15 = vld [vmem:[%s1996_s10 + $0x10] sm:$0xff] }
 0x371   : > { %1316 = vmatpush.bf16.msra.mxu1 %v1518_v15 }
 0x377   : > { %v882_v16 = vpop.f32.mrf.mxu0 }
 0x378   : > { %1088 = vrot.lane.b32.xlu1 %v815_v9, %s1649_s16  ;;  %v1517_v16 = vld [vmem:[%s1996_s10 + $0x8] sm:$0xff] }
 0x379   : > { %1317 = vmatpush.bf16.msra.mxu1 %v1517_v16 }
 0x384   : > { %v1010_v17 = vpop.f32.mrf.mxu0 }
 0x385   : > { %1100 = vrot.lane.b32.xlu1 %v1010_v17, %s1650_s17  ;;  %v1516_v17 = vld [vmem:[%s1996_s10] sm:$0xff] }
 0x386   : > { %1318 = vmatpush.bf16.msra.mxu1 %v1516_v17 }
 0x38c   : > { %v1012_v18 = vpop.f32.mrf.mxu0 }
 0x38d   : > { %v1075_v19 = vpop.f32.mrf.mxu3  ;;  %v1570_v18 = vld [vmem:[%s1995_s9] ss:$0 sm:$0xff] }
 0x38e   : > { %1104 = vrot.lane.b32.xlu0 %v1075_v19, %s1651_s18 }
 0x395   : > { %v1077_v20 = vpop.f32.mrf.mxu3 }
 0x3ab   : > { %v1081_v24 = vpop.permute.xlu1 %1080 }
 0x3ac   : > { %v1107_v28 = vsel %vm561_vm1, %v619_v3, %v1081_v24 }
 0x3b3   : > { %v1097_v33 = vpop.permute.xlu2 %1096 }
 0x3b8   : > { %v1085_v26 = vpop.permute.xlu0 %1084 }
 0x3b9   : > { %v1109_v29 = vsel %vm1108_vm4, %v1107_v28, %v1085_v26 }
 0x3e2   : > { %v1093_v25 = vpop.permute.xlu1 %1092 }
 0x3ea   : > { %v1089_v27 = vpop.permute.xlu1 %1088 }
 0x3eb   : > { %v1111_v30 = vsel %vm1110_vm5, %v1109_v29, %v1089_v27 }
 0x3ec   : > { %v1113_v31 = vsel %vm1112_vm6, %v1111_v30, %v1093_v25 }
 0x3ed   : > { %v1115_v34 = vsel %vm1114_vm7, %v1113_v31, %v1097_v33  ;;  %v1571_v33 = vld [vmem:[%s1997_s11] ss:$0 sm:$0xff] }
 0x3f7   : > { %v1101_v32 = vpop.permute.xlu1 %1100 }
 0x3f8   : > { %v1116_v14 = vsel %vm585_vm3, %v1115_v34, %v1101_v32 }
 0x400   : > { %v1105_v35 = vpop.permute.xlu0 %1104 }
 0x401   : > { %v1118_v22 = vsel %vm1117_vm8, %v1116_v14, %v1105_v35 }
 0x402   : > { %v1119_v36 = vpack.c.bf16 %v1118_v22, %v1118_v22 }
 0x404   : > { %1466 = vmatmul.msk.bf16.vlgmr.msra.gmra.mxu2 %vm511_vm0, %v1119_v36 }
 0x487   : > { %v1152_v4 = vpop.f32.mrf.mxu2 }
 0x488   : > { %v1153_v38 = vadd.f32 %v1567_v37, %v1152_v4 }
 0x48a   : > { %v1156_v39 = vadd.f32 %v1153_v38, %v1754_v2 }
 0x48c   : > { %v1159_v40 = vsel %vm511_vm0, %v1156_v39, 0.0 }
 0x48d   : > { %1160 = vadd.xlane.f32.xlu2 %v1159_v40 }
 0x48f   : > { %v1154_v41 = vpop.f32.mrf.mxu2 }
 0x500   : > { %v1161_v49 = vpop.xlane.xlu2 %1160 }
 0x501   : > { %v1169_v50 = vmul.f32 %v1919_v48, %v1161_v49 }
 0x503   : > { %v1170_v51 = vsub.f32 %v1156_v39, %v1169_v50 }
 0x505   : > { %v1171_v52 = vmul.f32 %v1170_v51, %v1170_v51 }
 0x507   : > { %v1172_v2 = vsel %vm511_vm0, %v1171_v52, 0.0 }
 0x508   : > { %1173 = vadd.xlane.f32.xlu1 %v1172_v2 }
 0x57b   : > { %v1174_v56 = vpop.xlane.xlu1 %1173 }
 0x57c   : > { %v1175_v57 = vmul.f32 %v1174_v56, %v1919_v48 }
 0x57e   : > { %v1176_v58 = vadd.f32 1e-05, %v1175_v57 }
 0x580   : > { %1608 = vrsqrt.f32 %v1176_v58  ;;  %vm1183_vm11 = vweird.f32 %v1176_v58 }
 0x586   : > { %v1609_v59 = vpop.eup %1608 }
 0x587   : > { %v1178_v60 = vmul.f32 %v1609_v59, %v1176_v58  ;;  %vm1184_vm10 = vweird.f32 %v1609_v59 }
 0x588   : > { %vm1185_vm12 = vmor %vm1183_vm11, %vm1184_vm10 }
 0x589   : > { %v1179_v61 = vmul.f32 %v1609_v59, %v1178_v60 }
 0x58b   : > { %v1180_v62 = vmul.f32 0.5, %v1179_v61 }
 0x58d   : > { %v1181_v63 = vsub.f32 1.5, %v1180_v62 }
 0x58f   : > { %v1182_v0 = vmul.f32 %v1609_v59, %v1181_v63 }
 0x591   : > { %v1186_v3 = vsel %vm1185_vm12, %v1609_v59, %v1182_v0 }
 0x592   : > { %v1187_v6 = vmul.f32 %v1186_v3, %v1170_v51  ;;  %v1572_v51 = vld [vmem:[%s1998_s12] ss:$0 sm:$0xff] }
 0x594   : > { %v1191_v7 = vmul.f32 %v1568_v1, %v1187_v6 }
 0x596   : > { %v1195_v8 = vadd.f32 %v1569_v5, %v1191_v7 }
 0x598   : > { %v1196_v9 = vpack.c.bf16 %v1195_v8, %v1195_v8 }
 0x59a   : > { %1475 = vmatmul.msk.bf16.vlgmr.msrb.gmra.mxu0 %vm511_vm0, %v1196_v9 }
 0x617   : > { %v1229_v19 = vpop.f32.mrf.mxu0 }
 0x618   : > { %v1230_v20 = vadd.f32 %v1570_v18, %v1229_v19 }
 0x61a   : > { %v1233_v21 = vmul.f32 %v1230_v20, %v1230_v20 }
 0x61c   : > { %v1234_v23 = vmul.f32 %v1233_v21, %v1230_v20 }
 0x61e   : > { %v1235_v24 = vmul.f32 0.044715, %v1234_v23 }
 0x61f   : > { %v1231_v25 = vpop.f32.mrf.mxu0 }
 0x620   : > { %v1236_v26 = vadd.f32 %v1235_v24, %v1230_v20 }
 0x622   : > { %v1237_v27 = vmul.f32 0.7978846, %v1236_v26 }
 0x624   : > { %1610 = vtanh.f32 %v1237_v27 }
 0x62a   : > { %v1611_v28 = vpop.eup %1610 }
 0x62b   : > { %v1239_v29 = vadd.f32 1.0, %v1611_v28 }
 0x62d   : > { %v1240_v30 = vmul.f32 0.5, %v1239_v29 }
 0x62f   : > { %v1241_v31 = vmul.f32 %v1240_v30, %v1230_v20 }
 0x631   : > { %v1242_v32 = vpack.c.bf16 %v1241_v31, %v1241_v31 }
 0x633   : > { %1319 = vmatmul.bf16.vlgmr.msra.gmra.mxu1 %v1242_v32 }
 0x6b0   : > { %v1320_v34 = vpop.f32.mrf.mxu1 }
 0x6b1   : > { %v1321_v14 = vadd.f32 %v1571_v33, %v1320_v34 }
 0x6b3   : > { %v1324_v35 = vadd.f32 %v1321_v14, %v1195_v8 }
 0x6b5   : > { %v1327_v22 = vsel %vm511_vm0, %v1324_v35, 0.0 }
 0x6b6   : > { %1328 = vadd.xlane.f32.xlu0 %v1327_v22 }
 0x6b8   : > { %v1322_v36 = vpop.f32.mrf.mxu1 }
 0x729   : > { %v1329_v37 = vpop.xlane.xlu0 %1328 }
 0x72a   : > { %v1330_v4 = vmul.f32 %v1329_v37, %v1919_v48 }
 0x72c   : > { %v1331_v38 = vsub.f32 %v1324_v35, %v1330_v4 }
 0x72e   : > { %v1332_v39 = vmul.f32 %v1331_v38, %v1331_v38 }
 0x730   : > { %v1333_v40 = vsel %vm511_vm0, %v1332_v39, 0.0 }
 0x731   : > { %1334 = vadd.xlane.f32.xlu2 %v1333_v40 }
 0x7a4   : > { %v1335_v41 = vpop.xlane.xlu2 %1334 }
 0x7a5   : > { %v1336_v42 = vmul.f32 %v1335_v41, %v1919_v48  ;;  %v1573_v48 = vld [vmem:[%s1999_s13] ss:$0 sm:$0xff] }
 0x7a7   : > { %v1337_v43 = vadd.f32 1e-05, %v1336_v42 }
 0x7a9   : > { %1612 = vrsqrt.f32 %v1337_v43  ;;  %vm1344_vm14 = vweird.f32 %v1337_v43 }
 0x7af   : > { %v1613_v44 = vpop.eup %1612 }
 0x7b0   : > { %v1339_v45 = vmul.f32 %v1613_v44, %v1337_v43  ;;  %vm1345_vm13 = vweird.f32 %v1613_v44 }
 0x7b1   : > { %vm1346_vm15 = vmor %vm1344_vm14, %vm1345_vm13 }
 0x7b2   : > { %v1340_v46 = vmul.f32 %v1613_v44, %v1339_v45 }
 0x7b4   : > { %v1341_v47 = vmul.f32 0.5, %v1340_v46 }
 0x7b6   : > { %v1342_v49 = vsub.f32 1.5, %v1341_v47 }
 0x7b8   : > { %v1343_v50 = vmul.f32 %v1613_v44, %v1342_v49 }
 0x7ba   : > { %v1347_v52 = vsel %vm1346_vm15, %v1613_v44, %v1343_v50 }
 0x7bb   : > { %v1348_v2 = vmul.f32 %v1347_v52, %v1331_v38 }
 0x7bd   : > { %v1352_v53 = vmul.f32 %v1572_v51, %v1348_v2 }
 0x7bf   : > { %v1356_v54 = vadd.f32 %v1573_v48, %v1352_v53 }
 0x7c1   : > { %1357 = vst.msk [vmem:[%s482_s21] sm:$0xff] %vm511_vm0, %v1356_v54 }
 0x7c2 PF: > { %s24_s29 = sadd.s32 1, %s1620_s29  }
 0x7c3   : > { %p21_p4 = scmp.ge.s32.totalorder %s24_s29, 4  }
 0x7c5   :  { %23 = sbr.rel (!%p21_p4) target bundleno = 1 (0x1), region = 109 }

// kernel: hybrid_blip2_flamingo_forward.25
= control target key start
LH: loop header
LB: loop body
LE: loop exit
PB: predicated region body
PF: predicated region fallthrough
CT: control target
= control target key end

     0   :  { %vm23_vm0 = vcmask 261120   ;;  %s342_s0 = inlined_call_operand.vmem [shape: f32[32,32], index: 0, kind: input, shape index: {}]   ;;  %s343_s1 = inlined_call_operand.vmem [shape: f32[1,32], index: 1, kind: input, shape index: {}]   ;;  %s344_s2 = inlined_call_operand.vmem [shape: f32[1,32], index: 2, kind: input, shape index: {}]   ;;  %s345_s3 = inlined_call_operand.vmem [shape: bf16[32,128], index: 3, kind: input, shape index: {}]   ;;  %s346_s4 = inlined_call_operand.hbm [shape: f32[32,128], index: 4, kind: output, shape index: {}]  }
   0x1   :  { %v21_v0 = vld [vmem:[%s342_s0 + $0x10] sm:$0xff]  ;;  %v19_v1 = vld [vmem:[%s342_s0] sm:$0xff] }
   0x2   :  { %v30_v2 = vsel %vm23_vm0, %v21_v0, 0.0  ;;  %v24_v3 = vsel %vm23_vm0, %v19_v1, 0.0 }
   0x3   :  { %31 = vadd.xlane.f32.xlu1 %v30_v2  ;;  %25 = vadd.xlane.f32.xlu0 %v24_v3 }
   0x4   :  { %9 = vsyncpa [#allocation3], 0  ;;  %v22_v4 = vld [vmem:[%s342_s0 + $0x18] sm:$0xff]  ;;  %v20_v5 = vld [vmem:[%s342_s0 + $0x8] sm:$0xff]  ;;  %v256_v8 = vmov 32.0   ;;  %s188_s5 = sshll.u32 %s346_s4, 4  ;;  %s189_s5 = int_to_ptr.hbm [resolvable:$true] %s188_s5 }
   0x5   :  { %v33_v6 = vsel %vm23_vm0, %v22_v4, 0.0  ;;  %v27_v7 = vsel %vm23_vm0, %v20_v5, 0.0  ;;  %220 = vrcp.f32 %v256_v8  ;;  %v211_v35 = vld [vmem:[%s345_s3 + $0x8] sm:$0xff]  ;;  %v210_v40 = vld [vmem:[%s345_s3] sm:$0xff]  ;;  %s258_s6 = smov 128   ;;  %s259_s7 = smov 8  }
   0x6   :  { %165 = vmatpush.bf16.msra.mxu0 %v211_v35  ;;  %212 = vmatpush.bf16.msra.mxu1 %v211_v35 }
   0xa   :  { %166 = vmatpush.bf16.msra.mxu0 %v210_v40  ;;  %213 = vmatpush.bf16.msra.mxu1 %v210_v40 }
   0xb   :  { %34 = vadd.xlane.f32.xlu1 %v33_v6  ;;  %28 = vadd.xlane.f32.xlu0 %v27_v7  ;;  %v221_v9 = vpop.eup %220 }
   0xc   :  { %v37_v10 = vmul.f32 32.0, %v221_v9  ;;  %vm41_vm1 = vweird.f32 %v221_v9 }
   0xe   :  { %v38_v11 = vsub.f32 1.0, %v37_v10  ;;  %v218_v10 = vld [vmem:[%s343_s1] ss:$0 sm:$0xff]  ;;  %s257_s1 = smov [#allocation2]  }
  0x10   :  { %v39_v12 = vmul.f32 %v221_v9, %v38_v11 }
  0x12   :  { %v40_v13 = vadd.f32 %v221_v9, %v39_v12 }
  0x14   :  { %v42_v14 = vsel %vm41_vm1, %v221_v9, %v40_v13 }
  0x76   :  { %v32_v15 = vpop.xlane.xlu1 %31  ;;  %v26_v16 = vpop.xlane.xlu0 %25 }
  0x77   :  { %v45_v17 = vmul.f32 %v42_v14, %v32_v15  ;;  %v43_v18 = vmul.f32 %v42_v14, %v26_v16 }
  0x79   :  { %v301_v19 = vsub.f32 %v21_v0, %v45_v17  ;;  %v303_v20 = vsub.f32 %v19_v1, %v43_v18  ;;  %v219_v17 = vld [vmem:[%s344_s2] ss:$0 sm:$0xff]  ;;  %s186_s2 = sshll.u32 %s257_s1, 4  ;;  %s187_s2 = int_to_ptr.vmem [resolvable:$true] %s186_s2 }
  0x7b   :  { %v53_v21 = vmul.f32 %v301_v19, %v301_v19  ;;  %v51_v22 = vmul.f32 %v303_v20, %v303_v20 }
  0x7d   :  { %v61_v23 = vsel %vm23_vm0, %v53_v21, 0.0  ;;  %v55_v24 = vsel %vm23_vm0, %v51_v22, 0.0 }
  0x7e   :  { %v35_v25 = vpop.xlane.xlu1 %34  ;;  %62 = vadd.xlane.f32.xlu0 %v61_v23  ;;  %56 = vadd.xlane.f32.xlu2 %v55_v24  ;;  %v29_v26 = vpop.xlane.xlu0 %28 }
  0x7f   :  { %v46_v27 = vmul.f32 %v42_v14, %v35_v25  ;;  %v44_v28 = vmul.f32 %v42_v14, %v29_v26 }
  0x81   :  { %v311_v29 = vsub.f32 %v22_v4, %v46_v27  ;;  %v313_v30 = vsub.f32 %v20_v5, %v44_v28 }
  0x83   :  { %v54_v31 = vmul.f32 %v311_v29, %v311_v29  ;;  %v52_v32 = vmul.f32 %v313_v30, %v313_v30 }
  0x85   :  { %v64_v33 = vsel %vm23_vm0, %v54_v31, 0.0  ;;  %v58_v34 = vsel %vm23_vm0, %v52_v32, 0.0 }
  0x86   :  { %65 = vadd.xlane.f32.xlu1 %v64_v33  ;;  %59 = vadd.xlane.f32.xlu2 %v58_v34 }
  0xf1   :  { %v57_v36 = vpop.xlane.xlu2 %56  ;;  %v63_v37 = vpop.xlane.xlu0 %62 }
  0xf2   :  { %v67_v38 = vmul.f32 %v57_v36, %v42_v14  ;;  %v69_v39 = vmul.f32 %v63_v37, %v42_v14 }
  0xf4   :  { %v71_v41 = vadd.f32 1e-05, %v67_v38  ;;  %v73_v42 = vadd.f32 1e-05, %v69_v39 }
  0xf6   :  { %222 = vrsqrt.f32 %v71_v41  ;;  %vm101_vm4 = vweird.f32 %v73_v42  ;;  %vm81_vm5 = vweird.f32 %v71_v41 }
  0xf7   :  { %224 = vrsqrt.f32 %v73_v42 }
  0xf9   :  { %v66_v43 = vpop.xlane.xlu1 %65  ;;  %v60_v44 = vpop.xlane.xlu2 %59 }
  0xfa   :  { %v70_v45 = vmul.f32 %v66_v43, %v42_v14  ;;  %v68_v46 = vmul.f32 %v60_v44, %v42_v14 }
  0xfc   :  { %v223_v47 = vpop.eup %222  ;;  %v74_v48 = vadd.f32 1e-05, %v70_v45  ;;  %v72_v49 = vadd.f32 1e-05, %v68_v46 }
  0xfd   :  { %v225_v50 = vpop.eup %224  ;;  %v76_v51 = vmul.f32 %v223_v47, %v71_v41  ;;  %vm82_vm3 = vweird.f32 %v223_v47 }
  0xfe   :  { %v96_v52 = vmul.f32 %v225_v50, %v73_v42  ;;  %226 = vrsqrt.f32 %v74_v48  ;;  %vm102_vm2 = vweird.f32 %v225_v50  ;;  %vm83_vm7 = vmor %vm81_vm5, %vm82_vm3  ;;  %vm111_vm10 = vweird.f32 %v74_v48 }
  0xff   :  { %v77_v53 = vmul.f32 %v223_v47, %v76_v51  ;;  %228 = vrsqrt.f32 %v72_v49  ;;  %vm103_vm6 = vmor %vm101_vm4, %vm102_vm2  ;;  %vm91_vm12 = vweird.f32 %v72_v49 }
 0x100   :  { %v97_v54 = vmul.f32 %v225_v50, %v96_v52 }
 0x101   :  { %v78_v55 = vmul.f32 0.5, %v77_v53 }
 0x102   :  { %v98_v56 = vmul.f32 0.5, %v97_v54 }
 0x103   :  { %v79_v57 = vsub.f32 1.5, %v78_v55 }
 0x104   :  { %v227_v58 = vpop.eup %226  ;;  %v99_v59 = vsub.f32 1.5, %v98_v56 }
 0x105   :  { %v229_v60 = vpop.eup %228  ;;  %v106_v61 = vmul.f32 %v227_v58, %v74_v48  ;;  %v80_v62 = vmul.f32 %v223_v47, %v79_v57  ;;  %vm112_vm8 = vweird.f32 %v227_v58 }
 0x106   :  { %v100_v63 = vmul.f32 %v225_v50, %v99_v59  ;;  %v86_v0 = vmul.f32 %v229_v60, %v72_v49  ;;  %vm92_vm9 = vweird.f32 %v229_v60  ;;  %vm113_vm11 = vmor %vm111_vm10, %vm112_vm8 }
 0x107   :  { %v107_v1 = vmul.f32 %v227_v58, %v106_v61  ;;  %v84_v5 = vsel %vm83_vm7, %v223_v47, %v80_v62  ;;  %vm93_vm13 = vmor %vm91_vm12, %vm92_vm9 }
 0x108   :  { %v87_v2 = vmul.f32 %v229_v60, %v86_v0  ;;  %v104_v3 = vsel %vm103_vm6, %v225_v50, %v100_v63  ;;  %v115_v11 = vmul.f32 %v84_v5, %v303_v20 }
 0x109   :  { %v108_v4 = vmul.f32 0.5, %v107_v1  ;;  %v117_v8 = vmul.f32 %v104_v3, %v301_v19 }
 0x10a   :  { %v88_v6 = vmul.f32 0.5, %v87_v2  ;;  %v123_v21 = vmul.f32 %v218_v10, %v115_v11 }
 0x10b   :  { %v109_v7 = vsub.f32 1.5, %v108_v4  ;;  %v125_v18 = vmul.f32 %v218_v10, %v117_v8 }
 0x10c   :  { %v89_v9 = vsub.f32 1.5, %v88_v6  ;;  %v131_v25 = vadd.f32 %v219_v17, %v123_v21 }
 0x10d   :  { %v110_v12 = vmul.f32 %v227_v58, %v109_v7  ;;  %v133_v23 = vadd.f32 %v219_v17, %v125_v18 }
 0x10e   :  { %v90_v13 = vmul.f32 %v229_v60, %v89_v9 }
 0x10f   :  { %v114_v14 = vsel %vm113_vm11, %v227_v58, %v110_v12 }
 0x110   :  { %v118_v15 = vmul.f32 %v114_v14, %v311_v29  ;;  %v94_v16 = vsel %vm93_vm13, %v229_v60, %v90_v13 }
 0x111   :  { %v116_v19 = vmul.f32 %v94_v16, %v313_v30 }
 0x112   :  { %v126_v22 = vmul.f32 %v218_v10, %v118_v15 }
 0x113   :  { %v124_v20 = vmul.f32 %v218_v10, %v116_v19 }
 0x114   :  { %v134_v24 = vadd.f32 %v219_v17, %v126_v22 }
 0x115   :  { %v132_v26 = vadd.f32 %v219_v17, %v124_v20 }
 0x116   :  { %v136_v27 = vpack.c.bf16 %v134_v24, %v133_v23 }
 0x117   :  { %v135_v28 = vpack.c.bf16 %v132_v26, %v131_v25 }
 0x118   :  { %209 = vmatmul.msk.bf16.vlgmr.msra.gmra.mxu1 %vm23_vm0, %v136_v27 }
 0x119   :  { %208 = vmatmul.msk.bf16.vlgmr.msra.gmra.mxu0 %vm23_vm0, %v135_v28 }
 0x195   :  { %v173_v29 = vpop.f32.mrf.mxu1 }
 0x196   :  { %v168_v31 = vpop.f32.mrf.mxu0  ;;  %180 = vst [vmem:[#allocation2 + $0x10] sm:$0xff] %v173_v29 }
 0x197   :  { %178 = vst [vmem:[#allocation2] sm:$0xff] %v168_v31 }
 0x19d   :  { %v175_v30 = vpop.f32.mrf.mxu1 }
 0x19e   :  { %v170_v32 = vpop.f32.mrf.mxu0  ;;  %181 = vst [vmem:[#allocation2 + $0x18] sm:$0xff] %v175_v30 }
 0x19f   :  { %179 = vst [vmem:[#allocation2 + $0x8] sm:$0xff] %v170_v32 }
 0x1a0   :  { %194 = dma.vmem_to_hbm [thread:$0]  %s187_s2, 512, %s189_s5, [#allocation3], %s258_s6, %s258_s6, %s259_s7  }
 0x1a1   :  { %254 = dma.done.wait [#allocation3], 512  }
 0x1a2   :  { %255 = vsyncadd [#allocation3], 4294966784 }
 0x1a3   :  { %199 = vsyncpa [#allocation3], 1 }

// kernel: hybrid_blip2_flamingo_forward.21
= control target key start
LH: loop header
LB: loop body
LE: loop exit
PB: predicated region body
PF: predicated region fallthrough
CT: control target
= control target key end

     0   :  { %s1520_s29 = smov 0   ;;  %s1702_s0 = inlined_call_operand.vmem [shape: f32[2,16,32], index: 0, kind: input, shape index: {}]   ;;  %s1703_s1 = inlined_call_operand.vmem [shape: f32[2,8,32], index: 1, kind: input, shape index: {}]   ;;  %s1704_s2 = inlined_call_operand.vmem [shape: bf16[32,96], index: 2, kind: input, shape index: {}]   ;;  %s1705_s3 = inlined_call_operand.vmem [shape: f32[1,96], index: 3, kind: input, shape index: {}]   ;;  %s1706_s4 = inlined_call_operand.vmem [shape: bf16[32,32], index: 4, kind: input, shape index: {}]   ;;  %s1707_s5 = inlined_call_operand.vmem [shape: f32[1,32], index: 5, kind: input, shape index: {}]   ;;  %s1708_s6 = inlined_call_operand.vmem [shape: f32[1,32], index: 6, kind: input, shape index: {}]   ;;  %s1709_s7 = inlined_call_operand.vmem [shape: f32[1,32], index: 7, kind: input, shape index: {}]   ;;  %s1710_s8 = inlined_call_operand.vmem [shape: bf16[32,128], index: 8, kind: input, shape index: {}]   ;;  %s1711_s9 = inlined_call_operand.vmem [shape: f32[1,128], index: 9, kind: input, shape index: {}]   ;;  %s1712_s10 = inlined_call_operand.vmem [shape: bf16[128,32], index: 10, kind: input, shape index: {}]   ;;  %s1713_s11 = inlined_call_operand.vmem [shape: f32[1,32], index: 11, kind: input, shape index: {}]   ;;  %s1714_s12 = inlined_call_operand.vmem [shape: f32[1,32], index: 12, kind: input, shape index: {}]   ;;  %s1715_s13 = inlined_call_operand.vmem [shape: f32[1,32], index: 13, kind: input, shape index: {}]   ;;  %s1716_s14 = inlined_call_operand.vmem [shape: f32[2,16,32], index: 14, kind: output, shape index: {}]  }
   0x1 LB: > { %s1234_s30 = sadd.s32 4294967295, %s1428_s29   ;;  %p1238_p0 = scmp.ge.s32.totalorder %s1428_s29, 1  ;;  %s1428_s29 = sphi %s1520_s29, %s24_s29  }
   0x2   : > { %p421_p1 = scmp.lt.s32.totalorder %s1428_s29, 3 }
   0x4   : > { %p422_p2 = pnand %p1238_p0, %p421_p1 }
   0x5   : > { %p471_p3 = scmp.lt.s32.totalorder (!%p422_p2), %s1234_s30, 1  ;;  %s1430_s15 = smov (!%p422_p2), 72  }
   0x6   : > { %425 = sbr.rel (%p422_p2) target bundleno = 1964 (0x7ac), region = 76  ;;  %s1431_s16 = smov (!%p422_p2), 96  }
   0x7   : > { %s1432_s17 = smov (!%p422_p2), 120   ;;  %s1433_s18 = smov (!%p422_p2), 88  }
   0x8   : > { %s1435_s21 = smov (!%p422_p2), 80   ;;  %s1436_s22 = smov (!%p422_p2), 104  }
   0x9   : > { %s1438_s24 = smov (!%p422_p2), 56   ;;  %s1439_s25 = smov (!%p422_p2), 48  }
   0xa   : > { %s1441_s27 = smov (!%p422_p2), 8   ;;  %s1442_s28 = smov (!%p422_p2), 16  }
   0xb   : > { %v1317_v0 = vld [vmem:[%s1704_s2 + $0x8] sm:$0xff]  ;;  %v1316_v1 = vld [vmem:[%s1704_s2] sm:$0xff]  ;;  %s1718_s30 = smov (!%p471_p3, %s1234_s30), 1  ;;  %vm511_vm0 = vcmask 261120   ;;  %vm550_vm1 = vcmask 64512   ;;  %vm601_vm2 = vcmask 1043456  }
   0xc   : > { %521 = vmatpush.bf16.msra.mxu0 %v1317_v0  ;;  %538 = vmatpush.bf16.msra.mxu1 %v1317_v0  ;;  %s1314_s19 = sshll.u32 %s1718_s30, 4  ;;  %s1241_s20 = sshll.u32 %s1718_s30, 3  ;;  %v1368_v7 = vld [vmem:[%s1705_s3] ss:$0 sm:$0xff]  ;;  %vm859_vm3 = vcmask 130048   ;;  %vm862_vm4 = vcmask 195584  }
   0xd   : > { %s475_s23 = scalar_lea.vmem %s1702_s0, %s1314_s19  ;;  %s479_s26 = scalar_lea.vmem %s1703_s1, %s1241_s20 }
   0xe   : > { %v1543_v2 = vld [vmem:[%s475_s23] sm:$0xff]  ;;  %v1545_v3 = vld [vmem:[%s475_s23 + $0x8] sm:$0xff]  ;;  %s1434_s20 = smov 112   ;;  %s1437_s23 = smov 64  }
   0xf   : > { %v488_v4 = vpack.c.bf16 %v1545_v3, %v1543_v2  ;;  %v489_v5 = vld [vmem:[%s479_s26] sm:$0xff]  ;;  %s1440_s26 = smov 40  }
  0x10   : > { %522 = vmatpush.bf16.msra.mxu0 %v1316_v1  ;;  %539 = vmatpush.bf16.msra.mxu1 %v1316_v1  ;;  %v490_v6 = vpack.c.bf16 %v489_v5, %v489_v5 }
  0x13   : > { %1252 = vmatmul.msk.bf16.vlgmr.msra.gmra.mxu0 %vm511_vm0, %v488_v4  ;;  %1253 = vmatmul.msk.bf16.vlgmr.msra.gmra.mxu1 %vm511_vm0, %v490_v6 }
  0x90   : > { %v524_v8 = vpop.f32.mrf.mxu0  ;;  %v541_v9 = vpop.f32.mrf.mxu1 }
  0x91   : > { %v542_v10 = vadd.f32 %v1368_v7, %v541_v9  ;;  %v525_v13 = vadd.f32 %v1368_v7, %v524_v8 }
  0x93   : > { %v1557_v11 = vpack.c.bf16 %v542_v10, %v542_v10 }
  0x95   : > { %764 = vrot.lane.b32.xlu2 %v1557_v11, %s1430_s15  ;;  %548 = vrot.lane.b32.xlu0 %v1557_v11, %s1431_s16  ;;  %s1443_s15 = smov 24  }
  0x98   : > { %v526_v12 = vpop.f32.mrf.mxu0  ;;  %v543_v15 = vpop.f32.mrf.mxu1 }
  0x99   : > { %v527_v14 = vadd.f32 %v1368_v7, %v526_v12 }
  0x9b   : > { %v545_v16 = vpack.c.bf16 %v527_v14, %v525_v13 }
  0x9d   : > { %620 = vrot.lane.b32.xlu1 %v545_v16, %s1432_s17  ;;  %622 = vrot.lane.b32.xlu0 %v1557_v11, %s1433_s18  ;;  %s484_s17 = scalar_lea.vmem %s1716_s14, %s1314_s19 }
  0x9e   : > { %691 = vrot.lane.b32.xlu2 %v545_v16, %s1434_s20 }
  0xa5   : > { %693 = vrot.lane.b32.xlu1 %v1557_v11, %s1435_s21  ;;  %762 = vrot.lane.b32.xlu0 %v545_v16, %s1436_s22 }
  0xef   : > { %v765_v21 = vpop.permute.xlu2 %764 }
  0xf0   : > { %v770_v23 = vsel %vm550_vm1, %v765_v21, 0 }
  0xf8   : > { %v692_v26 = vpop.permute.xlu2 %691 }
 0x107   : > { %v549_v17 = vpop.permute.xlu0 %548 }
 0x108   : > { %v555_v18 = vsel %vm550_vm1, %v549_v17, 0 }
 0x109   : > { %564 = vmatpush.bf16.xpose.msra.mxu2 %v555_v18 }
 0x10f   : > { %v621_v19 = vpop.permute.xlu1 %620  ;;  %v623_v20 = vpop.permute.xlu0 %622 }
 0x110   : > { %1254 = vmatmul.msk.bf16.vlgmr.msra.gmra.mxu2 %vm550_vm1, %v545_v16  ;;  %v628_v22 = vsel %vm550_vm1, %v623_v20, 0 }
 0x111   : > { %637 = vmatpush.bf16.xpose.msra.mxu3 %v628_v22 }
 0x117   : > { %v694_v24 = vpop.permute.xlu1 %693  ;;  %v763_v27 = vpop.permute.xlu0 %762 }
 0x118   : > { %v699_v25 = vsel %vm550_vm1, %v694_v24, 0  ;;  %1256 = vmatmul.msk.bf16.vlgmr.msra.gmra.mxu3 %vm550_vm1, %v621_v19 }
 0x119   : > { %779 = vmatpush.bf16.xpose.msrb.mxu3 %v770_v23  ;;  %708 = vmatpush.bf16.xpose.msrb.mxu1 %v699_v25 }
 0x120   : > { %1258 = vmatmul.msk.bf16.vlgmr.msrb.gmra.mxu1 %vm550_vm1, %v692_v26 }
 0x128   : > { %1260 = vmatmul.msk.bf16.vlgmr.msrb.gmra.mxu3 %vm550_vm1, %v763_v27 }
 0x193   : > { %v566_v28 = vpop.f32.mrf.mxu2 }
 0x194   : > { %v571_v29 = vmul.f32 0.35355338, %v566_v28 }
 0x196   : > { %v573_v30 = vsel %vm550_vm1, %v571_v29, -inf }
 0x197   : > { %574 = vmax.xlane.f32.xlu1 %v573_v30 }
 0x19b   : > { %v639_v31 = vpop.f32.mrf.mxu3  ;;  %v568_v41 = vpop.f32.mrf.mxu2 }
 0x19c   : > { %v644_v32 = vmul.f32 0.35355338, %v639_v31  ;;  %v572_v42 = vmul.f32 0.35355338, %v568_v41 }
 0x19d   : > { %v710_v33 = vpop.f32.mrf.mxu1 }
 0x19e   : > { %v715_v34 = vmul.f32 0.35355338, %v710_v33  ;;  %v646_v35 = vsel %vm550_vm1, %v644_v32, -inf  ;;  %v576_v46 = vsel %vm550_vm1, %v572_v42, -inf }
 0x19f   : > { %647 = vmax.xlane.f32.xlu0 %v646_v35 }
 0x1a0   : > { %v717_v36 = vsel %vm550_vm1, %v715_v34, -inf }
 0x1a1   : > { %718 = vmax.xlane.f32.xlu1 %v717_v36 }
 0x1a3   : > { %v641_v37 = vpop.f32.mrf.mxu3 }
 0x1a4   : > { %v645_v47 = vmul.f32 0.35355338, %v641_v37 }
 0x1a5   : > { %v712_v38 = vpop.f32.mrf.mxu1 }
 0x1a6   : > { %v716_v39 = vmul.f32 0.35355338, %v712_v38  ;;  %v649_v51 = vsel %vm550_vm1, %v645_v47, -inf }
 0x1a8   : > { %v720_v40 = vsel %vm550_vm1, %v716_v39, -inf }
 0x1a9   : > { %721 = vmax.xlane.f32.xlu2 %v720_v40 }
 0x1ab   : > { %v781_v43 = vpop.f32.mrf.mxu3 }
 0x1ac   : > { %v786_v44 = vmul.f32 0.35355338, %v781_v43 }
 0x1ae   : > { %v788_v45 = vsel %vm550_vm1, %v786_v44, -inf }
 0x1af   : > { %789 = vmax.xlane.f32.xlu0 %v788_v45 }
 0x1b1   : > { %577 = vmax.xlane.f32.xlu2 %v576_v46 }
 0x1b3   : > { %v783_v48 = vpop.f32.mrf.mxu3 }
 0x1b4   : > { %v787_v49 = vmul.f32 0.35355338, %v783_v48 }
 0x1b6   : > { %v791_v50 = vsel %vm550_vm1, %v787_v49, -inf }
 0x1b7   : > { %792 = vmax.xlane.f32.xlu1 %v791_v50 }
 0x1b9   : > { %650 = vmax.xlane.f32.xlu2 %v649_v51 }
 0x1d0   : > { %596 = vrot.lane.b32.xlu1 %v1557_v11, %s1437_s23 }
 0x1d1   : > { %669 = vrot.lane.b32.xlu2 %v1557_v11, %s1438_s24 }
 0x20a   : > { %v575_v52 = vpop.xlane.xlu1 %574 }
 0x20b   : > { %v579_v53 = vsub.f32 %v571_v29, %v575_v52 }
 0x20d   : > { %v581_v54 = vmul.f32 1.442695, %v579_v53 }
 0x20f   : > { %1376 = vpow2.f32 %v581_v54 }
 0x212   : > { %v648_v55 = vpop.xlane.xlu0 %647 }
 0x213   : > { %v652_v56 = vsub.f32 %v644_v32, %v648_v55 }
 0x214   : > { %v719_v57 = vpop.xlane.xlu1 %718 }
 0x215   : > { %v723_v58 = vsub.f32 %v715_v34, %v719_v57  ;;  %v1581_v59 = vpop.eup %1376  ;;  %v654_v60 = vmul.f32 1.442695, %v652_v56 }
 0x216   : > { %v585_v62 = vsel %vm550_vm1, %v1581_v59, 0.0 }
 0x217   : > { %v725_v61 = vmul.f32 1.442695, %v723_v58  ;;  %1378 = vpow2.f32 %v654_v60  ;;  %586 = vadd.xlane.f32.xlu2 %v585_v62 }
 0x219   : > { %1380 = vpow2.f32 %v725_v61 }
 0x21c   : > { %v722_v63 = vpop.xlane.xlu2 %721 }
 0x21d   : > { %v724_v0 = vsub.f32 %v716_v39, %v722_v63  ;;  %v1585_v1 = vpop.eup %1378 }
 0x21e   : > { %v658_v6 = vsel %vm550_vm1, %v1585_v1, 0.0 }
 0x21f   : > { %v1381_v4 = vpop.eup %1380  ;;  %v727_v5 = vmul.f32 1.442695, %v724_v0  ;;  %659 = vadd.xlane.f32.xlu2 %v658_v6 }
 0x220   : > { %v729_v7 = vsel %vm550_vm1, %v1381_v4, 0.0 }
 0x221   : > { %1382 = vpow2.f32 %v727_v5  ;;  %730 = vadd.xlane.f32.xlu0 %v729_v7 }
 0x222   : > { %v790_v8 = vpop.xlane.xlu0 %789 }
 0x223   : > { %v794_v9 = vsub.f32 %v786_v44, %v790_v8 }
 0x224   : > { %v578_v10 = vpop.xlane.xlu2 %577 }
 0x225   : > { %v580_v12 = vsub.f32 %v572_v42, %v578_v10  ;;  %v796_v13 = vmul.f32 1.442695, %v794_v9 }
 0x227   : > { %v1383_v14 = vpop.eup %1382  ;;  %v583_v15 = vmul.f32 1.442695, %v580_v12  ;;  %1384 = vpow2.f32 %v796_v13 }
 0x228   : > { %v732_v16 = vsel %vm550_vm1, %v1383_v14, 0.0 }
 0x229   : > { %1386 = vpow2.f32 %v583_v15  ;;  %733 = vadd.xlane.f32.xlu0 %v732_v16  ;;  %v1319_v16 = vld [vmem:[%s1706_s4 + $0x8] sm:$0xff] }
 0x22a   : > { %v793_v17 = vpop.xlane.xlu1 %792  ;;  %895 = vmatpush.bf16.msra.mxu1 %v1319_v16  ;;  %v1370_v16 = vld [vmem:[%s1708_s6] ss:$0 sm:$0xff] }
 0x22b   : > { %v795_v22 = vsub.f32 %v787_v49, %v793_v17  ;;  %v1318_v17 = vld [vmem:[%s1706_s4] sm:$0xff] }
 0x22c   : > { %v651_v18 = vpop.xlane.xlu2 %650 }
 0x22d   : > { %v653_v19 = vsub.f32 %v645_v47, %v651_v18  ;;  %v1591_v20 = vpop.eup %1384  ;;  %v798_v26 = vmul.f32 1.442695, %v795_v22 }
 0x22e   : > { %v800_v24 = vsel %vm550_vm1, %v1591_v20, 0.0  ;;  %896 = vmatpush.bf16.msra.mxu1 %v1318_v17 }
 0x22f   : > { %v1387_v21 = vpop.eup %1386  ;;  %v656_v23 = vmul.f32 1.442695, %v653_v19  ;;  %801 = vadd.xlane.f32.xlu1 %v800_v24 }
 0x230   : > { %v588_v25 = vsel %vm550_vm1, %v1387_v21, 0.0 }
 0x231   : > { %1388 = vpow2.f32 %v656_v23  ;;  %589 = vadd.xlane.f32.xlu0 %v588_v25 }
 0x232   : > { %1390 = vpow2.f32 %v798_v26 }
 0x234   : > { %v670_v31 = vpop.permute.xlu2 %669 }
 0x235   : > { %v675_v34 = vsel %vm601_vm2, %v670_v31, 0 }
 0x237   : > { %v1389_v27 = vpop.eup %1388  ;;  %740 = vrot.lane.b32.xlu2 %v1557_v11, %s1439_s25 }
 0x238   : > { %v661_v28 = vsel %vm550_vm1, %v1389_v27, 0.0  ;;  %v1391_v29 = vpop.eup %1390 }
 0x239   : > { %662 = vadd.xlane.f32.xlu0 %v661_v28  ;;  %v803_v30 = vsel %vm550_vm1, %v1391_v29, 0.0 }
 0x241   : > { %804 = vadd.xlane.f32.xlu0 %v803_v30 }
 0x242   : > { %v597_v32 = vpop.permute.xlu1 %596 }
 0x243   : > { %v603_v33 = vsel %vm601_vm2, %v597_v32, 0 }
 0x244   : > { %612 = vmatpush.bf16.msrb.mxu0 %v603_v33 }
 0x248   : > { %684 = vmatpush.bf16.msra.mxu0 %v675_v34  ;;  %v1369_v34 = vld [vmem:[%s1707_s5] ss:$0 sm:$0xff] }
 0x255   : > { %811 = vrot.lane.b32.xlu0 %v1557_v11, %s1440_s26 }
 0x28a   : > { %v587_v35 = vpop.xlane.xlu2 %586 }
 0x292   : > { %v660_v36 = vpop.xlane.xlu2 %659 }
 0x294   : > { %v731_v37 = vpop.xlane.xlu0 %730 }
 0x295   : > { %1392 = vrcp.f32 %v731_v37 }
 0x29a   : > { %v741_v38 = vpop.permute.xlu2 %740 }
 0x29b   : > { %v746_v40 = vsel %vm601_vm2, %v741_v38, 0  ;;  %v1393_v41 = vpop.eup %1392 }
 0x29c   : > { %v734_v39 = vpop.xlane.xlu0 %733  ;;  %755 = vmatpush.bf16.msrb.mxu2 %v746_v40  ;;  %v737_v43 = vmul.f32 %v1393_v41, %v1381_v4 }
 0x29d   : > { %1394 = vrcp.f32 %v734_v39 }
 0x29e   : > { %1396 = vrcp.f32 %v587_v35 }
 0x2a2   : > { %v802_v58 = vpop.xlane.xlu1 %801 }
 0x2a3   : > { %v1395_v42 = vpop.eup %1394 }
 0x2a4   : > { %v738_v44 = vmul.f32 %v1395_v42, %v1383_v14  ;;  %v590_v45 = vpop.xlane.xlu0 %589  ;;  %v1397_v11 = vpop.eup %1396 }
 0x2a5   : > { %1398 = vrcp.f32 %v590_v45  ;;  %v593_v48 = vmul.f32 %v1397_v11, %v1581_v59 }
 0x2a6   : > { %v739_v46 = vpack.c.bf16 %v738_v44, %v737_v43  ;;  %v1444_v43 = vmov 32.0  }
 0x2a8   : > { %1259 = vmatmul.msk.bf16.vlgmr.msrb.gmra.mxu2 %vm550_vm1, %v739_v46 }
 0x2ab   : > { %v1399_v47 = vpop.eup %1398 }
 0x2ac   : > { %v594_v49 = vmul.f32 %v1399_v47, %v1387_v21  ;;  %v663_v50 = vpop.xlane.xlu0 %662 }
 0x2ad   : > { %1400 = vrcp.f32 %v663_v50 }
 0x2ae   : > { %v595_v51 = vpack.c.bf16 %v594_v49, %v593_v48  ;;  %1402 = vrcp.f32 %v660_v36 }
 0x2b0   : > { %1255 = vmatmul.msk.bf16.vlgmr.msrb.gmra.mxu0 %vm550_vm1, %v595_v51 }
 0x2b3   : > { %v1401_v52 = vpop.eup %1400 }
 0x2b4   : > { %v1403_v53 = vpop.eup %1402  ;;  %v667_v54 = vmul.f32 %v1401_v52, %v1389_v27  ;;  %v805_v57 = vpop.xlane.xlu0 %804 }
 0x2b5   : > { %v666_v55 = vmul.f32 %v1403_v53, %v1585_v1  ;;  %1404 = vrcp.f32 %v805_v57  ;;  %v1321_v57 = vld [vmem:[%s1710_s8 + $0x8] sm:$0xff] }
 0x2b6   : > { %1406 = vrcp.f32 %v802_v58  ;;  %998 = vmatpush.bf16.msra.mxu2 %v1321_v57  ;;  %v1373_v57 = vld [vmem:[%s1713_s11] ss:$0 sm:$0xff] }
 0x2b7   : > { %v668_v56 = vpack.c.bf16 %v667_v54, %v666_v55  ;;  %1408 = vrcp.f32 %v1444_v43 }
 0x2bb   : > { %v1405_v59 = vpop.eup %1404 }
 0x2bc   : > { %v1407_v62 = vpop.eup %1406  ;;  %v809_v63 = vmul.f32 %v1405_v59, %v1391_v29 }
 0x2bd   : > { %v808_v0 = vmul.f32 %v1407_v62, %v1591_v20  ;;  %v1409_v44 = vpop.eup %1408 }
 0x2be   : > { %v914_v45 = vmul.f32 32.0, %v1409_v44  ;;  %vm918_vm5 = vweird.f32 %v1409_v44 }
 0x2bf   : > { %v810_v4 = vpack.c.bf16 %v809_v63, %v808_v0 }
 0x2c0   : > { %1257 = vmatmul.msk.bf16.vlgmr.msra.gmra.mxu0 %vm550_vm1, %v668_v56  ;;  %v915_v46 = vsub.f32 1.0, %v914_v45 }
 0x2c2   : > { %v916_v11 = vmul.f32 %v1409_v44, %v915_v46 }
 0x2c4   : > { %v917_v47 = vadd.f32 %v1409_v44, %v916_v11 }
 0x2c6   : > { %v1627_v48 = vsel %vm918_vm5, %v1409_v44, %v917_v47 }
 0x2c7   : > { %v812_v60 = vpop.permute.xlu0 %811 }
 0x2c8   : > { %v817_v61 = vsel %vm601_vm2, %v812_v60, 0 }
 0x2c9   : > { %826 = vmatpush.bf16.msrb.mxu0 %v817_v61  ;;  %v1320_v61 = vld [vmem:[%s1710_s8] sm:$0xff] }
 0x2ca   : > { %999 = vmatpush.bf16.msra.mxu2 %v1320_v61 }
 0x2d0   : > { %1261 = vmatmul.msk.bf16.vlgmr.msrb.gmra.mxu0 %vm550_vm1, %v810_v4 }
 0x32b   : > { %v757_v7 = vpop.f32.mrf.mxu2 }
 0x32d   : > { %v614_v1 = vpop.f32.mrf.mxu0 }
 0x333   : > { %v759_v10 = vpop.f32.mrf.mxu2 }
 0x334   : > { %v1358_v13 = vpack.i.bf16 %v759_v10, %v757_v7 }
 0x335   : > { %v616_v5 = vpop.f32.mrf.mxu0 }
 0x33d   : > { %v686_v6 = vpop.f32.mrf.mxu0 }
 0x345   : > { %v688_v8 = vpop.f32.mrf.mxu0 }
 0x346   : > { %v1353_v9 = vpack.i.bf16 %v688_v8, %v686_v6 }
 0x348   : > { %1354 = vrot.lane.b32.xlu2 %v1353_v9, %s1441_s27 }
 0x34d   : > { %v828_v12 = vpop.f32.mrf.mxu0 }
 0x350   : > { %1359 = vrot.lane.b32.xlu2 %v1358_v13, %s1442_s28 }
 0x355   : > { %v830_v14 = vpop.f32.mrf.mxu0 }
 0x356   : > { %v1363_v15 = vpack.i.bf16 %v830_v14, %v828_v12 }
 0x358   : > { %1364 = vrot.lane.b32.xlu0 %v1363_v15, %s1443_s15 }
 0x3a2   : > { %v1355_v18 = vpop.permute.xlu2 %1354 }
 0x3a3   : > { %v1357_v20 = vunpack.i.h.bf16 %v1355_v18  ;;  %v1356_v21 = vunpack.i.l.bf16 %v1355_v18 }
 0x3a5   : > { %v858_v25 = vsel %vm550_vm1, %v616_v5, %v1357_v20  ;;  %v857_v26 = vsel %vm550_vm1, %v614_v1, %v1356_v21  ;;  %v1371_v20 = vld [vmem:[%s1709_s7] ss:$0 sm:$0xff] }
 0x3aa   : > { %v1360_v19 = vpop.permute.xlu2 %1359 }
 0x3ab   : > { %v1362_v22 = vunpack.i.h.bf16 %v1360_v19  ;;  %v1361_v23 = vunpack.i.l.bf16 %v1360_v19 }
 0x3ad   : > { %v860_v29 = vsel %vm859_vm3, %v857_v26, %v1361_v23  ;;  %v861_v30 = vsel %vm859_vm3, %v858_v25, %v1362_v22 }
 0x3ca   : > { %v1365_v24 = vpop.permute.xlu0 %1364 }
 0x3cb   : > { %v1367_v27 = vunpack.i.h.bf16 %v1365_v24  ;;  %v1366_v28 = vunpack.i.l.bf16 %v1365_v24 }
 0x3cd   : > { %v863_v31 = vsel %vm862_vm4, %v860_v29, %v1366_v28  ;;  %v864_v32 = vsel %vm862_vm4, %v861_v30, %v1367_v27  ;;  %v1329_v27 = vld [vmem:[%s1712_s10 + $0x38] sm:$0xff]  ;;  %v1328_v28 = vld [vmem:[%s1712_s10 + $0x30] sm:$0xff]  ;;  %v1327_v29 = vld [vmem:[%s1712_s10 + $0x28] sm:$0xff] }
 0x3ce   : > { %v865_v33 = vpack.c.bf16 %v864_v32, %v863_v31  ;;  %1093 = vmatpush.bf16.msra.mxu3 %v1329_v27  ;;  %v1326_v30 = vld [vmem:[%s1712_s10 + $0x20] sm:$0xff]  ;;  %v1325_v31 = vld [vmem:[%s1712_s10 + $0x18] sm:$0xff]  ;;  %v1324_v32 = vld [vmem:[%s1712_s10 + $0x10] sm:$0xff] }
 0x3d0   : > { %1270 = vmatmul.msk.bf16.vlgmr.msra.gmra.mxu1 %vm511_vm0, %v865_v33  ;;  %v1323_v33 = vld [vmem:[%s1712_s10 + $0x8] sm:$0xff] }
 0x3d2   : > { %1094 = vmatpush.bf16.msra.mxu3 %v1328_v28 }
 0x3d6   : > { %1095 = vmatpush.bf16.msra.mxu3 %v1327_v29  ;;  %v1374_v29 = vld [vmem:[%s1714_s12] ss:$0 sm:$0xff] }
 0x3da   : > { %1096 = vmatpush.bf16.msra.mxu3 %v1326_v30 }
 0x3de   : > { %1097 = vmatpush.bf16.msra.mxu3 %v1325_v31  ;;  %v1375_v31 = vld [vmem:[%s1715_s13] ss:$0 sm:$0xff] }
 0x3e2   : > { %1098 = vmatpush.bf16.msra.mxu3 %v1324_v32 }
 0x3e6   : > { %1099 = vmatpush.bf16.msra.mxu3 %v1323_v33 }
 0x44d   : > { %v898_v35 = vpop.f32.mrf.mxu1 }
 0x44e   : > { %v899_v36 = vadd.f32 %v1369_v34, %v898_v35 }
 0x450   : > { %v903_v37 = vadd.f32 %v899_v36, %v1543_v2  ;;  %v1322_v36 = vld [vmem:[%s1712_s10] sm:$0xff] }
 0x451   : > { %1100 = vmatpush.bf16.msra.mxu3 %v1322_v36 }
 0x452   : > { %v907_v38 = vsel %vm511_vm0, %v903_v37, 0.0 }
 0x453   : > { %908 = vadd.xlane.f32.xlu2 %v907_v38 }
 0x455   : > { %v900_v39 = vpop.f32.mrf.mxu1 }
 0x456   : > { %v901_v40 = vadd.f32 %v1369_v34, %v900_v39  ;;  %v1372_v34 = vld [vmem:[%s1711_s9] ss:$0 sm:$0xff] }
 0x458   : > { %v904_v41 = vadd.f32 %v901_v40, %v1545_v3 }
 0x45a   : > { %v910_v42 = vsel %vm511_vm0, %v904_v41, 0.0 }
 0x45b   : > { %911 = vadd.xlane.f32.xlu1 %v910_v42 }
 0x4c6   : > { %v909_v2 = vpop.xlane.xlu2 %908 }
 0x4c7   : > { %v920_v49 = vmul.f32 %v1627_v48, %v909_v2 }
 0x4c9   : > { %v922_v50 = vsub.f32 %v903_v37, %v920_v49 }
 0x4cb   : > { %v924_v51 = vmul.f32 %v922_v50, %v922_v50 }
 0x4cd   : > { %v926_v3 = vsel %vm511_vm0, %v924_v51, 0.0 }
 0x4ce   : > { %v912_v52 = vpop.xlane.xlu1 %911  ;;  %927 = vadd.xlane.f32.xlu0 %v926_v3 }
 0x4cf   : > { %v921_v53 = vmul.f32 %v1627_v48, %v912_v52 }
 0x4d1   : > { %v923_v54 = vsub.f32 %v904_v41, %v921_v53 }
 0x4d3   : > { %v925_v55 = vmul.f32 %v923_v54, %v923_v54 }
 0x4d5   : > { %v929_v56 = vsel %vm511_vm0, %v925_v55, 0.0 }
 0x4d6   : > { %930 = vadd.xlane.f32.xlu1 %v929_v56 }
 0x541   : > { %v928_v58 = vpop.xlane.xlu0 %927 }
 0x542   : > { %v932_v59 = vmul.f32 %v928_v58, %v1627_v48 }
 0x544   : > { %v934_v60 = vadd.f32 1e-05, %v932_v59 }
 0x546   : > { %1410 = vrsqrt.f32 %v934_v60  ;;  %vm942_vm7 = vweird.f32 %v934_v60 }
 0x549   : > { %v931_v62 = vpop.xlane.xlu1 %930 }
 0x54a   : > { %v933_v63 = vmul.f32 %v931_v62, %v1627_v48 }
 0x54c   : > { %v1411_v0 = vpop.eup %1410  ;;  %v935_v4 = vadd.f32 1e-05, %v933_v63 }
 0x54d   : > { %v937_v1 = vmul.f32 %v1411_v0, %v934_v60  ;;  %vm943_vm6 = vweird.f32 %v1411_v0 }
 0x54e   : > { %1412 = vrsqrt.f32 %v935_v4  ;;  %vm944_vm8 = vmor %vm942_vm7, %vm943_vm6  ;;  %vm952_vm10 = vweird.f32 %v935_v4 }
 0x54f   : > { %v938_v5 = vmul.f32 %v1411_v0, %v937_v1 }
 0x551   : > { %v939_v6 = vmul.f32 0.5, %v938_v5 }
 0x553   : > { %v940_v7 = vsub.f32 1.5, %v939_v6 }
 0x554   : > { %v1413_v8 = vpop.eup %1412 }
 0x555   : > { %v941_v9 = vmul.f32 %v1411_v0, %v940_v7  ;;  %v947_v10 = vmul.f32 %v1413_v8, %v935_v4  ;;  %vm953_vm9 = vweird.f32 %v1413_v8 }
 0x556   : > { %vm954_vm11 = vmor %vm952_vm10, %vm953_vm9 }
 0x557   : > { %v948_v12 = vmul.f32 %v1413_v8, %v947_v10  ;;  %v945_v13 = vsel %vm944_vm8, %v1411_v0, %v941_v9 }
 0x558   : > { %v956_v17 = vmul.f32 %v945_v13, %v922_v50 }
 0x559   : > { %v949_v14 = vmul.f32 0.5, %v948_v12 }
 0x55a   : > { %v961_v21 = vmul.f32 %v1370_v16, %v956_v17 }
 0x55b   : > { %v950_v15 = vsub.f32 1.5, %v949_v14 }
 0x55c   : > { %v966_v24 = vadd.f32 %v1371_v20, %v961_v21 }
 0x55d   : > { %v951_v18 = vmul.f32 %v1413_v8, %v950_v15 }
 0x55f   : > { %v955_v19 = vsel %vm954_vm11, %v1413_v8, %v951_v18 }
 0x560   : > { %v957_v22 = vmul.f32 %v955_v19, %v923_v54 }
 0x562   : > { %v962_v23 = vmul.f32 %v1370_v16, %v957_v22 }
 0x564   : > { %v967_v25 = vadd.f32 %v1371_v20, %v962_v23 }
 0x566   : > { %v968_v26 = vpack.c.bf16 %v967_v25, %v966_v24 }
 0x568   : > { %1279 = vmatmul.msk.bf16.vlgmr.msra.gmra.mxu2 %vm511_vm0, %v968_v26 }
 0x5eb   : > { %v1001_v35 = vpop.f32.mrf.mxu2 }
 0x5ec   : > { %v1002_v37 = vadd.f32 %v1372_v34, %v1001_v35 }
 0x5ee   : > { %v1006_v38 = vmul.f32 %v1002_v37, %v1002_v37 }
 0x5f0   : > { %v1008_v39 = vmul.f32 %v1006_v38, %v1002_v37 }
 0x5f2   : > { %v1010_v40 = vmul.f32 0.044715, %v1008_v39 }
 0x5f3   : > { %v1003_v41 = vpop.f32.mrf.mxu2 }
 0x5f4   : > { %v1012_v42 = vadd.f32 %v1010_v40, %v1002_v37  ;;  %v1004_v43 = vadd.f32 %v1372_v34, %v1003_v41 }
 0x5f6   : > { %v1014_v44 = vmul.f32 0.7978846, %v1012_v42  ;;  %v1007_v45 = vmul.f32 %v1004_v43, %v1004_v43 }
 0x5f8   : > { %v1009_v46 = vmul.f32 %v1007_v45, %v1004_v43  ;;  %1414 = vtanh.f32 %v1014_v44 }
 0x5fa   : > { %v1011_v11 = vmul.f32 0.044715, %v1009_v46 }
 0x5fc   : > { %v1013_v47 = vadd.f32 %v1011_v11, %v1004_v43 }
 0x5fe   : > { %v1015_v2 = vmul.f32 0.7978846, %v1013_v47  ;;  %v1415_v49 = vpop.eup %1414 }
 0x5ff   : > { %v1018_v50 = vadd.f32 1.0, %v1415_v49 }
 0x600   : > { %1416 = vtanh.f32 %v1015_v2 }
 0x601   : > { %v1020_v3 = vmul.f32 0.5, %v1018_v50 }
 0x603   : > { %v1022_v54 = vmul.f32 %v1020_v3, %v1002_v37 }
 0x606   : > { %v1417_v51 = vpop.eup %1416 }
 0x607   : > { %v1019_v52 = vadd.f32 1.0, %v1417_v51 }
 0x609   : > { %v1021_v53 = vmul.f32 0.5, %v1019_v52 }
 0x60b   : > { %v1023_v55 = vmul.f32 %v1021_v53, %v1004_v43 }
 0x60d   : > { %v1024_v56 = vpack.c.bf16 %v1023_v55, %v1022_v54 }
 0x60f   : > { %1101 = vmatmul.bf16.vlgmr.msra.gmra.mxu3 %v1024_v56 }
 0x692   : > { %v1102_v58 = vpop.f32.mrf.mxu3 }
 0x693   : > { %v1103_v59 = vadd.f32 %v1373_v57, %v1102_v58 }
 0x695   : > { %v1107_v60 = vadd.f32 %v1103_v59, %v966_v24 }
 0x697   : > { %v1111_v61 = vsel %vm511_vm0, %v1107_v60, 0.0 }
 0x698   : > { %1112 = vadd.xlane.f32.xlu1 %v1111_v61 }
 0x69a   : > { %v1104_v62 = vpop.f32.mrf.mxu3 }
 0x69b   : > { %v1105_v63 = vadd.f32 %v1373_v57, %v1104_v62 }
 0x69d   : > { %v1108_v0 = vadd.f32 %v1105_v63, %v967_v25 }
 0x69f   : > { %v1114_v4 = vsel %vm511_vm0, %v1108_v0, 0.0 }
 0x6a0   : > { %1115 = vadd.xlane.f32.xlu1 %v1114_v4 }
 0x70b   : > { %v1113_v1 = vpop.xlane.xlu1 %1112 }
 0x70c   : > { %v1117_v5 = vmul.f32 %v1113_v1, %v1627_v48 }
 0x70e   : > { %v1119_v6 = vsub.f32 %v1107_v60, %v1117_v5 }
 0x710   : > { %v1121_v7 = vmul.f32 %v1119_v6, %v1119_v6 }
 0x712   : > { %v1123_v8 = vsel %vm511_vm0, %v1121_v7, 0.0 }
 0x713   : > { %1124 = vadd.xlane.f32.xlu1 %v1123_v8  ;;  %v1116_v9 = vpop.xlane.xlu1 %1115 }
 0x714   : > { %v1118_v10 = vmul.f32 %v1116_v9, %v1627_v48 }
 0x716   : > { %v1120_v12 = vsub.f32 %v1108_v0, %v1118_v10 }
 0x718   : > { %v1122_v13 = vmul.f32 %v1120_v12, %v1120_v12 }
 0x71a   : > { %v1126_v14 = vsel %vm511_vm0, %v1122_v13, 0.0 }
 0x71b   : > { %1127 = vadd.xlane.f32.xlu2 %v1126_v14 }
 0x786   : > { %v1125_v15 = vpop.xlane.xlu1 %1124 }
 0x787   : > { %v1129_v16 = vmul.f32 %v1125_v15, %v1627_v48 }
 0x789   : > { %v1131_v17 = vadd.f32 1e-05, %v1129_v16 }
 0x78b   : > { %1418 = vrsqrt.f32 %v1131_v17  ;;  %vm1139_vm13 = vweird.f32 %v1131_v17 }
 0x78e   : > { %v1128_v18 = vpop.xlane.xlu2 %1127 }
 0x78f   : > { %v1130_v19 = vmul.f32 %v1128_v18, %v1627_v48 }
 0x791   : > { %v1419_v20 = vpop.eup %1418  ;;  %v1132_v21 = vadd.f32 1e-05, %v1130_v19 }
 0x792   : > { %v1134_v22 = vmul.f32 %v1419_v20, %v1131_v17  ;;  %vm1140_vm12 = vweird.f32 %v1419_v20 }
 0x793   : > { %1420 = vrsqrt.f32 %v1132_v21  ;;  %vm1141_vm14 = vmor %vm1139_vm13, %vm1140_vm12  ;;  %vm1149_vm1 = vweird.f32 %v1132_v21 }
 0x794   : > { %v1135_v23 = vmul.f32 %v1419_v20, %v1134_v22 }
 0x796   : > { %v1136_v24 = vmul.f32 0.5, %v1135_v23 }
 0x798   : > { %v1137_v25 = vsub.f32 1.5, %v1136_v24 }
 0x799   : > { %v1421_v26 = vpop.eup %1420 }
 0x79a   : > { %v1138_v27 = vmul.f32 %v1419_v20, %v1137_v25  ;;  %v1144_v28 = vmul.f32 %v1421_v26, %v1132_v21  ;;  %vm1150_vm15 = vweird.f32 %v1421_v26 }
 0x79b   : > { %vm1151_vm2 = vmor %vm1149_vm1, %vm1150_vm15 }
 0x79c   : > { %v1142_v30 = vsel %vm1141_vm14, %v1419_v20, %v1138_v27  ;;  %v1145_v48 = vmul.f32 %v1421_v26, %v1144_v28 }
 0x79d   : > { %v1153_v32 = vmul.f32 %v1142_v30, %v1119_v6 }
 0x79e   : > { %v1146_v33 = vmul.f32 0.5, %v1145_v48 }
 0x79f   : > { %v1158_v34 = vmul.f32 %v1374_v29, %v1153_v32 }
 0x7a0   : > { %v1147_v35 = vsub.f32 1.5, %v1146_v33 }
 0x7a1   : > { %v1163_v36 = vadd.f32 %v1375_v31, %v1158_v34 }
 0x7a2   : > { %v1148_v37 = vmul.f32 %v1421_v26, %v1147_v35 }
 0x7a3   : > { %1165 = vst.msk [vmem:[%s484_s17] sm:$0xff] %vm511_vm0, %v1163_v36 }
 0x7a4   : > { %v1152_v38 = vsel %vm1151_vm2, %v1421_v26, %v1148_v37 }
 0x7a5   : > { %v1154_v39 = vmul.f32 %v1152_v38, %v1120_v12 }
 0x7a7   : > { %v1159_v40 = vmul.f32 %v1374_v29, %v1154_v39 }
 0x7a9   : > { %v1164_v41 = vadd.f32 %v1375_v31, %v1159_v40 }
 0x7ab   : > { %1166 = vst.msk [vmem:[%s484_s17 + $0x8] sm:$0xff] %vm511_vm0, %v1164_v41 }
 0x7ac PF: > { %s24_s29 = sadd.s32 1, %s1428_s29  }
 0x7ad   : > { %p21_p4 = scmp.ge.s32.totalorder %s24_s29, 4  }
 0x7af   :  { %23 = sbr.rel (!%p21_p4) target bundleno = 1 (0x1), region = 109 }

// kernel: hybrid_blip2_flamingo_forward.19
= control target key start
LH: loop header
LB: loop body
LE: loop exit
PB: predicated region body
PF: predicated region fallthrough
CT: control target
= control target key end

     0   :  { %s1575_s18 = smov 0   ;;  %s1756_s0 = inlined_call_operand.vmem [shape: f32[2,16,32], index: 0, kind: input, shape index: {}, may-alias: {0,1}]   ;;  %s1757_s1 = inlined_call_operand.vmem [shape: f32[2,16,32], index: 1, kind: input, shape index: {}, may-alias: {0,1}]   ;;  %s1758_s2 = inlined_call_operand.vmem [shape: f32[2,16,16], index: 2, kind: input, shape index: {}]   ;;  %s1759_s3 = inlined_call_operand.vmem [shape: bf16[32,96], index: 3, kind: input, shape index: {}]   ;;  %s1760_s4 = inlined_call_operand.vmem [shape: f32[1,96], index: 4, kind: input, shape index: {}]   ;;  %s1761_s5 = inlined_call_operand.vmem [shape: bf16[32,32], index: 5, kind: input, shape index: {}]   ;;  %s1762_s6 = inlined_call_operand.vmem [shape: f32[1,32], index: 6, kind: input, shape index: {}]   ;;  %s1763_s7 = inlined_call_operand.vmem [shape: f32[1,32], index: 7, kind: input, shape index: {}]   ;;  %s1764_s8 = inlined_call_operand.vmem [shape: f32[1,32], index: 8, kind: input, shape index: {}]   ;;  %s1765_s9 = inlined_call_operand.vmem [shape: bf16[32,128], index: 9, kind: input, shape index: {}]   ;;  %s1766_s10 = inlined_call_operand.vmem [shape: f32[1,128], index: 10, kind: input, shape index: {}]   ;;  %s1767_s11 = inlined_call_operand.vmem [shape: bf16[128,32], index: 11, kind: input, shape index: {}]   ;;  %s1768_s12 = inlined_call_operand.vmem [shape: f32[1,32], index: 12, kind: input, shape index: {}]   ;;  %s1769_s13 = inlined_call_operand.vmem [shape: f32[1,32], index: 13, kind: input, shape index: {}]   ;;  %s1770_s14 = inlined_call_operand.vmem [shape: f32[1,32], index: 14, kind: input, shape index: {}]   ;;  %s1771_s15 = inlined_call_operand.vmem [shape: f32[2,16,32], index: 15, kind: output, shape index: {}]  }
   0x1 LB: > { %s1283_s19 = sadd.s32 4294967295, %s1478_s18   ;;  %p1287_p0 = scmp.ge.s32.totalorder %s1478_s18, 1  ;;  %s1478_s18 = sphi %s1575_s18, %s25_s18  }
   0x2   : > { %p457_p1 = scmp.lt.s32.totalorder %s1478_s18, 3 }
   0x4   : > { %p458_p2 = pnand %p1287_p0, %p457_p1 }
   0x5   : > { %p515_p3 = scmp.lt.s32.totalorder (!%p458_p2), %s1283_s19, 1  ;;  %s1481_s20 = smov (!%p458_p2), 72  }
   0x6   : > { %461 = sbr.rel (%p458_p2) target bundleno = 1953 (0x7a1), region = 80  ;;  %s1482_s21 = smov (!%p458_p2), 96  }
   0x7   : > { %s1483_s22 = smov (!%p458_p2), 80   ;;  %s1484_s23 = smov (!%p458_p2), 88  }
   0x8   : > { %s1485_s25 = smov (!%p458_p2), 112   ;;  %s1486_s26 = smov (!%p458_p2), 104  }
   0x9   : > { %s1488_s16 = smov (!%p458_p2), 64   ;;  %s1489_s17 = smov (!%p458_p2), 48  }
   0xb   : > { %v1371_v0 = vld [vmem:[%s1759_s3 + $0x8] sm:$0xff]  ;;  %v1370_v1 = vld [vmem:[%s1759_s3] sm:$0xff]  ;;  %s1773_s19 = smov (!%p515_p3, %s1283_s19), 1  ;;  %vm562_vm0 = vcmask 261120   ;;  %vm602_vm1 = vcmask 64512   ;;  %vm629_vm2 = vcmask 130048  }
   0xc   : > { %572 = vmatpush.bf16.msra.mxu0 %v1371_v0  ;;  %589 = vmatpush.bf16.msra.mxu1 %v1371_v0  ;;  %s1589_s24 = sshll.u32 %s1773_s19, 4  ;;  %v1422_v10 = vld [vmem:[%s1760_s4] ss:$0 sm:$0xff]  ;;  %s1480_s19 = smov 120   ;;  %vm915_vm3 = vcmask 195584  }
   0xd   : > { %s519_s27 = scalar_lea.vmem %s1756_s0, %s1589_s24  ;;  %s524_s30 = scalar_lea.vmem %s1757_s1, %s1589_s24 }
   0xe   : > { %v1595_v2 = vld [vmem:[%s519_s27] sm:$0xff]  ;;  %v1597_v3 = vld [vmem:[%s519_s27 + $0x8] sm:$0xff]  ;;  %s529_s29 = scalar_lea.vmem %s1758_s2, %s1589_s24 }
   0xf   : > { %v538_v4 = vpack.c.bf16 %v1597_v3, %v1595_v2  ;;  %v539_v5 = vld [vmem:[%s524_s30] sm:$0xff]  ;;  %v540_v6 = vld [vmem:[%s524_s30 + $0x8] sm:$0xff]  ;;  %s1487_s30 = smov 56  }
  0x10   : > { %573 = vmatpush.bf16.msra.mxu0 %v1370_v1  ;;  %590 = vmatpush.bf16.msra.mxu1 %v1370_v1  ;;  %v541_v7 = vpack.c.bf16 %v540_v6, %v539_v5  ;;  %v625_v31 = vld [vmem:[%s529_s29] sm:$0xff]  ;;  %v626_v44 = vld [vmem:[%s529_s29 + $0x8] sm:$0xff] }
  0x13   : > { %1304 = vmatmul.msk.bf16.vlgmr.msra.gmra.mxu0 %vm562_vm0, %v538_v4  ;;  %1305 = vmatmul.msk.bf16.vlgmr.msra.gmra.mxu1 %vm562_vm0, %v541_v7 }
  0x90   : > { %v575_v8 = vpop.f32.mrf.mxu0  ;;  %v592_v9 = vpop.f32.mrf.mxu1 }
  0x91   : > { %v576_v12 = vadd.f32 %v1422_v10, %v575_v8  ;;  %v593_v15 = vadd.f32 %v1422_v10, %v592_v9 }
  0x98   : > { %v577_v11 = vpop.f32.mrf.mxu0  ;;  %v594_v14 = vpop.f32.mrf.mxu1 }
  0x99   : > { %v578_v13 = vadd.f32 %v1422_v10, %v577_v11  ;;  %v595_v16 = vadd.f32 %v1422_v10, %v594_v14 }
  0x9b   : > { %v597_v17 = vpack.c.bf16 %v578_v13, %v576_v12  ;;  %v1610_v18 = vpack.c.bf16 %v595_v16, %v593_v15 }
  0x9d   : > { %674 = vrot.lane.b32.xlu1 %v597_v17, %s1480_s19  ;;  %818 = vrot.lane.b32.xlu2 %v1610_v18, %s1481_s20  ;;  %s1490_s19 = smov 40   ;;  %s1491_s20 = smov 8  }
  0x9e   : > { %600 = vrot.lane.b32.xlu0 %v1610_v18, %s1482_s21  ;;  %s1492_s21 = smov 16  }
  0xa5   : > { %747 = vrot.lane.b32.xlu1 %v1610_v18, %s1483_s22  ;;  %745 = vrot.lane.b32.xlu2 %v597_v17, %s1485_s25  ;;  %s1493_s22 = smov 24   ;;  %s534_s25 = scalar_lea.vmem %s1771_s15, %s1589_s24 }
  0xa6   : > { %676 = vrot.lane.b32.xlu0 %v1610_v18, %s1484_s23 }
  0xae   : > { %816 = vrot.lane.b32.xlu0 %v597_v17, %s1486_s26 }
  0xf7   : > { %v819_v22 = vpop.permute.xlu2 %818 }
  0xf8   : > { %v824_v27 = vsel %vm602_vm1, %v819_v22, 0 }
  0xff   : > { %v746_v28 = vpop.permute.xlu2 %745 }
 0x10f   : > { %v675_v19 = vpop.permute.xlu1 %674 }
 0x110   : > { %v601_v20 = vpop.permute.xlu0 %600 }
 0x111   : > { %v607_v21 = vsel %vm602_vm1, %v601_v20, 0 }
 0x112   : > { %616 = vmatpush.bf16.xpose.msra.mxu2 %v607_v21 }
 0x117   : > { %v748_v23 = vpop.permute.xlu1 %747 }
 0x118   : > { %v677_v24 = vpop.permute.xlu0 %676  ;;  %v753_v25 = vsel %vm602_vm1, %v748_v23, 0 }
 0x119   : > { %1306 = vmatmul.msk.bf16.vlgmr.msra.gmra.mxu2 %vm602_vm1, %v597_v17  ;;  %v682_v26 = vsel %vm602_vm1, %v677_v24, 0  ;;  %762 = vmatpush.bf16.xpose.msrb.mxu1 %v753_v25 }
 0x11a   : > { %691 = vmatpush.bf16.xpose.msra.mxu3 %v682_v26 }
 0x120   : > { %1310 = vmatmul.msk.bf16.vlgmr.msrb.gmra.mxu1 %vm602_vm1, %v746_v28  ;;  %v817_v29 = vpop.permute.xlu0 %816 }
 0x121   : > { %1308 = vmatmul.msk.bf16.vlgmr.msra.gmra.mxu3 %vm602_vm1, %v675_v19 }
 0x122   : > { %833 = vmatpush.bf16.xpose.msrb.mxu3 %v824_v27 }
 0x131   : > { %1312 = vmatmul.msk.bf16.vlgmr.msrb.gmra.mxu3 %vm602_vm1, %v817_v29 }
 0x19c   : > { %v618_v30 = vpop.f32.mrf.mxu2 }
 0x19d   : > { %v623_v32 = vmul.f32 0.35355338, %v618_v30  ;;  %v764_v33 = vpop.f32.mrf.mxu1 }
 0x19e   : > { %v769_v35 = vmul.f32 0.35355338, %v764_v33 }
 0x19f   : > { %v627_v34 = vadd.f32 %v625_v31, %v623_v32 }
 0x1a0   : > { %v771_v40 = vadd.f32 %v769_v35, %v625_v31 }
 0x1a1   : > { %v630_v36 = vsel %vm629_vm2, %v627_v34, -inf }
 0x1a2   : > { %631 = vmax.xlane.f32.xlu1 %v630_v36  ;;  %v773_v47 = vsel %vm629_vm2, %v771_v40, -inf }
 0x1a4   : > { %v693_v37 = vpop.f32.mrf.mxu3  ;;  %v620_v42 = vpop.f32.mrf.mxu2 }
 0x1a5   : > { %v698_v38 = vmul.f32 0.35355338, %v693_v37  ;;  %v766_v39 = vpop.f32.mrf.mxu1  ;;  %v624_v48 = vmul.f32 0.35355338, %v620_v42 }
 0x1a6   : > { %v770_v41 = vmul.f32 0.35355338, %v766_v39 }
 0x1a7   : > { %v700_v43 = vadd.f32 %v698_v38, %v625_v31  ;;  %v628_v51 = vadd.f32 %v626_v44, %v624_v48 }
 0x1a8   : > { %v772_v45 = vadd.f32 %v770_v41, %v626_v44 }
 0x1a9   : > { %v702_v46 = vsel %vm629_vm2, %v700_v43, -inf  ;;  %v633_v53 = vsel %vm629_vm2, %v628_v51, -inf }
 0x1aa   : > { %703 = vmax.xlane.f32.xlu0 %v702_v46  ;;  %774 = vmax.xlane.f32.xlu1 %v773_v47  ;;  %v776_v49 = vsel %vm629_vm2, %v772_v45, -inf }
 0x1ab   : > { %777 = vmax.xlane.f32.xlu2 %v776_v49 }
 0x1ac   : > { %v695_v50 = vpop.f32.mrf.mxu3 }
 0x1ad   : > { %v699_v52 = vmul.f32 0.35355338, %v695_v50 }
 0x1af   : > { %v701_v56 = vadd.f32 %v699_v52, %v626_v44 }
 0x1b1   : > { %v705_v59 = vsel %vm629_vm2, %v701_v56, -inf }
 0x1b3   : > { %634 = vmax.xlane.f32.xlu2 %v633_v53 }
 0x1b4   : > { %v835_v54 = vpop.f32.mrf.mxu3 }
 0x1b5   : > { %v840_v55 = vmul.f32 0.35355338, %v835_v54 }
 0x1b7   : > { %v842_v57 = vadd.f32 %v840_v55, %v625_v31 }
 0x1b9   : > { %v844_v58 = vsel %vm629_vm2, %v842_v57, -inf }
 0x1ba   : > { %845 = vmax.xlane.f32.xlu0 %v844_v58 }
 0x1bb   : > { %706 = vmax.xlane.f32.xlu2 %v705_v59 }
 0x1bc   : > { %v837_v60 = vpop.f32.mrf.mxu3 }
 0x1bd   : > { %v841_v61 = vmul.f32 0.35355338, %v837_v60 }
 0x1bf   : > { %v843_v62 = vadd.f32 %v841_v61, %v626_v44 }
 0x1c1   : > { %v847_v63 = vsel %vm629_vm2, %v843_v62, -inf }
 0x1c2   : > { %848 = vmax.xlane.f32.xlu1 %v847_v63 }
 0x1d3   : > { %725 = vrot.lane.b32.xlu2 %v1610_v18, %s1487_s30 }
 0x1db   : > { %653 = vrot.lane.b32.xlu1 %v1610_v18, %s1488_s16 }
 0x215   : > { %v632_v0 = vpop.xlane.xlu1 %631 }
 0x216   : > { %v636_v1 = vsub.f32 %v627_v34, %v632_v0 }
 0x218   : > { %v638_v4 = vmul.f32 1.442695, %v636_v1 }
 0x21a   : > { %1430 = vpow2.f32 %v638_v4 }
 0x21d   : > { %v704_v5 = vpop.xlane.xlu0 %703  ;;  %v775_v6 = vpop.xlane.xlu1 %774 }
 0x21e   : > { %v708_v7 = vsub.f32 %v700_v43, %v704_v5  ;;  %v779_v8 = vsub.f32 %v771_v40, %v775_v6  ;;  %v778_v9 = vpop.xlane.xlu2 %777 }
 0x21f   : > { %v780_v13 = vsub.f32 %v772_v45, %v778_v9 }
 0x220   : > { %v1638_v10 = vpop.eup %1430  ;;  %v710_v11 = vmul.f32 1.442695, %v708_v7  ;;  %v781_v12 = vmul.f32 1.442695, %v779_v8 }
 0x221   : > { %v642_v14 = vsel %vm629_vm2, %v1638_v10, 0.0  ;;  %v783_v15 = vmul.f32 1.442695, %v780_v13 }
 0x222   : > { %1432 = vpow2.f32 %v710_v11  ;;  %643 = vadd.xlane.f32.xlu2 %v642_v14 }
 0x223   : > { %1434 = vpow2.f32 %v781_v12 }
 0x224   : > { %1436 = vpow2.f32 %v783_v15 }
 0x226   : > { %v635_v16 = vpop.xlane.xlu2 %634 }
 0x227   : > { %v637_v20 = vsub.f32 %v628_v51, %v635_v16 }
 0x228   : > { %v1642_v17 = vpop.eup %1432 }
 0x229   : > { %v1435_v19 = vpop.eup %1434  ;;  %v714_v21 = vsel %vm629_vm2, %v1642_v17, 0.0  ;;  %v640_v23 = vmul.f32 1.442695, %v637_v20 }
 0x22a   : > { %v785_v22 = vsel %vm629_vm2, %v1435_v19, 0.0  ;;  %715 = vadd.xlane.f32.xlu2 %v714_v21  ;;  %v1437_v27 = vpop.eup %1436 }
 0x22b   : > { %786 = vadd.xlane.f32.xlu0 %v785_v22  ;;  %1438 = vpow2.f32 %v640_v23  ;;  %v788_v30 = vsel %vm629_vm2, %v1437_v27, 0.0 }
 0x22d   : > { %v846_v24 = vpop.xlane.xlu0 %845 }
 0x22e   : > { %v850_v25 = vsub.f32 %v842_v57, %v846_v24  ;;  %v707_v26 = vpop.xlane.xlu2 %706  ;;  %v1373_v24 = vld [vmem:[%s1761_s5 + $0x8] sm:$0xff] }
 0x22f   : > { %v709_v29 = vsub.f32 %v701_v56, %v707_v26  ;;  %948 = vmatpush.bf16.msra.mxu1 %v1373_v24 }
 0x230   : > { %v852_v28 = vmul.f32 1.442695, %v850_v25  ;;  %v1372_v25 = vld [vmem:[%s1761_s5] sm:$0xff] }
 0x231   : > { %v712_v31 = vmul.f32 1.442695, %v709_v29  ;;  %v1439_v33 = vpop.eup %1438 }
 0x232   : > { %1440 = vpow2.f32 %v852_v28  ;;  %v645_v37 = vsel %vm629_vm2, %v1439_v33, 0.0 }
 0x233   : > { %789 = vadd.xlane.f32.xlu0 %v788_v30  ;;  %1442 = vpow2.f32 %v712_v31  ;;  %949 = vmatpush.bf16.msra.mxu1 %v1372_v25 }
 0x235   : > { %v849_v32 = vpop.xlane.xlu1 %848 }
 0x236   : > { %v851_v35 = vsub.f32 %v843_v62, %v849_v32  ;;  %v726_v44 = vpop.permute.xlu2 %725 }
 0x238   : > { %v1648_v34 = vpop.eup %1440  ;;  %v854_v38 = vmul.f32 1.442695, %v851_v35 }
 0x239   : > { %v856_v36 = vsel %vm629_vm2, %v1648_v34, 0.0  ;;  %v1443_v39 = vpop.eup %1442 }
 0x23a   : > { %857 = vadd.xlane.f32.xlu1 %v856_v36  ;;  %1444 = vpow2.f32 %v854_v38  ;;  %v717_v40 = vsel %vm629_vm2, %v1443_v39, 0.0 }
 0x23b   : > { %646 = vadd.xlane.f32.xlu0 %v645_v37 }
 0x240   : > { %v1445_v41 = vpop.eup %1444 }
 0x241   : > { %v859_v42 = vsel %vm629_vm2, %v1445_v41, 0.0 }
 0x242   : > { %796 = vrot.lane.b32.xlu2 %v1610_v18, %s1489_s17 }
 0x243   : > { %718 = vadd.xlane.f32.xlu0 %v717_v40 }
 0x24b   : > { %860 = vadd.xlane.f32.xlu0 %v859_v42  ;;  %v1423_v42 = vld [vmem:[%s1762_s6] ss:$0 sm:$0xff] }
 0x24d   : > { %v654_v43 = vpop.permute.xlu1 %653 }
 0x24e   : > { %666 = vmatpush.bf16.msrb.mxu0 %v654_v43 }
 0x252   : > { %738 = vmatpush.bf16.msra.mxu0 %v726_v44 }
 0x25f   : > { %867 = vrot.lane.b32.xlu0 %v1610_v18, %s1490_s19 }
 0x295   : > { %v644_v45 = vpop.xlane.xlu2 %643 }
 0x29d   : > { %v716_v46 = vpop.xlane.xlu2 %715 }
 0x29e   : > { %v787_v47 = vpop.xlane.xlu0 %786 }
 0x29f   : > { %1446 = vrcp.f32 %v787_v47 }
 0x2a5   : > { %v797_v48 = vpop.permute.xlu2 %796  ;;  %v1447_v50 = vpop.eup %1446 }
 0x2a6   : > { %v790_v49 = vpop.xlane.xlu0 %789  ;;  %809 = vmatpush.bf16.msrb.mxu2 %v797_v48  ;;  %v793_v52 = vmul.f32 %v1447_v50, %v1435_v19 }
 0x2a7   : > { %1448 = vrcp.f32 %v790_v49 }
 0x2a8   : > { %1450 = vrcp.f32 %v644_v45 }
 0x2ad   : > { %v1449_v51 = vpop.eup %1448  ;;  %v858_v5 = vpop.xlane.xlu1 %857 }
 0x2ae   : > { %v794_v53 = vmul.f32 %v1449_v51, %v1437_v27  ;;  %v647_v54 = vpop.xlane.xlu0 %646  ;;  %v1451_v56 = vpop.eup %1450  ;;  %v1494_v51 = vmov 32.0  }
 0x2af   : > { %1452 = vrcp.f32 %v647_v54  ;;  %v650_v57 = vmul.f32 %v1451_v56, %v1638_v10 }
 0x2b0   : > { %v795_v55 = vpack.c.bf16 %v794_v53, %v793_v52 }
 0x2b2   : > { %1311 = vmatmul.msk.bf16.vlgmr.msrb.gmra.mxu2 %vm629_vm2, %v795_v55 }
 0x2b5   : > { %v1453_v18 = vpop.eup %1452 }
 0x2b6   : > { %v651_v58 = vmul.f32 %v1453_v18, %v1439_v33  ;;  %v719_v59 = vpop.xlane.xlu0 %718 }
 0x2b7   : > { %1454 = vrcp.f32 %v719_v59 }
 0x2b8   : > { %v652_v60 = vpack.c.bf16 %v651_v58, %v650_v57  ;;  %1456 = vrcp.f32 %v716_v46 }
 0x2ba   : > { %1307 = vmatmul.msk.bf16.vlgmr.msrb.gmra.mxu0 %vm629_vm2, %v652_v60 }
 0x2bd   : > { %v1455_v61 = vpop.eup %1454 }
 0x2be   : > { %v1457_v62 = vpop.eup %1456  ;;  %v723_v63 = vmul.f32 %v1455_v61, %v1443_v39  ;;  %v861_v4 = vpop.xlane.xlu0 %860 }
 0x2bf   : > { %v722_v0 = vmul.f32 %v1457_v62, %v1642_v17  ;;  %1458 = vrcp.f32 %v861_v4 }
 0x2c0   : > { %1460 = vrcp.f32 %v858_v5 }
 0x2c1   : > { %v724_v1 = vpack.c.bf16 %v723_v63, %v722_v0  ;;  %1462 = vrcp.f32 %v1494_v51  ;;  %v1427_v51 = vld [vmem:[%s1768_s12] ss:$0 sm:$0xff] }
 0x2c5   : > { %v1459_v6 = vpop.eup %1458 }
 0x2c6   : > { %v1461_v8 = vpop.eup %1460  ;;  %v865_v9 = vmul.f32 %v1459_v6, %v1445_v41  ;;  %v1374_v6 = vld [vmem:[%s1765_s9] sm:$0xff] }
 0x2c7   : > { %v864_v10 = vmul.f32 %v1461_v8, %v1648_v34  ;;  %v1463_v52 = vpop.eup %1462  ;;  %v1383_v8 = vld [vmem:[%s1767_s11 + $0x38] sm:$0xff] }
 0x2c8   : > { %v967_v53 = vmul.f32 32.0, %v1463_v52  ;;  %vm971_vm4 = vweird.f32 %v1463_v52  ;;  %1130 = vmatpush.bf16.msra.mxu3 %v1383_v8 }
 0x2c9   : > { %v866_v11 = vpack.c.bf16 %v865_v9, %v864_v10 }
 0x2ca   : > { %1309 = vmatmul.msk.bf16.vlgmr.msra.gmra.mxu0 %vm629_vm2, %v724_v1  ;;  %v968_v54 = vsub.f32 1.0, %v967_v53  ;;  %v1375_v1 = vld [vmem:[%s1765_s9 + $0x8] sm:$0xff] }
 0x2cb   : > { %1051 = vmatpush.bf16.msra.mxu2 %v1375_v1 }
 0x2cc   : > { %v969_v55 = vmul.f32 %v1463_v52, %v968_v54 }
 0x2ce   : > { %v970_v56 = vadd.f32 %v1463_v52, %v969_v55 }
 0x2cf   : > { %1052 = vmatpush.bf16.msra.mxu2 %v1374_v6 }
 0x2d0   : > { %v1682_v18 = vsel %vm971_vm4, %v1463_v52, %v970_v56 }
 0x2d1   : > { %v868_v7 = vpop.permute.xlu0 %867 }
 0x2d2   : > { %880 = vmatpush.bf16.msrb.mxu0 %v868_v7 }
 0x2da   : > { %1313 = vmatmul.msk.bf16.vlgmr.msrb.gmra.mxu0 %vm629_vm2, %v866_v11  ;;  %v1382_v11 = vld [vmem:[%s1767_s11 + $0x30] sm:$0xff] }
 0x2db   : > { %1131 = vmatpush.bf16.msra.mxu3 %v1382_v11 }
 0x335   : > { %v811_v15 = vpop.f32.mrf.mxu2 }
 0x337   : > { %v668_v12 = vpop.f32.mrf.mxu0 }
 0x33d   : > { %v813_v19 = vpop.f32.mrf.mxu2 }
 0x33e   : > { %v1412_v21 = vpack.i.bf16 %v813_v19, %v811_v15  ;;  %v1381_v15 = vld [vmem:[%s1767_s11 + $0x28] sm:$0xff]  ;;  %v1380_v19 = vld [vmem:[%s1767_s11 + $0x20] sm:$0xff] }
 0x33f   : > { %v670_v13 = vpop.f32.mrf.mxu0  ;;  %1132 = vmatpush.bf16.msra.mxu3 %v1381_v15 }
 0x343   : > { %1133 = vmatpush.bf16.msra.mxu3 %v1380_v19 }
 0x347   : > { %v740_v14 = vpop.f32.mrf.mxu0 }
 0x34f   : > { %v742_v16 = vpop.f32.mrf.mxu0 }
 0x350   : > { %v1407_v17 = vpack.i.bf16 %v742_v16, %v740_v14 }
 0x352   : > { %1408 = vrot.lane.b32.xlu2 %v1407_v17, %s1491_s20 }
 0x357   : > { %v882_v20 = vpop.f32.mrf.mxu0 }
 0x35a   : > { %1413 = vrot.lane.b32.xlu2 %v1412_v21, %s1492_s21 }
 0x35f   : > { %v884_v22 = vpop.f32.mrf.mxu0 }
 0x360   : > { %v1417_v23 = vpack.i.bf16 %v884_v22, %v882_v20 }
 0x362   : > { %1418 = vrot.lane.b32.xlu0 %v1417_v23, %s1493_s22 }
 0x3ac   : > { %v1409_v26 = vpop.permute.xlu2 %1408 }
 0x3ad   : > { %v1411_v28 = vunpack.i.h.bf16 %v1409_v26  ;;  %v1410_v29 = vunpack.i.l.bf16 %v1409_v26 }
 0x3af   : > { %v912_v33 = vsel %vm602_vm1, %v670_v13, %v1411_v28  ;;  %v911_v34 = vsel %vm602_vm1, %v668_v12, %v1410_v29  ;;  %v1424_v28 = vld [vmem:[%s1763_s7] ss:$0 sm:$0xff] }
 0x3b4   : > { %v1414_v27 = vpop.permute.xlu2 %1413 }
 0x3b5   : > { %v1416_v30 = vunpack.i.h.bf16 %v1414_v27  ;;  %v1415_v31 = vunpack.i.l.bf16 %v1414_v27 }
 0x3b7   : > { %v913_v37 = vsel %vm629_vm2, %v911_v34, %v1415_v31  ;;  %v914_v38 = vsel %vm629_vm2, %v912_v33, %v1416_v30 }
 0x3d4   : > { %v1419_v32 = vpop.permute.xlu0 %1418 }
 0x3d5   : > { %v1421_v35 = vunpack.i.h.bf16 %v1419_v32  ;;  %v1420_v36 = vunpack.i.l.bf16 %v1419_v32  ;;  %v1425_v32 = vld [vmem:[%s1764_s8] ss:$0 sm:$0xff] }
 0x3d7   : > { %v916_v39 = vsel %vm915_vm3, %v913_v37, %v1420_v36  ;;  %v917_v40 = vsel %vm915_vm3, %v914_v38, %v1421_v35 }
 0x3d8   : > { %v918_v41 = vpack.c.bf16 %v917_v40, %v916_v39  ;;  %v1379_v39 = vld [vmem:[%s1767_s11 + $0x18] sm:$0xff]  ;;  %v1378_v40 = vld [vmem:[%s1767_s11 + $0x10] sm:$0xff] }
 0x3d9   : > { %1134 = vmatpush.bf16.msra.mxu3 %v1379_v39 }
 0x3da   : > { %1322 = vmatmul.msk.bf16.vlgmr.msra.gmra.mxu1 %vm562_vm0, %v918_v41  ;;  %v1377_v41 = vld [vmem:[%s1767_s11 + $0x8] sm:$0xff] }
 0x3dd   : > { %1135 = vmatpush.bf16.msra.mxu3 %v1378_v40 }
 0x3e1   : > { %1136 = vmatpush.bf16.msra.mxu3 %v1377_v41 }
 0x457   : > { %v951_v43 = vpop.f32.mrf.mxu1 }
 0x458   : > { %v952_v44 = vadd.f32 %v1423_v42, %v951_v43 }
 0x45a   : > { %v956_v45 = vadd.f32 %v952_v44, %v1595_v2  ;;  %v1426_v44 = vld [vmem:[%s1766_s10] ss:$0 sm:$0xff] }
 0x45c   : > { %v960_v46 = vsel %vm562_vm0, %v956_v45, 0.0 }
 0x45d   : > { %961 = vadd.xlane.f32.xlu2 %v960_v46 }
 0x45f   : > { %v953_v47 = vpop.f32.mrf.mxu1 }
 0x460   : > { %v954_v48 = vadd.f32 %v1423_v42, %v953_v47  ;;  %v1376_v42 = vld [vmem:[%s1767_s11] sm:$0xff] }
 0x461   : > { %1137 = vmatpush.bf16.msra.mxu3 %v1376_v42 }
 0x462   : > { %v957_v49 = vadd.f32 %v954_v48, %v1597_v3 }
 0x464   : > { %v963_v50 = vsel %vm562_vm0, %v957_v49, 0.0 }
 0x465   : > { %964 = vadd.xlane.f32.xlu1 %v963_v50 }
 0x4d0   : > { %v962_v2 = vpop.xlane.xlu2 %961 }
 0x4d1   : > { %v973_v57 = vmul.f32 %v1682_v18, %v962_v2 }
 0x4d3   : > { %v975_v58 = vsub.f32 %v956_v45, %v973_v57 }
 0x4d5   : > { %v977_v59 = vmul.f32 %v975_v58, %v975_v58 }
 0x4d7   : > { %v979_v3 = vsel %vm562_vm0, %v977_v59, 0.0 }
 0x4d8   : > { %v965_v60 = vpop.xlane.xlu1 %964  ;;  %980 = vadd.xlane.f32.xlu0 %v979_v3 }
 0x4d9   : > { %v974_v61 = vmul.f32 %v1682_v18, %v965_v60 }
 0x4db   : > { %v976_v62 = vsub.f32 %v957_v49, %v974_v61 }
 0x4dd   : > { %v978_v63 = vmul.f32 %v976_v62, %v976_v62 }
 0x4df   : > { %v982_v0 = vsel %vm562_vm0, %v978_v63, 0.0 }
 0x4e0   : > { %983 = vadd.xlane.f32.xlu1 %v982_v0 }
 0x54b   : > { %v981_v4 = vpop.xlane.xlu0 %980 }
 0x54c   : > { %v985_v5 = vmul.f32 %v981_v4, %v1682_v18 }
 0x54e   : > { %v987_v7 = vadd.f32 1e-05, %v985_v5 }
 0x550   : > { %1464 = vrsqrt.f32 %v987_v7  ;;  %vm995_vm6 = vweird.f32 %v987_v7 }
 0x553   : > { %v984_v9 = vpop.xlane.xlu1 %983 }
 0x554   : > { %v986_v10 = vmul.f32 %v984_v9, %v1682_v18 }
 0x556   : > { %v1465_v12 = vpop.eup %1464  ;;  %v988_v13 = vadd.f32 1e-05, %v986_v10 }
 0x557   : > { %v990_v14 = vmul.f32 %v1465_v12, %v987_v7  ;;  %vm996_vm5 = vweird.f32 %v1465_v12 }
 0x558   : > { %1466 = vrsqrt.f32 %v988_v13  ;;  %vm997_vm7 = vmor %vm995_vm6, %vm996_vm5  ;;  %vm1005_vm9 = vweird.f32 %v988_v13 }
 0x559   : > { %v991_v16 = vmul.f32 %v1465_v12, %v990_v14 }
 0x55b   : > { %v992_v17 = vmul.f32 0.5, %v991_v16 }
 0x55d   : > { %v993_v20 = vsub.f32 1.5, %v992_v17 }
 0x55e   : > { %v1467_v21 = vpop.eup %1466 }
 0x55f   : > { %v994_v22 = vmul.f32 %v1465_v12, %v993_v20  ;;  %v1000_v23 = vmul.f32 %v1467_v21, %v988_v13  ;;  %vm1006_vm8 = vweird.f32 %v1467_v21 }
 0x560   : > { %vm1007_vm10 = vmor %vm1005_vm9, %vm1006_vm8 }
 0x561   : > { %v1001_v24 = vmul.f32 %v1467_v21, %v1000_v23  ;;  %v998_v25 = vsel %vm997_vm7, %v1465_v12, %v994_v22  ;;  %v1429_v23 = vld [vmem:[%s1770_s14] ss:$0 sm:$0xff] }
 0x562   : > { %v1009_v29 = vmul.f32 %v998_v25, %v975_v58 }
 0x563   : > { %v1002_v26 = vmul.f32 0.5, %v1001_v24 }
 0x564   : > { %v1014_v33 = vmul.f32 %v1424_v28, %v1009_v29 }
 0x565   : > { %v1003_v27 = vsub.f32 1.5, %v1002_v26 }
 0x566   : > { %v1019_v36 = vadd.f32 %v1425_v32, %v1014_v33 }
 0x567   : > { %v1004_v30 = vmul.f32 %v1467_v21, %v1003_v27 }
 0x569   : > { %v1008_v31 = vsel %vm1007_vm10, %v1467_v21, %v1004_v30  ;;  %v1428_v21 = vld [vmem:[%s1769_s13] ss:$0 sm:$0xff] }
 0x56a   : > { %v1010_v34 = vmul.f32 %v1008_v31, %v976_v62 }
 0x56c   : > { %v1015_v35 = vmul.f32 %v1424_v28, %v1010_v34 }
 0x56e   : > { %v1020_v37 = vadd.f32 %v1425_v32, %v1015_v35 }
 0x570   : > { %v1021_v38 = vpack.c.bf16 %v1020_v37, %v1019_v36 }
 0x572   : > { %1331 = vmatmul.msk.bf16.vlgmr.msra.gmra.mxu2 %vm562_vm0, %v1021_v38 }
 0x5f5   : > { %v1054_v43 = vpop.f32.mrf.mxu2 }
 0x5f6   : > { %v1055_v45 = vadd.f32 %v1426_v44, %v1054_v43 }
 0x5f8   : > { %v1059_v48 = vmax.f32 %v1055_v45, 0.0 }
 0x5fd   : > { %v1056_v46 = vpop.f32.mrf.mxu2 }
 0x5fe   : > { %v1057_v47 = vadd.f32 %v1426_v44, %v1056_v46 }
 0x600   : > { %v1060_v49 = vmax.f32 %v1057_v47, 0.0 }
 0x602   : > { %v1061_v50 = vpack.c.bf16 %v1060_v49, %v1059_v48 }
 0x604   : > { %1138 = vmatmul.bf16.vlgmr.msra.gmra.mxu3 %v1061_v50 }
 0x687   : > { %v1139_v52 = vpop.f32.mrf.mxu3 }
 0x688   : > { %v1140_v53 = vadd.f32 %v1427_v51, %v1139_v52 }
 0x68a   : > { %v1144_v54 = vadd.f32 %v1140_v53, %v1019_v36 }
 0x68c   : > { %v1148_v55 = vsel %vm562_vm0, %v1144_v54, 0.0 }
 0x68d   : > { %1149 = vadd.xlane.f32.xlu1 %v1148_v55 }
 0x68f   : > { %v1141_v56 = vpop.f32.mrf.mxu3 }
 0x690   : > { %v1142_v2 = vadd.f32 %v1427_v51, %v1141_v56 }
 0x692   : > { %v1145_v57 = vadd.f32 %v1142_v2, %v1020_v37 }
 0x694   : > { %v1151_v58 = vsel %vm562_vm0, %v1145_v57, 0.0 }
 0x695   : > { %1152 = vadd.xlane.f32.xlu1 %v1151_v58 }
 0x700   : > { %v1150_v59 = vpop.xlane.xlu1 %1149 }
 0x701   : > { %v1154_v3 = vmul.f32 %v1150_v59, %v1682_v18 }
 0x703   : > { %v1156_v60 = vsub.f32 %v1144_v54, %v1154_v3 }
 0x705   : > { %v1158_v61 = vmul.f32 %v1156_v60, %v1156_v60 }
 0x707   : > { %v1160_v62 = vsel %vm562_vm0, %v1158_v61, 0.0 }
 0x708   : > { %1161 = vadd.xlane.f32.xlu1 %v1160_v62  ;;  %v1153_v63 = vpop.xlane.xlu1 %1152 }
 0x709   : > { %v1155_v0 = vmul.f32 %v1153_v63, %v1682_v18 }
 0x70b   : > { %v1157_v1 = vsub.f32 %v1145_v57, %v1155_v0 }
 0x70d   : > { %v1159_v4 = vmul.f32 %v1157_v1, %v1157_v1 }
 0x70f   : > { %v1163_v5 = vsel %vm562_vm0, %v1159_v4, 0.0 }
 0x710   : > { %1164 = vadd.xlane.f32.xlu2 %v1163_v5 }
 0x77b   : > { %v1162_v6 = vpop.xlane.xlu1 %1161 }
 0x77c   : > { %v1166_v7 = vmul.f32 %v1162_v6, %v1682_v18 }
 0x77e   : > { %v1168_v8 = vadd.f32 1e-05, %v1166_v7 }
 0x780   : > { %1468 = vrsqrt.f32 %v1168_v8  ;;  %vm1176_vm12 = vweird.f32 %v1168_v8 }
 0x783   : > { %v1165_v9 = vpop.xlane.xlu2 %1164 }
 0x784   : > { %v1167_v10 = vmul.f32 %v1165_v9, %v1682_v18 }
 0x786   : > { %v1469_v11 = vpop.eup %1468  ;;  %v1169_v12 = vadd.f32 1e-05, %v1167_v10 }
 0x787   : > { %v1171_v13 = vmul.f32 %v1469_v11, %v1168_v8  ;;  %vm1177_vm11 = vweird.f32 %v1469_v11 }
 0x788   : > { %1470 = vrsqrt.f32 %v1169_v12  ;;  %vm1178_vm13 = vmor %vm1176_vm12, %vm1177_vm11  ;;  %vm1186_vm15 = vweird.f32 %v1169_v12 }
 0x789   : > { %v1172_v14 = vmul.f32 %v1469_v11, %v1171_v13 }
 0x78b   : > { %v1173_v15 = vmul.f32 0.5, %v1172_v14 }
 0x78d   : > { %v1174_v16 = vsub.f32 1.5, %v1173_v15 }
 0x78e   : > { %v1471_v17 = vpop.eup %1470 }
 0x78f   : > { %v1175_v19 = vmul.f32 %v1469_v11, %v1174_v16  ;;  %v1181_v20 = vmul.f32 %v1471_v17, %v1169_v12  ;;  %vm1187_vm14 = vweird.f32 %v1471_v17 }
 0x790   : > { %vm1188_vm1 = vmor %vm1186_vm15, %vm1187_vm14 }
 0x791   : > { %v1179_v22 = vsel %vm1178_vm13, %v1469_v11, %v1175_v19  ;;  %v1182_v18 = vmul.f32 %v1471_v17, %v1181_v20 }
 0x792   : > { %v1190_v24 = vmul.f32 %v1179_v22, %v1156_v60 }
 0x793   : > { %v1183_v25 = vmul.f32 0.5, %v1182_v18 }
 0x794   : > { %v1195_v26 = vmul.f32 %v1428_v21, %v1190_v24 }
 0x795   : > { %v1184_v27 = vsub.f32 1.5, %v1183_v25 }
 0x796   : > { %v1200_v28 = vadd.f32 %v1429_v23, %v1195_v26 }
 0x797   : > { %v1185_v29 = vmul.f32 %v1471_v17, %v1184_v27 }
 0x798   : > { %1202 = vst.msk [vmem:[%s534_s25] sm:$0xff] %vm562_vm0, %v1200_v28 }
 0x799   : > { %v1189_v30 = vsel %vm1188_vm1, %v1471_v17, %v1185_v29 }
 0x79a   : > { %v1191_v31 = vmul.f32 %v1189_v30, %v1157_v1 }
 0x79c   : > { %v1196_v32 = vmul.f32 %v1428_v21, %v1191_v31 }
 0x79e   : > { %v1201_v33 = vadd.f32 %v1429_v23, %v1196_v32 }
 0x7a0   : > { %1203 = vst.msk [vmem:[%s534_s25 + $0x8] sm:$0xff] %vm562_vm0, %v1201_v33 }
 0x7a1 PF: > { %s25_s18 = sadd.s32 1, %s1478_s18  }
 0x7a2   : > { %p22_p4 = scmp.ge.s32.totalorder %s25_s18, 4  }
 0x7a4   :  { %24 = sbr.rel (!%p22_p4) target bundleno = 1 (0x1), region = 116 }

</bundles_post_ra>
